<compile_context>
chip_gen: v7x
topology: tpu7x:2x2x1
jax: 0.10.0
libtpu: 0.0.40
codegen_flags: <defaults>
</compile_context>

<pallas_src>
import functools

import jax
import jax.numpy as jnp
from jax.experimental import pallas as pl
from jax.experimental.pallas import tpu as pltpu


def _softplus(x):
    # numerically-stable softplus; used in both kernel and reference so they
    # match elementwise exactly.
    return jnp.maximum(x, 0.0) + jnp.log1p(jnp.exp(-jnp.abs(x)))


def _elu(x):
    return jnp.where(x > 0, x, jnp.expm1(x))


def _relu(x):
    return jnp.maximum(x, 0.0)


_ACTIVATIONS = {"softplus": _softplus, "relu": _relu, "elu": _elu}


def _round_up(n, m):
    return ((n + m - 1) // m) * m


# --------------------------------------------------------------------------
# Kernel
# --------------------------------------------------------------------------
def basenet1a_kernel(*refs, n_layers, has_proj, activation, x_scale_static):
    """Fused BaseNet1a forward for one batch tile.

    Transposed layout: activations are (features, batch_tile); weights are
    PyTorch-style (out, in), so every layer is `W @ h + b` (no transposes).
    """
    act = _ACTIVATIONS[activation]

    if has_proj:
        (x_ref, wpx_ref, bpx_ref, w0a_ref, b0a_ref, w0b_ref, b0b_ref,
         w1a_ref, b1a_ref, w1b_ref, b1b_ref,
         wsc_ref, bsc_ref, w2s_ref, w2c_ref, b2_ref, y_ref) = refs
    else:
        (x_ref, w0a_ref, b0a_ref, w0b_ref, b0b_ref,
         w1a_ref, b1a_ref, w1b_ref, b1b_ref,
         wsc_ref, bsc_ref, w2s_ref, w2c_ref, b2_ref, y_ref) = refs

    def linear(w_ref, b_ref, h):
        return jnp.dot(w_ref[...], h, preferred_element_type=jnp.float32) + b_ref[...]

    x = x_ref[...].astype(jnp.float32)                      # (x_dim, bt)

    # ---- layer0: LinearRes(x_dim -> h_dim) --------------------------------
    if has_proj:
        # x_scale already folded into wpx / w0a by the wrapper.
        y_old = linear(wpx_ref, bpx_ref, x)
    else:
        # identity skip path: apply the preprocess scale once, in-kernel.
        sv = jnp.asarray(x_scale_static, jnp.float32).reshape(-1, 1)
        x = x * sv
        y_old = x
    y_new = linear(w0b_ref, b0b_ref, act(linear(w0a_ref, b0a_ref, x)))
    h = act(y_old + y_new)                                  # (h_dim, bt)

    # ---- layer1a: n_layers x LinearRes(h_dim -> h_dim), identity skip -----
    def res_block(l, h):
        z = jnp.dot(w1a_ref[l], h, preferred_element_type=jnp.float32) + b1a_ref[l]
        yn = jnp.dot(w1b_ref[l], act(z), preferred_element_type=jnp.float32) + b1b_ref[l]
        return act(h + yn)

    if n_layers > 0:
        if n_layers <= 4:
            for l in range(n_layers):                       # short: full unroll
                h = res_block(l, h)
        else:
            # deep stacks: bound vreg live ranges with a real loop
            h = jax.lax.fori_loop(0, n_layers, res_block, h, unroll=2)

    # ---- layer1b + layer2 fused: SinCos(h_dim -> 2*h_dim) then Linear ------
    # alpha folded into wsc; w2 pre-split into sin/cos halves so we never
    # materialize the concatenated (2*h_dim, bt) slab.
    # TODO(synk): optional bf16 sin/cos body on v6e/v7x (EUP-bound at scale).
    z = linear(wsc_ref, bsc_ref, h)                         # (h_dim, bt)
    y = (jnp.dot(w2s_ref[...], jnp.sin(z), preferred_element_type=jnp.float32)
         + jnp.dot(w2c_ref[...], jnp.cos(z), preferred_element_type=jnp.float32)
         + b2_ref[...])
    y_ref[...] = y.astype(y_ref.dtype)


# --------------------------------------------------------------------------
# Wrapper
# --------------------------------------------------------------------------
def basenet1a_forward(x, params, *, x_scale, alpha, n_layers,
                      activation="softplus", batch_tile=1024):
    """x: (N, x_dim) -> (N, y_dim). Fused BaseNet1a forward on TPU."""
    (wpx, bpx, w0a, b0a, w0b, b0b, w1a, b1a, w1b, b1b,
     wsc, bsc, w2, b2) = params
    N, x_dim = x.shape
    h_dim = w0a.shape[0]
    y_dim = w2.shape[0]
    has_proj = wpx is not None

    # --- one-time wrapper-side layout / scale preparation ------------------
    sv = jnp.broadcast_to(jnp.asarray(x_scale, jnp.float32).reshape(-1), (x_dim,))
    col = lambda b: jnp.asarray(b, jnp.float32).reshape(-1, 1)

    if has_proj:
        wpx_k = jnp.asarray(wpx, jnp.float32) * sv[None, :]   # fold x_scale
        bpx_k = col(bpx)
        w0a_k = jnp.asarray(w0a, jnp.float32) * sv[None, :]   # fold x_scale
    else:
        wpx_k = bpx_k = None
        w0a_k = jnp.asarray(w0a, jnp.float32)
    b0a_k = col(b0a)
    w0b_k = jnp.asarray(w0b, jnp.float32)
    b0b_k = col(b0b)

    if n_layers > 0:
        w1a_k = jnp.asarray(w1a, jnp.float32)
        b1a_k = jnp.asarray(b1a, jnp.float32).reshape(n_layers, h_dim, 1)
        w1b_k = jnp.asarray(w1b, jnp.float32)
        b1b_k = jnp.asarray(b1b, jnp.float32).reshape(n_layers, h_dim, 1)
    else:  # dummy (never read) stacks so BlockSpecs stay non-empty
        w1a_k = jnp.zeros((1, h_dim, h_dim), jnp.float32)
        b1a_k = jnp.zeros((1, h_dim, 1), jnp.float32)
        w1b_k = jnp.zeros((1, h_dim, h_dim), jnp.float32)
        b1b_k = jnp.zeros((1, h_dim, 1), jnp.float32)

    wsc_k = float(alpha) * jnp.asarray(wsc, jnp.float32)      # fold SinCos alpha
    bsc_k = col(bsc)
    w2_f = jnp.asarray(w2, jnp.float32)
    w2s_k = w2_f[:, :h_dim]                                   # multiplies sin(z)
    w2c_k = w2_f[:, h_dim:]                                   # multiplies cos(z)
    b2_k = col(b2)

    # --- batch rides the lane axis: big, 128-aligned tiles -----------------
    bt = min(int(batch_tile), _round_up(N, 128))
    bt = _round_up(bt, 128)
    n_pad = _round_up(N, bt)

    x_t = jnp.asarray(x, jnp.float32).T                      # (x_dim, N)
    if n_pad != N:
        x_t = jnp.pad(x_t, ((0, 0), (0, n_pad - N)))

    if isinstance(x_scale, (tuple, list)):
        xs_static = tuple(float(v) for v in x_scale)
    else:
        xs_static = float(x_scale)

    kernel = functools.partial(
        basenet1a_kernel, n_layers=n_layers, has_proj=has_proj,
        activation=activation, x_scale_static=xs_static)

    def full(shape):
        nd = len(shape)
        return pl.BlockSpec(shape, lambda i, _nd=nd: (0,) * _nd)

    in_specs = [pl.BlockSpec((x_dim, bt), lambda i: (0, i))]
    operands = [x_t]
    if has_proj:
        in_specs += [full(wpx_k.shape), full(bpx_k.shape)]
        operands += [wpx_k, bpx_k]
    weight_ops = [w0a_k, b0a_k, w0b_k, b0b_k,
                  w1a_k, b1a_k, w1b_k, b1b_k,
                  wsc_k, bsc_k, w2s_k, w2c_k, b2_k]
    in_specs += [full(w.shape) for w in weight_ops]
    operands += weight_ops

    # advisory cost estimate (EUP-heavy) so XLA schedules neighbors sensibly.
    macs_row = (h_dim * x_dim * (2 if has_proj else 1) + h_dim * h_dim
                + n_layers * 2 * h_dim * h_dim + h_dim * h_dim
                + y_dim * 2 * h_dim)
    transc_row = 2 * h_dim                                   # sin + cos
    if activation in ("softplus", "elu"):
        transc_row += (1 + n_layers) * 2 * h_dim * 2         # exp + log1p each
    weight_bytes = sum(int(o.size) for o in operands[1:]) * 4
    cost = pl.CostEstimate(
        flops=int(2 * macs_row * n_pad),
        transcendentals=int(transc_row * n_pad),
        bytes_accessed=int(4 * n_pad * (x_dim + y_dim) + weight_bytes),
    )

    y_t = pl.pallas_call(
        kernel,
        out_shape=jax.ShapeDtypeStruct((y_dim, n_pad), x.dtype),
        grid_spec=pltpu.PrefetchScalarGridSpec(
            num_scalar_prefetch=0,
            grid=(n_pad // bt,),
            in_specs=in_specs,
            out_specs=pl.BlockSpec((y_dim, bt), lambda i: (0, i)),
        ),
        compiler_params=pltpu.CompilerParams(
            dimension_semantics=("parallel",)),
        cost_estimate=cost,
    )(*operands)

    return y_t[:, :N].T                                      # back to (N, y_dim)


# --------------------------------------------------------------------------
# Init + pure-JAX reference (mirrors BaseNet1a exactly)
# --------------------------------------------------------------------------
def init_params(key, x_dim, h_dim, n_layers, alpha, gamma, y_dim):
    """Deterministic init matching BaseNet1a.__init__ shapes/ranges."""
    def linear_init(k, in_dim, out_dim):
        kw, kb = jax.random.split(k)
        bound = 1.0 / (in_dim ** 0.5)
        w = jax.random.uniform(kw, (out_dim, in_dim), jnp.float32, -bound, bound)
        b = jax.random.uniform(kb, (out_dim,), jnp.float32, -bound, bound)
        return w, b

    keys = jax.random.split(key, 8 + 2 * max(n_layers, 1))
    ki = iter(keys)

    # layer0: LinearRes(x_dim, h_dim)
    if x_dim != h_dim:
        wpx, bpx = linear_init(next(ki), x_dim, h_dim)
    else:
        wpx, bpx = None, None
    w0a, b0a = linear_init(next(ki), x_dim, h_dim)
    w0b, b0b = linear_init(next(ki), h_dim, h_dim)

    # layer1a: n_layers x LinearRes(h_dim, h_dim)
    w1a_l, b1a_l, w1b_l, b1b_l = [], [], [], []
    for _ in range(n_layers):
        wa, ba = linear_init(next(ki), h_dim, h_dim)
        wb, bb = linear_init(next(ki), h_dim, h_dim)
        w1a_l.append(wa); b1a_l.append(ba); w1b_l.append(wb); b1b_l.append(bb)
    if n_layers > 0:
        w1a, b1a = jnp.stack(w1a_l), jnp.stack(b1a_l)
        w1b, b1b = jnp.stack(w1b_l), jnp.stack(b1b_l)
    else:
        w1a = jnp.zeros((0, h_dim, h_dim), jnp.float32)
        b1a = jnp.zeros((0, h_dim), jnp.float32)
        w1b = jnp.zeros((0, h_dim, h_dim), jnp.float32)
        b1b = jnp.zeros((0, h_dim), jnp.float32)

    # layer1b: SinCos(h_dim, 2*h_dim, alpha, is_first=False)
    _, bsc = linear_init(next(ki), h_dim, h_dim)             # default bias init
    bound_w = (6.0 / h_dim) ** 0.5 / alpha
    wsc = jax.random.uniform(next(ki), (h_dim, h_dim), jnp.float32,
                             -bound_w, bound_w)

    # layer2: Linear(2*h_dim, y_dim); weight *= gamma, bias *= 0
    w2, b2 = linear_init(next(ki), 2 * h_dim, y_dim)
    w2 = gamma * w2
    b2 = jnp.zeros_like(b2)

    return (wpx, bpx, w0a, b0a, w0b, b0b, w1a, b1a, w1b, b1b, wsc, bsc, w2, b2)


def reference_forward(x, params, *, x_scale, alpha, n_layers, activation="softplus"):
    """Pure-JAX mirror of BaseNet1a.forward (PyTorch (out,in) weights)."""
    act = _ACTIVATIONS[activation]
    (wpx, bpx, w0a, b0a, w0b, b0b, w1a, b1a, w1b, b1b, wsc, bsc, w2, b2) = params

    if isinstance(x_scale, (tuple, list)):
        x = x * jnp.asarray(x_scale, x.dtype)[None, :]
    else:
        x = x * x_scale

    def linear_res(h, wa, ba, wb, bb, wp=None, bp=None):
        y_old = h if wp is None else h @ wp.T + bp
        y_new = act(h @ wa.T + ba) @ wb.T + bb
        return act(y_old + y_new)

    h = linear_res(x, w0a, b0a, w0b, b0b, wpx, bpx)
    for l in range(n_layers):
        h = linear_res(h, w1a[l], b1a[l], w1b[l], b1b[l])
    z = (alpha * h) @ wsc.T + bsc
    h = jnp.concatenate([jnp.sin(z), jnp.cos(z)], axis=-1)
    return h @ w2.T + b2


if __name__ == "__main__":
    # Coordinate-MLP style shapes consistent with the module.
    x_dim, h_dim, n_layers, y_dim = 3, 32, 2, 3
    x_scale, alpha, gamma = 10.0, 2.0, 0.01
    N = 512

    key = jax.random.PRNGKey(0)
    k_x, k_p = jax.random.split(key)
    x = jax.random.uniform(k_x, (N, x_dim), jnp.float32, minval=-1.0, maxval=1.0)
    params = init_params(k_p, x_dim, h_dim, n_layers, alpha, gamma, y_dim)

    y = basenet1a_forward(x, params, x_scale=x_scale, alpha=alpha,
                          n_layers=n_layers, activation="softplus",
                          batch_tile=256)
    y = jax.block_until_ready(y)

    y_ref = reference_forward(x, params, x_scale=x_scale, alpha=alpha,
                              n_layers=n_layers, activation="softplus")
    assert y.shape == (N, y_dim)
    err = float(jnp.max(jnp.abs(y - y_ref)))
    assert jnp.allclose(y, y_ref, atol=1e-4, rtol=1e-4), err

    print("KERNEL_OK")
</pallas_src>

<mosaic_0001>
module attributes {stable_mosaic.version = 11 : i64} {
  func.func @basenet1a_kernel(%arg0: i32, %arg1: memref<3x256xf32, #tpu.memory_space<vmem>>, %arg2: memref<32x3xf32, #tpu.memory_space<vmem>>, %arg3: memref<32x1xf32, #tpu.memory_space<vmem>>, %arg4: memref<32x3xf32, #tpu.memory_space<vmem>>, %arg5: memref<32x1xf32, #tpu.memory_space<vmem>>, %arg6: memref<32x32xf32, #tpu.memory_space<vmem>>, %arg7: memref<32x1xf32, #tpu.memory_space<vmem>>, %arg8: memref<2x32x32xf32, #tpu.memory_space<vmem>>, %arg9: memref<2x32x1xf32, #tpu.memory_space<vmem>>, %arg10: memref<2x32x32xf32, #tpu.memory_space<vmem>>, %arg11: memref<2x32x1xf32, #tpu.memory_space<vmem>>, %arg12: memref<32x32xf32, #tpu.memory_space<vmem>>, %arg13: memref<32x1xf32, #tpu.memory_space<vmem>>, %arg14: memref<3x32xf32, #tpu.memory_space<vmem>>, %arg15: memref<3x32xf32, #tpu.memory_space<vmem>>, %arg16: memref<3x1xf32, #tpu.memory_space<vmem>>, %arg17: memref<3x256xf32, #tpu.memory_space<vmem>>) attributes {dimension_semantics = [#tpu.dimension_semantics<parallel>], iteration_bounds = array<i64: 2>, scalar_prefetch = 0 : i64, scratch_operands = 0 : i64, tpu.core_type = #tpu.core_type<tc>, window_params = [{transform_indices = @transform_0, window_bounds = array<i64: 3, 256>}, {pipeline_mode = #tpu.pipeline_mode<synchronous>, transform_indices = @transform_1, window_bounds = array<i64: 32, 3>}, {pipeline_mode = #tpu.pipeline_mode<synchronous>, transform_indices = @transform_2, window_bounds = array<i64: 32, 1>}, {pipeline_mode = #tpu.pipeline_mode<synchronous>, transform_indices = @transform_3, window_bounds = array<i64: 32, 3>}, {pipeline_mode = #tpu.pipeline_mode<synchronous>, transform_indices = @transform_4, window_bounds = array<i64: 32, 1>}, {pipeline_mode = #tpu.pipeline_mode<synchronous>, transform_indices = @transform_5, window_bounds = array<i64: 32, 32>}, {pipeline_mode = #tpu.pipeline_mode<synchronous>, transform_indices = @transform_6, window_bounds = array<i64: 32, 1>}, {pipeline_mode = #tpu.pipeline_mode<synchronous>, transform_indices = @transform_7, window_bounds = array<i64: 2, 32, 32>}, {pipeline_mode = #tpu.pipeline_mode<synchronous>, transform_indices = @transform_8, window_bounds = array<i64: 2, 32, 1>}, {pipeline_mode = #tpu.pipeline_mode<synchronous>, transform_indices = @transform_9, window_bounds = array<i64: 2, 32, 32>}, {pipeline_mode = #tpu.pipeline_mode<synchronous>, transform_indices = @transform_10, window_bounds = array<i64: 2, 32, 1>}, {pipeline_mode = #tpu.pipeline_mode<synchronous>, transform_indices = @transform_11, window_bounds = array<i64: 32, 32>}, {pipeline_mode = #tpu.pipeline_mode<synchronous>, transform_indices = @transform_12, window_bounds = array<i64: 32, 1>}, {pipeline_mode = #tpu.pipeline_mode<synchronous>, transform_indices = @transform_13, window_bounds = array<i64: 3, 32>}, {pipeline_mode = #tpu.pipeline_mode<synchronous>, transform_indices = @transform_14, window_bounds = array<i64: 3, 32>}, {pipeline_mode = #tpu.pipeline_mode<synchronous>, transform_indices = @transform_15, window_bounds = array<i64: 3, 1>}, {transform_indices = @transform_16, window_bounds = array<i64: 3, 256>}]} {
    %c0 = arith.constant 0 : index
    %c0_0 = arith.constant 0 : index
    %0 = vector.load %arg1[%c0, %c0_0] : memref<3x256xf32, #tpu.memory_space<vmem>>, vector<3x256xf32>
    %c0_1 = arith.constant 0 : index
    %c0_2 = arith.constant 0 : index
    %1 = vector.load %arg2[%c0_1, %c0_2] : memref<32x3xf32, #tpu.memory_space<vmem>>, vector<32x3xf32>
    %cst = arith.constant dense<0.000000e+00> : vector<32x256xf32>
    %2 = tpu.matmul %1, %0, %cst {dimension_numbers = #tpu.dot_dimension_numbers<[1], [0], [0], [1], [0, 0, 1, 1], [], []>} : vector<32x3xf32>, vector<3x256xf32>, vector<32x256xf32> -> vector<32x256xf32>
    %c0_3 = arith.constant 0 : index
    %c0_4 = arith.constant 0 : index
    %3 = vector.load %arg3[%c0_3, %c0_4] : memref<32x1xf32, #tpu.memory_space<vmem>>, vector<32x1xf32>
    %4 = vector.broadcast %3 : vector<32x1xf32> to vector<32x256xf32>
    %5 = arith.addf %2, %4 : vector<32x256xf32>
    %c0_5 = arith.constant 0 : index
    %c0_6 = arith.constant 0 : index
    %6 = vector.load %arg4[%c0_5, %c0_6] : memref<32x3xf32, #tpu.memory_space<vmem>>, vector<32x3xf32>
    %cst_7 = arith.constant dense<0.000000e+00> : vector<32x256xf32>
    %7 = tpu.matmul %6, %0, %cst_7 {dimension_numbers = #tpu.dot_dimension_numbers<[1], [0], [0], [1], [0, 0, 1, 1], [], []>} : vector<32x3xf32>, vector<3x256xf32>, vector<32x256xf32> -> vector<32x256xf32>
    %c0_8 = arith.constant 0 : index
    %c0_9 = arith.constant 0 : index
    %8 = vector.load %arg5[%c0_8, %c0_9] : memref<32x1xf32, #tpu.memory_space<vmem>>, vector<32x1xf32>
    %9 = vector.broadcast %8 : vector<32x1xf32> to vector<32x256xf32>
    %10 = arith.addf %7, %9 : vector<32x256xf32>
    %cst_10 = arith.constant 0.000000e+00 : f32
    %11 = vector.broadcast %cst_10 : f32 to vector<32x256xf32>
    %12 = arith.maximumf %10, %11 : vector<32x256xf32>
    %13 = math.absf %10 : vector<32x256xf32>
    %cst_11 = arith.constant 0.000000e+00 : f32
    %14 = vector.broadcast %cst_11 : f32 to vector<32x256xf32>
    %15 = arith.subf %14, %13 : vector<32x256xf32>
    %16 = math.exp %15 : vector<32x256xf32>
    %17 = math.log1p %16 : vector<32x256xf32>
    %18 = arith.addf %12, %17 : vector<32x256xf32>
    %c0_12 = arith.constant 0 : index
    %c0_13 = arith.constant 0 : index
    %19 = vector.load %arg6[%c0_12, %c0_13] : memref<32x32xf32, #tpu.memory_space<vmem>>, vector<32x32xf32>
    %cst_14 = arith.constant dense<0.000000e+00> : vector<32x256xf32>
    %20 = tpu.matmul %19, %18, %cst_14 {dimension_numbers = #tpu.dot_dimension_numbers<[1], [0], [0], [1], [0, 0, 1, 1], [], []>} : vector<32x32xf32>, vector<32x256xf32>, vector<32x256xf32> -> vector<32x256xf32>
    %c0_15 = arith.constant 0 : index
    %c0_16 = arith.constant 0 : index
    %21 = vector.load %arg7[%c0_15, %c0_16] : memref<32x1xf32, #tpu.memory_space<vmem>>, vector<32x1xf32>
    %22 = vector.broadcast %21 : vector<32x1xf32> to vector<32x256xf32>
    %23 = arith.addf %20, %22 : vector<32x256xf32>
    %24 = arith.addf %5, %23 : vector<32x256xf32>
    %cst_17 = arith.constant 0.000000e+00 : f32
    %25 = vector.broadcast %cst_17 : f32 to vector<32x256xf32>
    %26 = arith.maximumf %24, %25 : vector<32x256xf32>
    %27 = math.absf %24 : vector<32x256xf32>
    %cst_18 = arith.constant 0.000000e+00 : f32
    %28 = vector.broadcast %cst_18 : f32 to vector<32x256xf32>
    %29 = arith.subf %28, %27 : vector<32x256xf32>
    %30 = math.exp %29 : vector<32x256xf32>
    %31 = math.log1p %30 : vector<32x256xf32>
    %32 = arith.addf %26, %31 : vector<32x256xf32>
    %c0_19 = arith.constant 0 : index
    %c0_20 = arith.constant 0 : index
    %c0_21 = arith.constant 0 : index
    %33 = vector.load %arg8[%c0_19, %c0_20, %c0_21] : memref<2x32x32xf32, #tpu.memory_space<vmem>>, vector<1x32x32xf32>
    %34 = vector.shape_cast %33 : vector<1x32x32xf32> to vector<32x32xf32>
    %cst_22 = arith.constant dense<0.000000e+00> : vector<32x256xf32>
    %35 = tpu.matmul %34, %32, %cst_22 {dimension_numbers = #tpu.dot_dimension_numbers<[1], [0], [0], [1], [0, 0, 1, 1], [], []>} : vector<32x32xf32>, vector<32x256xf32>, vector<32x256xf32> -> vector<32x256xf32>
    %c0_23 = arith.constant 0 : index
    %c0_24 = arith.constant 0 : index
    %c0_25 = arith.constant 0 : index
    %36 = vector.load %arg9[%c0_23, %c0_24, %c0_25] : memref<2x32x1xf32, #tpu.memory_space<vmem>>, vector<1x32x1xf32>
    %37 = vector.shape_cast %36 : vector<1x32x1xf32> to vector<32x1xf32>
    %38 = vector.broadcast %37 : vector<32x1xf32> to vector<32x256xf32>
    %39 = arith.addf %35, %38 : vector<32x256xf32>
    %c0_26 = arith.constant 0 : index
    %c0_27 = arith.constant 0 : index
    %c0_28 = arith.constant 0 : index
    %40 = vector.load %arg10[%c0_26, %c0_27, %c0_28] : memref<2x32x32xf32, #tpu.memory_space<vmem>>, vector<1x32x32xf32>
    %41 = vector.shape_cast %40 : vector<1x32x32xf32> to vector<32x32xf32>
    %cst_29 = arith.constant 0.000000e+00 : f32
    %42 = vector.broadcast %cst_29 : f32 to vector<32x256xf32>
    %43 = arith.maximumf %39, %42 : vector<32x256xf32>
    %44 = math.absf %39 : vector<32x256xf32>
    %cst_30 = arith.constant 0.000000e+00 : f32
    %45 = vector.broadcast %cst_30 : f32 to vector<32x256xf32>
    %46 = arith.subf %45, %44 : vector<32x256xf32>
    %47 = math.exp %46 : vector<32x256xf32>
    %48 = math.log1p %47 : vector<32x256xf32>
    %49 = arith.addf %43, %48 : vector<32x256xf32>
    %cst_31 = arith.constant dense<0.000000e+00> : vector<32x256xf32>
    %50 = tpu.matmul %41, %49, %cst_31 {dimension_numbers = #tpu.dot_dimension_numbers<[1], [0], [0], [1], [0, 0, 1, 1], [], []>} : vector<32x32xf32>, vector<32x256xf32>, vector<32x256xf32> -> vector<32x256xf32>
    %c0_32 = arith.constant 0 : index
    %c0_33 = arith.constant 0 : index
    %c0_34 = arith.constant 0 : index
    %51 = vector.load %arg11[%c0_32, %c0_33, %c0_34] : memref<2x32x1xf32, #tpu.memory_space<vmem>>, vector<1x32x1xf32>
    %52 = vector.shape_cast %51 : vector<1x32x1xf32> to vector<32x1xf32>
    %53 = vector.broadcast %52 : vector<32x1xf32> to vector<32x256xf32>
    %54 = arith.addf %50, %53 : vector<32x256xf32>
    %55 = arith.addf %32, %54 : vector<32x256xf32>
    %cst_35 = arith.constant 0.000000e+00 : f32
    %56 = vector.broadcast %cst_35 : f32 to vector<32x256xf32>
    %57 = arith.maximumf %55, %56 : vector<32x256xf32>
    %58 = math.absf %55 : vector<32x256xf32>
    %cst_36 = arith.constant 0.000000e+00 : f32
    %59 = vector.broadcast %cst_36 : f32 to vector<32x256xf32>
    %60 = arith.subf %59, %58 : vector<32x256xf32>
    %61 = math.exp %60 : vector<32x256xf32>
    %62 = math.log1p %61 : vector<32x256xf32>
    %63 = arith.addf %57, %62 : vector<32x256xf32>
    %c1 = arith.constant 1 : index
    %c0_37 = arith.constant 0 : index
    %c0_38 = arith.constant 0 : index
    %64 = vector.load %arg8[%c1, %c0_37, %c0_38] : memref<2x32x32xf32, #tpu.memory_space<vmem>>, vector<1x32x32xf32>
    %65 = vector.shape_cast %64 : vector<1x32x32xf32> to vector<32x32xf32>
    %cst_39 = arith.constant dense<0.000000e+00> : vector<32x256xf32>
    %66 = tpu.matmul %65, %63, %cst_39 {dimension_numbers = #tpu.dot_dimension_numbers<[1], [0], [0], [1], [0, 0, 1, 1], [], []>} : vector<32x32xf32>, vector<32x256xf32>, vector<32x256xf32> -> vector<32x256xf32>
    %c1_40 = arith.constant 1 : index
    %c0_41 = arith.constant 0 : index
    %c0_42 = arith.constant 0 : index
    %67 = vector.load %arg9[%c1_40, %c0_41, %c0_42] : memref<2x32x1xf32, #tpu.memory_space<vmem>>, vector<1x32x1xf32>
    %68 = vector.shape_cast %67 : vector<1x32x1xf32> to vector<32x1xf32>
    %69 = vector.broadcast %68 : vector<32x1xf32> to vector<32x256xf32>
    %70 = arith.addf %66, %69 : vector<32x256xf32>
    %c1_43 = arith.constant 1 : index
    %c0_44 = arith.constant 0 : index
    %c0_45 = arith.constant 0 : index
    %71 = vector.load %arg10[%c1_43, %c0_44, %c0_45] : memref<2x32x32xf32, #tpu.memory_space<vmem>>, vector<1x32x32xf32>
    %72 = vector.shape_cast %71 : vector<1x32x32xf32> to vector<32x32xf32>
    %cst_46 = arith.constant 0.000000e+00 : f32
    %73 = vector.broadcast %cst_46 : f32 to vector<32x256xf32>
    %74 = arith.maximumf %70, %73 : vector<32x256xf32>
    %75 = math.absf %70 : vector<32x256xf32>
    %cst_47 = arith.constant 0.000000e+00 : f32
    %76 = vector.broadcast %cst_47 : f32 to vector<32x256xf32>
    %77 = arith.subf %76, %75 : vector<32x256xf32>
    %78 = math.exp %77 : vector<32x256xf32>
    %79 = math.log1p %78 : vector<32x256xf32>
    %80 = arith.addf %74, %79 : vector<32x256xf32>
    %cst_48 = arith.constant dense<0.000000e+00> : vector<32x256xf32>
    %81 = tpu.matmul %72, %80, %cst_48 {dimension_numbers = #tpu.dot_dimension_numbers<[1], [0], [0], [1], [0, 0, 1, 1], [], []>} : vector<32x32xf32>, vector<32x256xf32>, vector<32x256xf32> -> vector<32x256xf32>
    %c1_49 = arith.constant 1 : index
    %c0_50 = arith.constant 0 : index
    %c0_51 = arith.constant 0 : index
    %82 = vector.load %arg11[%c1_49, %c0_50, %c0_51] : memref<2x32x1xf32, #tpu.memory_space<vmem>>, vector<1x32x1xf32>
    %83 = vector.shape_cast %82 : vector<1x32x1xf32> to vector<32x1xf32>
    %84 = vector.broadcast %83 : vector<32x1xf32> to vector<32x256xf32>
    %85 = arith.addf %81, %84 : vector<32x256xf32>
    %86 = arith.addf %63, %85 : vector<32x256xf32>
    %cst_52 = arith.constant 0.000000e+00 : f32
    %87 = vector.broadcast %cst_52 : f32 to vector<32x256xf32>
    %88 = arith.maximumf %86, %87 : vector<32x256xf32>
    %89 = math.absf %86 : vector<32x256xf32>
    %cst_53 = arith.constant 0.000000e+00 : f32
    %90 = vector.broadcast %cst_53 : f32 to vector<32x256xf32>
    %91 = arith.subf %90, %89 : vector<32x256xf32>
    %92 = math.exp %91 : vector<32x256xf32>
    %93 = math.log1p %92 : vector<32x256xf32>
    %94 = arith.addf %88, %93 : vector<32x256xf32>
    %c0_54 = arith.constant 0 : index
    %c0_55 = arith.constant 0 : index
    %95 = vector.load %arg12[%c0_54, %c0_55] : memref<32x32xf32, #tpu.memory_space<vmem>>, vector<32x32xf32>
    %cst_56 = arith.constant dense<0.000000e+00> : vector<32x256xf32>
    %96 = tpu.matmul %95, %94, %cst_56 {dimension_numbers = #tpu.dot_dimension_numbers<[1], [0], [0], [1], [0, 0, 1, 1], [], []>} : vector<32x32xf32>, vector<32x256xf32>, vector<32x256xf32> -> vector<32x256xf32>
    %c0_57 = arith.constant 0 : index
    %c0_58 = arith.constant 0 : index
    %97 = vector.load %arg13[%c0_57, %c0_58] : memref<32x1xf32, #tpu.memory_space<vmem>>, vector<32x1xf32>
    %98 = vector.broadcast %97 : vector<32x1xf32> to vector<32x256xf32>
    %99 = arith.addf %96, %98 : vector<32x256xf32>
    %c0_59 = arith.constant 0 : index
    %c0_60 = arith.constant 0 : index
    %100 = vector.load %arg14[%c0_59, %c0_60] : memref<3x32xf32, #tpu.memory_space<vmem>>, vector<3x32xf32>
    %101 = math.sin %99 : vector<32x256xf32>
    %cst_61 = arith.constant dense<0.000000e+00> : vector<3x256xf32>
    %102 = tpu.matmul %100, %101, %cst_61 {dimension_numbers = #tpu.dot_dimension_numbers<[1], [0], [0], [1], [0, 0, 1, 1], [], []>} : vector<3x32xf32>, vector<32x256xf32>, vector<3x256xf32> -> vector<3x256xf32>
    %c0_62 = arith.constant 0 : index
    %c0_63 = arith.constant 0 : index
    %103 = vector.load %arg15[%c0_62, %c0_63] : memref<3x32xf32, #tpu.memory_space<vmem>>, vector<3x32xf32>
    %104 = math.cos %99 : vector<32x256xf32>
    %cst_64 = arith.constant dense<0.000000e+00> : vector<3x256xf32>
    %105 = tpu.matmul %103, %104, %cst_64 {dimension_numbers = #tpu.dot_dimension_numbers<[1], [0], [0], [1], [0, 0, 1, 1], [], []>} : vector<3x32xf32>, vector<32x256xf32>, vector<3x256xf32> -> vector<3x256xf32>
    %106 = arith.addf %102, %105 : vector<3x256xf32>
    %c0_65 = arith.constant 0 : index
    %c0_66 = arith.constant 0 : index
    %107 = vector.load %arg16[%c0_65, %c0_66] : memref<3x1xf32, #tpu.memory_space<vmem>>, vector<3x1xf32>
    %108 = vector.broadcast %107 : vector<3x1xf32> to vector<3x256xf32>
    %109 = arith.addf %106, %108 : vector<3x256xf32>
    %c0_67 = arith.constant 0 : index
    %c0_68 = arith.constant 0 : index
    %110 = vector.load %arg17[%c0_67, %c0_68] : memref<3x256xf32, #tpu.memory_space<vmem>>, vector<3x256xf32>
    tpu.vector_store %arg17[%c0_67, %c0_68], %109 {strides = array<i32>} : memref<3x256xf32, #tpu.memory_space<vmem>>, vector<3x256xf32>,
    return
  }
  func.func @transform_0(%arg0: i32) -> (i32, i32) {
    %c0_i32 = arith.constant 0 : i32
    %c0_i32_0 = arith.constant 0 : i32
    return %c0_i32, %arg0 : i32, i32
  }
  func.func @transform_1(%arg0: i32) -> (i32, i32) {
    %c0_i32 = arith.constant 0 : i32
    %c0_i32_0 = arith.constant 0 : i32
    %c0_i32_1 = arith.constant 0 : i32
    return %c0_i32, %c0_i32_0 : i32, i32
  }
  func.func @transform_2(%arg0: i32) -> (i32, i32) {
    %c0_i32 = arith.constant 0 : i32
    %c0_i32_0 = arith.constant 0 : i32
    %c0_i32_1 = arith.constant 0 : i32
    return %c0_i32, %c0_i32_0 : i32, i32
  }
  func.func @transform_3(%arg0: i32) -> (i32, i32) {
    %c0_i32 = arith.constant 0 : i32
    %c0_i32_0 = arith.constant 0 : i32
    %c0_i32_1 = arith.constant 0 : i32
    return %c0_i32, %c0_i32_0 : i32, i32
  }
  func.func @transform_4(%arg0: i32) -> (i32, i32) {
    %c0_i32 = arith.constant 0 : i32
    %c0_i32_0 = arith.constant 0 : i32
    %c0_i32_1 = arith.constant 0 : i32
    return %c0_i32, %c0_i32_0 : i32, i32
  }
  func.func @transform_5(%arg0: i32) -> (i32, i32) {
    %c0_i32 = arith.constant 0 : i32
    %c0_i32_0 = arith.constant 0 : i32
    %c0_i32_1 = arith.constant 0 : i32
    return %c0_i32, %c0_i32_0 : i32, i32
  }
  func.func @transform_6(%arg0: i32) -> (i32, i32) {
    %c0_i32 = arith.constant 0 : i32
    %c0_i32_0 = arith.constant 0 : i32
    %c0_i32_1 = arith.constant 0 : i32
    return %c0_i32, %c0_i32_0 : i32, i32
  }
  func.func @transform_7(%arg0: i32) -> (i32, i32, i32) {
    %c0_i32 = arith.constant 0 : i32
    %c0_i32_0 = arith.constant 0 : i32
    %c0_i32_1 = arith.constant 0 : i32
    %c0_i32_2 = arith.constant 0 : i32
    return %c0_i32, %c0_i32_0, %c0_i32_1 : i32, i32, i32
  }
  func.func @transform_8(%arg0: i32) -> (i32, i32, i32) {
    %c0_i32 = arith.constant 0 : i32
    %c0_i32_0 = arith.constant 0 : i32
    %c0_i32_1 = arith.constant 0 : i32
    %c0_i32_2 = arith.constant 0 : i32
    return %c0_i32, %c0_i32_0, %c0_i32_1 : i32, i32, i32
  }
  func.func @transform_9(%arg0: i32) -> (i32, i32, i32) {
    %c0_i32 = arith.constant 0 : i32
    %c0_i32_0 = arith.constant 0 : i32
    %c0_i32_1 = arith.constant 0 : i32
    %c0_i32_2 = arith.constant 0 : i32
    return %c0_i32, %c0_i32_0, %c0_i32_1 : i32, i32, i32
  }
  func.func @transform_10(%arg0: i32) -> (i32, i32, i32) {
    %c0_i32 = arith.constant 0 : i32
    %c0_i32_0 = arith.constant 0 : i32
    %c0_i32_1 = arith.constant 0 : i32
    %c0_i32_2 = arith.constant 0 : i32
    return %c0_i32, %c0_i32_0, %c0_i32_1 : i32, i32, i32
  }
  func.func @transform_11(%arg0: i32) -> (i32, i32) {
    %c0_i32 = arith.constant 0 : i32
    %c0_i32_0 = arith.constant 0 : i32
    %c0_i32_1 = arith.constant 0 : i32
    return %c0_i32, %c0_i32_0 : i32, i32
  }
  func.func @transform_12(%arg0: i32) -> (i32, i32) {
    %c0_i32 = arith.constant 0 : i32
    %c0_i32_0 = arith.constant 0 : i32
    %c0_i32_1 = arith.constant 0 : i32
    return %c0_i32, %c0_i32_0 : i32, i32
  }
  func.func @transform_13(%arg0: i32) -> (i32, i32) {
    %c0_i32 = arith.constant 0 : i32
    %c0_i32_0 = arith.constant 0 : i32
    %c0_i32_1 = arith.constant 0 : i32
    return %c0_i32, %c0_i32_0 : i32, i32
  }
  func.func @transform_14(%arg0: i32) -> (i32, i32) {
    %c0_i32 = arith.constant 0 : i32
    %c0_i32_0 = arith.constant 0 : i32
    %c0_i32_1 = arith.constant 0 : i32
    return %c0_i32, %c0_i32_0 : i32, i32
  }
  func.func @transform_15(%arg0: i32) -> (i32, i32) {
    %c0_i32 = arith.constant 0 : i32
    %c0_i32_0 = arith.constant 0 : i32
    %c0_i32_1 = arith.constant 0 : i32
    return %c0_i32, %c0_i32_0 : i32, i32
  }
  func.func @transform_16(%arg0: i32) -> (i32, i32) {
    %c0_i32 = arith.constant 0 : i32
    %c0_i32_0 = arith.constant 0 : i32
    return %c0_i32, %arg0 : i32, i32
  }
}

</mosaic_0001>

<bundles_post_ra>
// kernel: tpu_custom_call.1
= control target key start
LH: loop header
LB: loop body
LE: loop exit
PB: predicated region body
PF: predicated region fallthrough
CT: control target
= control target key end

     0   :  { %s6462_s0 = inlined_call_operand.vmem [shape: f32[3,512], index: 0, kind: input, shape index: {}]   ;;  %s6463_s1 = inlined_call_operand.vmem [shape: f32[32,3], index: 1, kind: input, shape index: {}]   ;;  %s6464_s2 = inlined_call_operand.vmem [shape: f32[32,1], index: 2, kind: input, shape index: {}]   ;;  %s6465_s3 = inlined_call_operand.vmem [shape: f32[32,3], index: 3, kind: input, shape index: {}]   ;;  %s6466_s4 = inlined_call_operand.vmem [shape: f32[32,1], index: 4, kind: input, shape index: {}]   ;;  %s6467_s5 = inlined_call_operand.vmem [shape: f32[32,32], index: 5, kind: input, shape index: {}]   ;;  %s6468_s6 = inlined_call_operand.vmem [shape: f32[32,1], index: 6, kind: input, shape index: {}]   ;;  %s6469_s7 = inlined_call_operand.vmem [shape: f32[2,32,32], index: 7, kind: input, shape index: {}]   ;;  %s6470_s8 = inlined_call_operand.vmem [shape: f32[2,32,1], index: 8, kind: input, shape index: {}]   ;;  %s6471_s9 = inlined_call_operand.vmem [shape: f32[2,32,32], index: 9, kind: input, shape index: {}]   ;;  %s6472_s10 = inlined_call_operand.vmem [shape: f32[2,32,1], index: 10, kind: input, shape index: {}]   ;;  %s6473_s11 = inlined_call_operand.vmem [shape: f32[32,32], index: 11, kind: input, shape index: {}]   ;;  %s6474_s12 = inlined_call_operand.vmem [shape: f32[32,1], index: 12, kind: input, shape index: {}]   ;;  %s6475_s13 = inlined_call_operand.vmem [shape: f32[3,32], index: 13, kind: input, shape index: {}]   ;;  %s6476_s14 = inlined_call_operand.vmem [shape: f32[3,32], index: 14, kind: input, shape index: {}]   ;;  %s6477_s15 = inlined_call_operand.vmem [shape: f32[3,1], index: 15, kind: input, shape index: {}]   ;;  %s6478_s16 = inlined_call_operand.hbm [shape: f32[3,512], index: 16, kind: output, shape index: {}]  }
   0x1   :  { %6489 = sst [smem:[#allocation11_spill]] %s6462_s0 }
   0x2   :  { %21 = vsyncpa [#allocation3], 0 }
   0x3   :  { %23 = vsyncpa [#allocation3 + $0x1], 0  ;;  %s4891_s21 = smov 0   ;;  %s4893_s22 = smov 0  }
   0x4   :  { %s4895_s23 = smov 0   ;;  %s4897_s24 = smov 0  }
   0x5 LB: > { %6490 = sst [smem:[#allocation5_spill]] %s4783_s21  ;;  %s4912_s25 = sadd.s32 4294967295, %s4795_s24   ;;  %s4795_s24 = sphi %s4897_s24, %s6555_s24   ;;  %s4791_s23 = sphi %s4895_s23, %s6557_s23   ;;  %s4787_s22 = sphi %s4893_s22, %s6559_s22   ;;  %s4783_s21 = sphi %s4891_s21, %s6558_s21  }
   0x6   : > { %6491 = sst [smem:[#allocation6_spill]] %s4791_s23  ;;  %s4206_s26 = sadd.s32 4294967294, %s4795_s24  }
   0x7   : > { %6492 = sst [smem:[#allocation7_spill]] %s4795_s24  ;;  %s4916_s27 = sadd.s32 1, %s4795_s24  }
   0x8   : > { %6493 = sst [smem:[#allocation8_spill]] %s4916_s27  ;;  %s377_s28 = sadd.s32 1, %s4791_s23 }
   0x9   : > { %s374_s29 = ssub.s32 %s4795_s24, %s4916_s27  ;;  %p387_p0 = scmp.ne.s32.totalorder %s4791_s23, %s4787_s22 }
   0xa   : > { %p375_p1 = scmp.eq.s32.totalorder %s374_s29, 0  ;;  %p388_p2 = scmp.eq.s32.totalorder %s4912_s25, 1 }
   0xb   : > { %p393_p3 = scmp.ne.s32.totalorder %s4787_s22, %s4783_s21  ;;  %p394_p4 = scmp.eq.s32.totalorder %s4206_s26, 1 }
   0xc   : > { %s4927_s30 = scalar_select %p375_p1, %s4791_s23, %s377_s28  }
   0xd   : > { %p4929_p5 = por %p388_p2, %p387_p0  ;;  %p4933_p6 = por %p394_p4, %p393_p3 }
   0xe   : > { %6494 = sst [smem:[#allocation9_spill]] %s4927_s30  ;;  %p4209_p7 = scmp.ge.s32.totalorder %s4795_s24, 1 }
   0xf   : > { %s6496_s17 = scalar_select %p4933_p6, 1, 0 }
  0x10   : > { %p466_p8 = scmp.lt.s32.totalorder %s4795_s24, 3 }
  0x11   : > { %6497 = sst [smem:[#allocation10_spill]] %s6496_s17 }
  0x12   : > { %p467_p9 = pnand %p4209_p7, %p466_p8 }
  0x13   : > { %s4211_s18 = sshll.u32 (!%p467_p9), %s4912_s25, 1  ;;  %v4797_v0 = vmov (!%p467_p9), 0.0   ;;  %v665_v1 = vld [vmem:[%s6466_s4] sm:$0xff] (!%p467_p9)  ;;  %v4798_v2 = vmov (!%p467_p9), 0   ;;  %v667_v3 = vld [vmem:[%s6466_s4 + $0x10] sm:$0xff] (!%p467_p9)  ;;  %v666_v4 = vld [vmem:[%s6466_s4 + $0x8] sm:$0xff] (!%p467_p9) }
  0x14   : > { %470 = sbr.rel (%p467_p9) target bundleno = 2355 (0x933), region = 84  ;;  %p517_p10 = scmp.lt.s32.totalorder (!%p467_p9), %s4211_s18, 3  ;;  %765 = vmatprep.mubr.f32.mxu1 (!%p467_p9), %v4797_v0  ;;  %636 = vmatprep.mubr.f32.mxu0 (!%p467_p9), %v4797_v0  ;;  %v668_v5 = vld [vmem:[%s6466_s4 + $0x18] sm:$0xff] (!%p467_p9)  ;;  %vm567_vm0 = vcmask (!%p467_p9), 1042432   ;;  %v528_v8 = vld [vmem:[%s6464_s2] sm:$0xff] (!%p467_p9)  ;;  %vm554_vm1 = vcmask (!%p467_p9), 23552  }
  0x15   : > { %4506 = vset.pattern.permute.xlu0 (!%p467_p9), %v4798_v2  ;;  %4507 = vset.pattern.permute.xlu1 (!%p467_p9), %v4798_v2  ;;  %s6498_s21 = sld [smem:[#allocation11_spill]] (!%p467_p9)  ;;  %v661_v9 = vld [vmem:[%s6465_s3] sm:$0xff] (!%p467_p9)  ;;  %v529_v10 = vld [vmem:[%s6464_s2 + $0x8] sm:$0xff] (!%p467_p9)  ;;  %v530_v14 = vld [vmem:[%s6464_s2 + $0x10] sm:$0xff] (!%p467_p9)  ;;  %vm6488_vm10 = vcmask (!%p467_p9), 261120   ;;  %s4336_s17 = sshll.u32 (!%p467_p9), %s4912_s25, 7 }
  0x16   : > { %671 = vperm.xlu0 (!%p467_p9), %4506, %v665_v1   ;;  %681 = vperm.xlu1 (!%p467_p9), %4507, %v667_v3   ;;  %v914_v11 = vld [vmem:[%s6468_s6] sm:$0xff] (!%p467_p9)  ;;  %v662_v12 = vld [vmem:[%s6465_s3 + $0x8] sm:$0xff] (!%p467_p9)  ;;  %v663_v15 = vld [vmem:[%s6465_s3 + $0x10] sm:$0xff] (!%p467_p9)  ;;  %s6420_s28 = scalar_lea.hbm (!%p467_p9), %s6478_s16, %s4336_s17  ;;  %s4805_s25 = smov (!%p467_p9), [#allocation2]  }
  0x17   : > { %v915_v13 = vld [vmem:[%s6468_s6 + $0x8] sm:$0xff] (!%p467_p9)  ;;  %v531_v16 = vld [vmem:[%s6464_s2 + $0x18] sm:$0xff] (!%p467_p9)  ;;  %v916_v17 = vld [vmem:[%s6468_s6 + $0x10] sm:$0xff] (!%p467_p9)  ;;  %s4737_s23 = sshll.u32 (!%p467_p9), %s4805_s25, 4  ;;  %s4738_s23 = int_to_ptr.vmem [resolvable:$false] %s4737_s23 }
  0x18   : > { %v664_v18 = vld [vmem:[%s6465_s3 + $0x18] sm:$0xff] (!%p467_p9)  ;;  %v1172_v20 = vld [vmem:[%s6470_s8] sm:$0xff] (!%p467_p9)  ;;  %v1173_v21 = vld [vmem:[%s6470_s8 + $0x8] sm:$0xff] (!%p467_p9)  ;;  %s4739_s27 = scalar_lea.vmem (!%p467_p9), %s4738_s23, 256 }
  0x19   : > { %v917_v19 = vld [vmem:[%s6468_s6 + $0x18] sm:$0xff] (!%p467_p9)  ;;  %v1174_v22 = vld [vmem:[%s6470_s8 + $0x10] sm:$0xff] (!%p467_p9)  ;;  %v1421_v24 = vld [vmem:[%s6472_s10] sm:$0xff] (!%p467_p9) }
  0x1a   : > { %676 = vperm.xlu0 (!%p467_p9), %4506, %v666_v4   ;;  %686 = vperm.xlu1 (!%p467_p9), %4507, %v668_v5   ;;  %v1175_v23 = vld [vmem:[%s6470_s8 + $0x18] sm:$0xff] (!%p467_p9)  ;;  %v1422_v25 = vld [vmem:[%s6472_s10 + $0x8] sm:$0xff] (!%p467_p9)  ;;  %v1423_v26 = vld [vmem:[%s6472_s10 + $0x10] sm:$0xff] (!%p467_p9) }
  0x1b   : > { %s6561_s18 = smov (!%p517_p10, %s4211_s18), 3  ;;  %v1424_v27 = vld [vmem:[%s6472_s10 + $0x18] sm:$0xff]  ;;  %v4241_v28 = vld [vmem:[%s6470_s8 + $0x20] sm:$0xff]  ;;  %v4242_v29 = vld [vmem:[%s6470_s8 + $0x28] sm:$0xff] }
  0x1c   : > { %s4212_s19 = sshll.u32 %s6561_s18, 2  ;;  %v4243_v30 = vld [vmem:[%s6470_s8 + $0x30] sm:$0xff]  ;;  %v4244_v31 = vld [vmem:[%s6470_s8 + $0x38] sm:$0xff]  ;;  %v4253_v32 = vld [vmem:[%s6472_s10 + $0x20] sm:$0xff] }
  0x1d   : > { %s520_s24 = scalar_lea.vmem %s6498_s21, %s4212_s19  ;;  %v4254_v33 = vld [vmem:[%s6472_s10 + $0x28] sm:$0xff]  ;;  %v4255_v34 = vld [vmem:[%s6472_s10 + $0x30] sm:$0xff]  ;;  %v4256_v35 = vld [vmem:[%s6472_s10 + $0x38] sm:$0xff]  ;;  %s513_s21 = sand.u32 1, %s4787_s22  }
  0x1e   : > { %v523_v6 = vld [vmem:[%s520_s24] sm:$0x77]  ;;  %534 = vperm.xlu0 %4506, %v528_v8   ;;  %539 = vperm.xlu1 %4507, %v529_v10   ;;  %v2189_v37 = vld [vmem:[%s6474_s12 + $0x8] sm:$0xff]  ;;  %v2190_v38 = vld [vmem:[%s6474_s12 + $0x10] sm:$0xff]  ;;  %s4210_s24 = sshll.u32 %s513_s21, 3  ;;  %s4133_s30 = scalar_lea.sflag [#allocation3], %s513_s21 }
  0x1f   : > { %v553_v7 = vcombine.high %v523_v6, %v523_v6  ;;  %v2188_v36 = vld [vmem:[%s6474_s12] sm:$0xff]  ;;  %v2191_v39 = vld [vmem:[%s6474_s12 + $0x18] sm:$0xff]  ;;  %v525_v42 = vld [vmem:[%s6463_s1 + $0x8] sm:$0xff]  ;;  %s515_s18 = scalar_lea.vmem [#allocation2], %s4210_s24 }
  0x20   : > { %v4119_v40 = vld [vmem:[%s6477_s15] sm:$0x7]  ;;  %v526_v43 = vld [vmem:[%s6463_s1 + $0x10] sm:$0xff]  ;;  %v527_v44 = vld [vmem:[%s6463_s1 + $0x18] sm:$0xff]  ;;  %s4147_s19 = sshll.u32 %s515_s18, 4  ;;  %s6422_s19 = int_to_ptr.vmem [resolvable:$true] %s4147_s19 }
  0x21   : > { %4219 = vmatprep.subr.msk.mxu1 %vm567_vm0, %v553_v7  ;;  %4213 = vmatprep.subr.msk.mxu0 %vm567_vm0, %v553_v7  ;;  %v524_v41 = vld [vmem:[%s6463_s1] sm:$0xff]  ;;  %s4733_s29 = scalar_lea.vmem %s6422_s19, 128  ;;  %p4740_p0 = scmp.lt.s32.totalorder %s6422_s19, %s4738_s23 }
  0x22   : > { %4220 = vmatpush1.msk.msra.mxu1 %vm567_vm0, %v523_v6  ;;  %4214 = vmatpush1.msk.msra.mxu0 %vm567_vm0, %v523_v6  ;;  %p4734_p11 = scmp.ne.s32.totalorder %s6422_s19, %s4733_s29  ;;  %p4741_p1 = scmp.lt.s32.totalorder %s4739_s27, %s4733_s29 }
  0x23   : > { %4221 = vmatmul.mubr.msk.f32.vlgmr.msra.gmra.mrb[0].mxu1 %vm554_vm1, %v661_v9  ;;  %920 = vperm.xlu0 %4506, %v914_v11  }
  0x24   : > { %771 = vmatprep.mubr.f32.mxu1 %v4797_v0  ;;  %925 = vperm.xlu1 %4507, %v915_v13   ;;  %p4735_p12 = pnand %p4734_p11, %p4929_p5  ;;  %p4742_p2 = por %p4741_p1, %p4740_p0 }
  0x25   : > { %4215 = vmatmul.mubr.msk.f32.vlgmr.msra.gmra.mrb[0].mxu0 %vm554_vm1, %v524_v41 }
  0x26   : > { %642 = vmatprep.mubr.f32.mxu0 %v4797_v0  ;;  %p4736_p13 = pneg %p4735_p12 }
  0x27   : > { %4222 = vmatmul.mubr.msk.f32.gmra.mrb[2].mxu1 %vm554_vm1, %v662_v12  ;;  %544 = vperm.xlu0 %4506, %v530_v14  }
  0x28   : > { %777 = vmatprep.mubr.f32.mxu1 %v4797_v0  ;;  %549 = vperm.xlu1 %4507, %v531_v16   ;;  %p4743_p3 = pnand %p4742_p2, %p4736_p13 }
  0x29   : > { %4216 = vmatmul.mubr.msk.f32.gmra.mrb[2].mxu0 %vm554_vm1, %v525_v42 }
  0x2a   : > { %648 = vmatprep.mubr.f32.mxu0 %v4797_v0 }
  0x2b   : > { %4223 = vmatmul.mubr.msk.f32.gmra.mrb[4].mxu1 %vm554_vm1, %v663_v15  ;;  %930 = vperm.xlu0 %4506, %v916_v17  }
  0x2c   : > { %783 = vmatprep.mubr.f32.mxu1 %v4797_v0  ;;  %935 = vperm.xlu1 %4507, %v917_v19  }
  0x2d   : > { %4217 = vmatmul.mubr.msk.f32.gmra.mrb[4].mxu0 %vm554_vm1, %v526_v43 }
  0x2e   : > { %654 = vmatprep.mubr.f32.mxu0 %v4797_v0 }
  0x2f   : > { %4224 = vmatmul.mubr.msk.f32.gmra.mrb[6].mxu1 %vm554_vm1, %v664_v18  ;;  %1178 = vperm.xlu0 %4506, %v1172_v20  }
  0x30   : > { %1272 = vmatprep.mubr.f32.mxu1 %v4797_v0  ;;  %1183 = vperm.xlu1 %4507, %v1173_v21  }
  0x31   : > { %4218 = vmatmul.mubr.msk.f32.gmra.mrb[6].mxu0 %vm554_vm1, %v527_v44 }
  0x32   : > { %1015 = vmatprep.mubr.f32.mxu0 %v4797_v0 }
  0x33   : > { %1188 = vperm.xlu0 %4506, %v1174_v22  }
  0x34   : > { %1193 = vperm.xlu1 %4507, %v1175_v23  }
  0x37   : > { %1427 = vperm.xlu0 %4506, %v1421_v24  }
  0x38   : > { %1432 = vperm.xlu1 %4507, %v1422_v25  }
  0x3b   : > { %1437 = vperm.xlu0 %4506, %v1423_v26  }
  0x3c   : > { %1442 = vperm.xlu1 %4507, %v1424_v27  }
  0x3f   : > { %1686 = vperm.xlu0 %4506, %v4241_v28  }
  0x40   : > { %1691 = vperm.xlu1 %4507, %v4242_v29  }
  0x43   : > { %1696 = vperm.xlu0 %4506, %v4243_v30  }
  0x44   : > { %1701 = vperm.xlu1 %4507, %v4244_v31  }
  0x47   : > { %1937 = vperm.xlu0 %4506, %v4253_v32  }
  0x48   : > { %1942 = vperm.xlu1 %4507, %v4254_v33  }
  0x4b   : > { %1947 = vperm.xlu0 %4506, %v4255_v34  }
  0x4c   : > { %1952 = vperm.xlu1 %4507, %v4256_v35  }
  0x4f   : > { %2194 = vperm.xlu0 %4506, %v2188_v36  }
  0x50   : > { %2199 = vperm.xlu1 %4507, %v2189_v37  }
  0x53   : > { %2204 = vperm.xlu0 %4506, %v2190_v38  }
  0x54   : > { %2209 = vperm.xlu1 %4507, %v2191_v39  }
  0x57   : > { %4122 = vperm.xlu0 %4506, %v4119_v40  }
  0x95   : > { %v672_v45 = vpop.permute.xlu0 %671  ;;  %v682_v57 = vpop.permute.xlu1 %681 }
  0x99   : > { %v677_v51 = vpop.permute.xlu0 %676  ;;  %v687_v9 = vpop.permute.xlu1 %686 }
  0xf6   : > { %v767_v46 = vpop.f32.mrb[0].mxu1 }
  0xf7   : > { %v5088_v47 = vadd.f32 %v767_v46, %v672_v45  ;;  %v769_v48 = vpop.f32.mrb[1].mxu1 }
  0xf8   : > { %v5090_v49 = vadd.f32 %v769_v48, %v672_v45 }
  0xf9   : > { %v798_v50 = vand.u32 2147483647, %v5088_v47  ;;  %v790_v42 = vmax.f32 %v5088_v47, 0.0 }
  0xfa   : > { %v799_v52 = vand.u32 2147483647, %v5090_v49  ;;  %v773_v53 = vpop.f32.mrb[2].mxu1  ;;  %v791_v44 = vmax.f32 %v5090_v49, 0.0 }
  0xfb   : > { %v806_v54 = vsub.f32 0.0, %v798_v50  ;;  %v5094_v55 = vadd.f32 %v773_v53, %v677_v51  ;;  %v775_v56 = vpop.f32.mrb[3].mxu1 }
  0xfc   : > { %v807_v58 = vsub.f32 0.0, %v799_v52  ;;  %v5096_v59 = vadd.f32 %v775_v56, %v677_v51 }
  0xfd   : > { %v814_v60 = vmul.f32 1.442695, %v806_v54  ;;  %v800_v61 = vand.u32 2147483647, %v5094_v55  ;;  %v792_v54 = vmax.f32 %v5094_v55, 0.0 }
  0xfe   : > { %v816_v62 = vmul.f32 1.442695, %v807_v58  ;;  %v801_v63 = vand.u32 2147483647, %v5096_v59  ;;  %v779_v1 = vpop.f32.mrb[4].mxu1 }
  0xff   : > { %4509 = vpow2.f32 %v814_v60  ;;  %v808_v2 = vsub.f32 0.0, %v800_v61  ;;  %v5100_v3 = vadd.f32 %v779_v1, %v682_v57  ;;  %v781_v4 = vpop.f32.mrb[5].mxu1  ;;  %v793_v61 = vmax.f32 %v5096_v59, 0.0  ;;  %v540_v1 = vpop.permute.xlu1 %539 }
 0x100   : > { %4511 = vpow2.f32 %v816_v62  ;;  %v809_v5 = vsub.f32 0.0, %v801_v63  ;;  %v5102_v6 = vadd.f32 %v781_v4, %v682_v57 }
 0x101   : > { %v818_v7 = vmul.f32 1.442695, %v808_v2  ;;  %v802_v8 = vand.u32 2147483647, %v5100_v3 }
 0x102   : > { %v820_v10 = vmul.f32 1.442695, %v809_v5  ;;  %v803_v11 = vand.u32 2147483647, %v5102_v6  ;;  %v785_v12 = vpop.f32.mrb[6].mxu1 }
 0x103   : > { %4513 = vpow2.f32 %v818_v7  ;;  %v810_v13 = vsub.f32 0.0, %v802_v8  ;;  %v5106_v14 = vadd.f32 %v785_v12, %v687_v9  ;;  %v787_v15 = vpop.f32.mrb[7].mxu1  ;;  %v926_v55 = vpop.permute.xlu1 %925 }
 0x104   : > { %4515 = vpow2.f32 %v820_v10  ;;  %v811_v16 = vsub.f32 0.0, %v803_v11  ;;  %v5109_v21 = vadd.f32 %v787_v15, %v687_v9 }
 0x105   : > { %v822_v17 = vmul.f32 1.442695, %v810_v13  ;;  %v804_v18 = vand.u32 2147483647, %v5106_v14 }
 0x106   : > { %v824_v19 = vmul.f32 1.442695, %v811_v16  ;;  %v805_v27 = vand.u32 2147483647, %v5109_v21 }
 0x107   : > { %4517 = vpow2.f32 %v822_v17  ;;  %v812_v20 = vsub.f32 0.0, %v804_v18 }
 0x108   : > { %4519 = vpow2.f32 %v824_v19  ;;  %v813_v32 = vsub.f32 0.0, %v805_v27 }
 0x109   : > { %v4510_v22 = vpop.eup %4509  ;;  %v826_v23 = vmul.f32 1.442695, %v812_v20 }
 0x10a   : > { %v4512_v24 = vpop.eup %4511  ;;  %v830_v25 = vadd.f32 1.0, %v4510_v22  ;;  %v833_v34 = vmul.f32 -0.5, %v4510_v22  ;;  %v828_v38 = vmul.f32 1.442695, %v813_v32  ;;  %v836_v46 = vand.u32 2147483647, %v4510_v22 }
 0x10b   : > { %v839_v26 = vadd.f32 1.0, %v4512_v24  ;;  %4521 = vpow2.f32 %v826_v23  ;;  %v842_v35 = vmul.f32 -0.5, %v4512_v24  ;;  %v845_v50 = vand.u32 2147483647, %v4512_v24 }
 0x10c   : > { %4523 = vlog2.f32 %v830_v25  ;;  %v834_v43 = vadd.f32 1.0, %v833_v34  ;;  %vm5125_vm2 = vcmp.lt.f32.partialorder %v836_v46, 0.0004427343 }
 0x10d   : > { %v4514_v28 = vpop.eup %4513  ;;  %4525 = vlog2.f32 %v839_v26  ;;  %v843_v48 = vadd.f32 1.0, %v842_v35  ;;  %vm5129_vm3 = vcmp.lt.f32.partialorder %v845_v50, 0.0004427343 }
 0x10e   : > { %v4516_v29 = vpop.eup %4515  ;;  %v848_v30 = vadd.f32 1.0, %v4514_v28  ;;  %v851_v37 = vmul.f32 -0.5, %v4514_v28  ;;  %v854_v58 = vand.u32 2147483647, %v4514_v28  ;;  %v835_v47 = vmul.f32 %v4510_v22, %v834_v43 }
 0x10f   : > { %v857_v31 = vadd.f32 1.0, %v4516_v29  ;;  %v860_v40 = vmul.f32 -0.5, %v4516_v29  ;;  %v863_v49 = vand.u32 2147483647, %v4516_v29  ;;  %v844_v2 = vmul.f32 %v4512_v24, %v843_v48 }
 0x110   : > { %4527 = vlog2.f32 %v848_v30  ;;  %v852_v56 = vadd.f32 1.0, %v851_v37  ;;  %vm855_vm4 = vcmp.lt.f32.partialorder %v854_v58, 0.0004427343  ;;  %v794_v37 = vmax.f32 %v5100_v3, 0.0 }
 0x111   : > { %v5112_v33 = vpop.eup %4517  ;;  %4529 = vlog2.f32 %v857_v31  ;;  %v861_v60 = vadd.f32 1.0, %v860_v40  ;;  %vm864_vm5 = vcmp.lt.f32.partialorder %v863_v49, 0.0004427343  ;;  %v797_v58 = vmax.f32 %v5109_v21, 0.0  ;;  %v912_v21 = vld [vmem:[%s6467_s5 + $0x10] sm:$0xff] }
 0x112   : > { %v866_v36 = vadd.f32 1.0, %v5112_v33  ;;  %v5115_v39 = vpop.eup %4519  ;;  %v869_v62 = vmul.f32 -0.5, %v5112_v33  ;;  %v853_v8 = vmul.f32 %v4514_v28, %v852_v56  ;;  %v872_v16 = vand.u32 2147483647, %v5112_v33 }
 0x113   : > { %v875_v4 = vadd.f32 1.0, %v5115_v39  ;;  %v862_v12 = vmul.f32 %v4516_v29, %v861_v60  ;;  %v878_v40 = vmul.f32 -0.5, %v5115_v39  ;;  %v881_v50 = vand.u32 2147483647, %v5115_v39 }
 0x114   : > { %4531 = vlog2.f32 %v866_v36  ;;  %v870_v15 = vadd.f32 1.0, %v869_v62  ;;  %vm873_vm6 = vcmp.lt.f32.partialorder %v872_v16, 0.0004427343  ;;  %v913_v62 = vld [vmem:[%s6467_s5 + $0x18] sm:$0xff] }
 0x115   : > { %v5117_v41 = vpop.eup %4521  ;;  %4533 = vpow2.f32 %v828_v38  ;;  %v796_v38 = vmax.f32 %v5106_v14, 0.0  ;;  %v879_v48 = vadd.f32 1.0, %v878_v40  ;;  %vm882_vm8 = vcmp.lt.f32.partialorder %v881_v50, 0.0004427343 }
 0x116   : > { %v4524_v45 = vpop.eup %4523  ;;  %v884_v51 = vadd.f32 1.0, %v5117_v41  ;;  %v887_v9 = vmul.f32 -0.5, %v5117_v41  ;;  %v890_v27 = vand.u32 2147483647, %v5117_v41  ;;  %v871_v29 = vmul.f32 %v5112_v33, %v870_v15 }
 0x117   : > { %v4526_v52 = vpop.eup %4525  ;;  %v832_v53 = vmul.f32 0.6931472, %v4524_v45  ;;  %v880_v3 = vmul.f32 %v5115_v39, %v879_v48  ;;  %v910_v39 = vld [vmem:[%s6467_s5] sm:$0xff] }
 0x118   : > { %v841_v57 = vmul.f32 0.6931472, %v4526_v52  ;;  %4535 = vlog2.f32 %v884_v51  ;;  %v888_v25 = vadd.f32 1.0, %v887_v9  ;;  %vm891_vm7 = vcmp.lt.f32.partialorder %v890_v27, 0.0004427343 }
 0x119   : > { %v838_v7 = vsel %vm5125_vm2, %v835_v47, %v832_v53  ;;  %4537 = vlog2.f32 %v875_v4 }
 0x11a   : > { %v4528_v63 = vpop.eup %4527  ;;  %v847_v10 = vsel %vm5129_vm3, %v844_v2, %v841_v57  ;;  %v902_v18 = vadd.f32 %v838_v7, %v790_v42  ;;  %v889_v36 = vmul.f32 %v5117_v41, %v888_v25  ;;  %v795_v57 = vmax.f32 %v5102_v6, 0.0  ;;  %v911_v6 = vld [vmem:[%s6467_s5 + $0x8] sm:$0xff] }
 0x11b   : > { %v4530_v5 = vpop.eup %4529  ;;  %v850_v59 = vmul.f32 0.6931472, %v4528_v63  ;;  %v903_v22 = vadd.f32 %v847_v10, %v791_v44  ;;  %v535_v63 = vpop.permute.xlu0 %534  ;;  %v4405_v10 = vadd.f32 %v926_v55, %v540_v1 }
 0x11c   : > { %v859_v11 = vmul.f32 0.6931472, %v4530_v5 }
 0x11d   : > { %v856_v13 = vsel %vm855_vm4, %v853_v8, %v850_v59 }
 0x11e   : > { %v4532_v17 = vpop.eup %4531  ;;  %v904_v19 = vadd.f32 %v856_v13, %v792_v54  ;;  %v865_v20 = vsel %vm864_vm5, %v862_v12, %v859_v11  ;;  %v550_v12 = vpop.permute.xlu1 %549 }
 0x11f   : > { %v905_v23 = vadd.f32 %v865_v20, %v793_v61  ;;  %v868_v24 = vmul.f32 0.6931472, %v4532_v17  ;;  %v4534_v28 = vpop.eup %4533  ;;  %v921_v2 = vpop.permute.xlu0 %920 }
 0x120   : > { %v4339_v26 = vpack.c.bf16 %v904_v19, %v902_v18  ;;  %v893_v32 = vadd.f32 1.0, %v4534_v28  ;;  %v896_v44 = vmul.f32 -0.5, %v4534_v28  ;;  %v899_v52 = vand.u32 2147483647, %v4534_v28 }
 0x121   : > { %v4337_v30 = vpack.c.bf16 %v905_v23, %v903_v22  ;;  %v874_v34 = vsel %vm873_vm6, %v871_v29, %v868_v24  ;;  %v4401_v4 = vadd.f32 %v921_v2, %v535_v63 }
 0x122   : > { %v4536_v31 = vpop.eup %4535  ;;  %4539 = vlog2.f32 %v893_v32  ;;  %v906_v33 = vadd.f32 %v874_v34, %v794_v37  ;;  %v897_v51 = vadd.f32 1.0, %v896_v44  ;;  %vm900_vm9 = vcmp.lt.f32.partialorder %v899_v52, 0.0004427343  ;;  %v936_v32 = vpop.permute.xlu1 %935 }
 0x123   : > { %v886_v35 = vmul.f32 0.6931472, %v4536_v31  ;;  %4338 = vmatprep.subr.bf16.mxu0 %v4337_v30  ;;  %v4538_v45 = vpop.eup %4537  ;;  %v545_v5 = vpop.permute.xlu0 %544 }
 0x124   : > { %4340 = vmatpush1.bf16.msra.mxu0 %v4339_v26  ;;  %v877_v41 = vmul.f32 0.6931472, %v4538_v45  ;;  %v898_v56 = vmul.f32 %v4534_v28, %v897_v51 }
 0x125   : > { %v892_v42 = vsel %vm891_vm7, %v889_v36, %v886_v35  ;;  %v4413_v36 = vadd.f32 %v936_v32, %v550_v12 }
 0x126   : > { %v908_v43 = vadd.f32 %v892_v42, %v796_v38  ;;  %v883_v53 = vsel %vm882_vm8, %v880_v3, %v877_v41 }
 0x127   : > { %v907_v47 = vadd.f32 %v883_v53, %v795_v57  ;;  %v931_v19 = vpop.permute.xlu0 %930 }
 0x128   : > { %v4343_v46 = vpack.c.bf16 %v908_v43, %v906_v33  ;;  %v4409_v23 = vadd.f32 %v931_v19, %v545_v5 }
 0x12c   : > { %v4540_v14 = vpop.eup %4539 }
 0x12d   : > { %v895_v54 = vmul.f32 0.6931472, %v4540_v14 }
 0x12f   : > { %v901_v60 = vsel %vm900_vm9, %v898_v56, %v895_v54 }
 0x130   : > { %v909_v61 = vadd.f32 %v901_v60, %v797_v58 }
 0x132   : > { %v4341_v49 = vpack.c.bf16 %v909_v61, %v907_v47 }
 0x134   : > { %4342 = vmatprep.subr.bf16.mxu0 %v4341_v49 }
 0x135   : > { %4344 = vmatpush1.bf16.msra.mxu0 %v4343_v46 }
 0x138   : > { %4225 = vmatmul.mubr.msk.f32.vlgmr.msra.gmra.mrb[0].mxu0 %vm6488_vm10, %v910_v39 }
 0x139   : > { %1021 = vmatprep.mubr.f32.mxu0 %v4797_v0 }
 0x13c   : > { %4226 = vmatmul.mubr.msk.f32.gmra.mrb[2].mxu0 %vm6488_vm10, %v911_v6 }
 0x13d   : > { %1027 = vmatprep.mubr.f32.mxu0 %v4797_v0 }
 0x140   : > { %4227 = vmatmul.mubr.msk.f32.gmra.mrb[4].mxu0 %vm6488_vm10, %v912_v21 }
 0x141   : > { %1033 = vmatprep.mubr.f32.mxu0 %v4797_v0 }
 0x144   : > { %4228 = vmatmul.mubr.msk.f32.gmra.mrb[6].mxu0 %vm6488_vm10, %v913_v62 }
 0x145   : > { %1521 = vmatprep.mubr.f32.mxu0 %v4797_v0 }
 0x20b   : > { %v1017_v7 = vpop.f32.mrb[0].mxu0 }
 0x20c   : > { %v5170_v59 = vadd.f32 %v4401_v4, %v1017_v7  ;;  %v1019_v8 = vpop.f32.mrb[1].mxu0 }
 0x20d   : > { %v5172_v9 = vadd.f32 %v4401_v4, %v1019_v8 }
 0x20e   : > { %v1056_v11 = vand.u32 2147483647, %v5170_v59 }
 0x20f   : > { %v1057_v13 = vand.u32 2147483647, %v5172_v9  ;;  %v1023_v15 = vpop.f32.mrb[2].mxu0 }
 0x210   : > { %v1064_v16 = vsub.f32 0.0, %v1056_v11  ;;  %v5176_v17 = vadd.f32 %v4405_v10, %v1023_v15  ;;  %v1025_v18 = vpop.f32.mrb[3].mxu0  ;;  %v1049_v11 = vmax.f32 %v5172_v9, 0.0 }
 0x211   : > { %v1065_v20 = vsub.f32 0.0, %v1057_v13  ;;  %v5178_v22 = vadd.f32 %v4405_v10, %v1025_v18 }
 0x212   : > { %v1072_v24 = vmul.f32 1.442695, %v1064_v16  ;;  %v1058_v25 = vand.u32 2147483647, %v5176_v17  ;;  %v1050_v16 = vmax.f32 %v5176_v17, 0.0 }
 0x213   : > { %v1074_v26 = vmul.f32 1.442695, %v1065_v20  ;;  %v1059_v27 = vand.u32 2147483647, %v5178_v22  ;;  %v1029_v28 = vpop.f32.mrb[4].mxu0 }
 0x214   : > { %4541 = vpow2.f32 %v1072_v24  ;;  %v1066_v29 = vsub.f32 0.0, %v1058_v25  ;;  %v5182_v30 = vadd.f32 %v4409_v23, %v1029_v28  ;;  %v1031_v31 = vpop.f32.mrb[5].mxu0  ;;  %v1171_v28 = vld [vmem:[%s6469_s7 + $0x18] sm:$0xff] }
 0x215   : > { %4543 = vpow2.f32 %v1074_v26  ;;  %v1067_v34 = vsub.f32 0.0, %v1059_v27  ;;  %v5184_v35 = vadd.f32 %v4409_v23, %v1031_v31  ;;  %v1051_v23 = vmax.f32 %v5178_v22, 0.0 }
 0x216   : > { %v1076_v37 = vmul.f32 1.442695, %v1066_v29  ;;  %v1060_v38 = vand.u32 2147483647, %v5182_v30 }
 0x217   : > { %v1078_v40 = vmul.f32 1.442695, %v1067_v34  ;;  %v1061_v42 = vand.u32 2147483647, %v5184_v35  ;;  %v1035_v33 = vpop.f32.mrb[6].mxu0 }
 0x218   : > { %4545 = vpow2.f32 %v1076_v37  ;;  %v5188_v43 = vadd.f32 %v4413_v36, %v1035_v33  ;;  %v1037_v44 = vpop.f32.mrb[7].mxu0  ;;  %v1068_v48 = vsub.f32 0.0, %v1060_v38  ;;  %v1048_v33 = vmax.f32 %v5170_v59, 0.0 }
 0x219   : > { %4547 = vpow2.f32 %v1078_v40  ;;  %v1069_v45 = vsub.f32 0.0, %v1061_v42  ;;  %v5191_v51 = vadd.f32 %v4413_v36, %v1037_v44 }
 0x21a   : > { %v1062_v46 = vand.u32 2147483647, %v5188_v43  ;;  %v1080_v54 = vmul.f32 1.442695, %v1068_v48 }
 0x21b   : > { %v1082_v50 = vmul.f32 1.442695, %v1069_v45  ;;  %v1063_v57 = vand.u32 2147483647, %v5191_v51 }
 0x21c   : > { %v1070_v41 = vsub.f32 0.0, %v1062_v46 }
 0x21d   : > { %4549 = vpow2.f32 %v1082_v50  ;;  %v1071_v49 = vsub.f32 0.0, %v1063_v57 }
 0x21e   : > { %v4542_v52 = vpop.eup %4541  ;;  %v1084_v3 = vmul.f32 1.442695, %v1070_v41 }
 0x21f   : > { %v4544_v14 = vpop.eup %4543  ;;  %v1088_v53 = vadd.f32 1.0, %v4542_v52  ;;  %v1091_v6 = vmul.f32 -0.5, %v4542_v52  ;;  %v1086_v62 = vmul.f32 1.442695, %v1071_v49  ;;  %v1094_v4 = vand.u32 2147483647, %v4542_v52 }
 0x220   : > { %v1097_v56 = vadd.f32 1.0, %v4544_v14  ;;  %4551 = vpow2.f32 %v1084_v3  ;;  %v1100_v39 = vmul.f32 -0.5, %v4544_v14  ;;  %v1103_v7 = vand.u32 2147483647, %v4544_v14 }
 0x221   : > { %4553 = vlog2.f32 %v1088_v53  ;;  %v1092_v10 = vadd.f32 1.0, %v1091_v6  ;;  %vm5204_vm11 = vcmp.lt.f32.partialorder %v1094_v4, 0.0004427343 }
 0x222   : > { %v4546_v58 = vpop.eup %4545  ;;  %4555 = vlog2.f32 %v1097_v56  ;;  %v1101_v5 = vadd.f32 1.0, %v1100_v39  ;;  %vm5208_vm12 = vcmp.lt.f32.partialorder %v1103_v7, 0.0004427343 }
 0x223   : > { %v4548_v60 = vpop.eup %4547  ;;  %v1106_v47 = vadd.f32 1.0, %v4546_v58  ;;  %4557 = vpow2.f32 %v1080_v54  ;;  %v1109_v21 = vmul.f32 -0.5, %v4546_v58  ;;  %v1112_v18 = vand.u32 2147483647, %v4546_v58 }
 0x224   : > { %v1115_v61 = vadd.f32 1.0, %v4548_v60  ;;  %v1118_v1 = vmul.f32 -0.5, %v4548_v60  ;;  %v1121_v24 = vand.u32 2147483647, %v4548_v60  ;;  %v1102_v9 = vmul.f32 %v4544_v14, %v1101_v5 }
 0x225   : > { %4559 = vlog2.f32 %v1106_v47  ;;  %v1110_v12 = vadd.f32 1.0, %v1109_v21  ;;  %v1093_v31 = vmul.f32 %v4542_v52, %v1092_v10  ;;  %vm1113_vm13 = vcmp.lt.f32.partialorder %v1112_v18, 0.0004427343 }
 0x226   : > { %4561 = vlog2.f32 %v1115_v61  ;;  %v1119_v19 = vadd.f32 1.0, %v1118_v1  ;;  %vm1122_vm14 = vcmp.lt.f32.partialorder %v1121_v24, 0.0004427343 }
 0x227   : > { %v5194_v63 = vpop.eup %4549  ;;  %4563 = vpow2.f32 %v1086_v62  ;;  %v1111_v34 = vmul.f32 %v4546_v58, %v1110_v12  ;;  %v1054_v12 = vmax.f32 %v5188_v43, 0.0 }
 0x228   : > { %v1133_v17 = vadd.f32 1.0, %v5194_v63  ;;  %v1120_v38 = vmul.f32 %v4548_v60, %v1119_v19  ;;  %v1136_v53 = vmul.f32 -0.5, %v5194_v63  ;;  %v1139_v6 = vand.u32 2147483647, %v5194_v63 }
 0x22a   : > { %v5196_v2 = vpop.eup %4551  ;;  %v1137_v61 = vadd.f32 1.0, %v1136_v53  ;;  %vm1140_vm0 = vcmp.lt.f32.partialorder %v1139_v6, 0.0004427343 }
 0x22b   : > { %v4554_v55 = vpop.eup %4553  ;;  %v1142_v25 = vadd.f32 1.0, %v5196_v2  ;;  %v1145_v59 = vmul.f32 -0.5, %v5196_v2  ;;  %v1148_v49 = vand.u32 2147483647, %v5196_v2 }
 0x22c   : > { %v4556_v8 = vpop.eup %4555  ;;  %v1090_v20 = vmul.f32 0.6931472, %v4554_v55 }
 0x22d   : > { %v5199_v13 = vpop.eup %4557  ;;  %v1099_v15 = vmul.f32 0.6931472, %v4556_v8  ;;  %4565 = vlog2.f32 %v1142_v25  ;;  %v1146_v60 = vadd.f32 1.0, %v1145_v59  ;;  %v1138_v8 = vmul.f32 %v5194_v63, %v1137_v61 }
 0x22e   : > { %v1124_v22 = vadd.f32 1.0, %v5199_v13  ;;  %v1096_v40 = vsel %vm5204_vm11, %v1093_v31, %v1090_v20  ;;  %4567 = vlog2.f32 %v1133_v17  ;;  %v1127_v54 = vmul.f32 -0.5, %v5199_v13  ;;  %v1179_v17 = vpop.permute.xlu0 %1178 }
 0x22f   : > { %v4560_v26 = vpop.eup %4559  ;;  %v1105_v36 = vsel %vm5208_vm12, %v1102_v9, %v1099_v15  ;;  %v5225_v50 = vadd.f32 %v1096_v40, %v1048_v33  ;;  %v1130_v62 = vand.u32 2147483647, %v5199_v13  ;;  %v1147_v5 = vmul.f32 %v5196_v2, %v1146_v60  ;;  %v1170_v9 = vld [vmem:[%s6469_s7 + $0x10] sm:$0xff] }
 0x230   : > { %v4562_v29 = vpop.eup %4561  ;;  %v1108_v32 = vmul.f32 0.6931472, %v4560_v26  ;;  %v5221_v46 = vadd.f32 %v1105_v36, %v1049_v11  ;;  %4569 = vlog2.f32 %v1124_v22  ;;  %v1128_v39 = vadd.f32 1.0, %v1127_v54  ;;  %v1184_v36 = vpop.permute.xlu1 %1183 }
 0x231   : > { %v1117_v37 = vmul.f32 0.6931472, %v4562_v29  ;;  %v4564_v41 = vpop.eup %4563  ;;  %vm1149_vm15 = vcmp.lt.f32.partialorder %v1148_v49, 0.0004427343  ;;  %vm1131_vm1 = vcmp.lt.f32.partialorder %v1130_v62, 0.0004427343 }
 0x232   : > { %v1114_v42 = vsel %vm1113_vm13, %v1111_v34, %v1108_v32  ;;  %v1151_v14 = vadd.f32 1.0, %v4564_v41  ;;  %v1154_v57 = vmul.f32 -0.5, %v4564_v41  ;;  %v1157_v7 = vand.u32 2147483647, %v4564_v41 }
 0x233   : > { %v5219_v44 = vadd.f32 %v1114_v42, %v1050_v16  ;;  %v1123_v45 = vsel %vm1122_vm14, %v1120_v38, %v1117_v37  ;;  %v1129_v11 = vmul.f32 %v5199_v13, %v1128_v39  ;;  %v1055_v2 = vmax.f32 %v5191_v51, 0.0  ;;  %v1169_v51 = vld [vmem:[%s6469_s7 + $0x8] sm:$0xff] }
 0x234   : > { %v5223_v48 = vadd.f32 %v1123_v45, %v1051_v23  ;;  %4571 = vlog2.f32 %v1151_v14  ;;  %v1155_v55 = vadd.f32 1.0, %v1154_v57  ;;  %v1053_v23 = vmax.f32 %v5184_v35, 0.0  ;;  %v1189_v14 = vpop.permute.xlu0 %1188  ;;  %v1194_v39 = vpop.permute.xlu1 %1193 }
 0x235   : > { %v4347_v3 = vpack.c.bf16 %v5219_v44, %v5225_v50  ;;  %vm1158_vm2 = vcmp.lt.f32.partialorder %v1157_v7, 0.0004427343  ;;  %v1052_v63 = vmax.f32 %v5182_v30, 0.0  ;;  %v1168_v30 = vld [vmem:[%s6469_s7] sm:$0xff] }
 0x236   : > { %v4345_v52 = vpack.c.bf16 %v5223_v48, %v5221_v46  ;;  %v1156_v19 = vmul.f32 %v4564_v41, %v1155_v55 }
 0x237   : > { %v4566_v56 = vpop.eup %4565 }
 0x238   : > { %4346 = vmatprep.subr.bf16.mxu1 %v4345_v52  ;;  %v4568_v58 = vpop.eup %4567  ;;  %v1144_v21 = vmul.f32 0.6931472, %v4566_v56 }
 0x239   : > { %4348 = vmatpush1.bf16.msra.mxu1 %v4347_v3  ;;  %v1135_v1 = vmul.f32 0.6931472, %v4568_v58 }
 0x23a   : > { %v4570_v47 = vpop.eup %4569  ;;  %v1150_v15 = vsel %vm1149_vm15, %v1147_v5, %v1144_v21 }
 0x23b   : > { %v1126_v4 = vmul.f32 0.6931472, %v4570_v47  ;;  %v1141_v16 = vsel %vm1140_vm0, %v1138_v8, %v1135_v1  ;;  %v5244_v24 = vadd.f32 %v1150_v15, %v1054_v12 }
 0x23c   : > { %v5246_v13 = vadd.f32 %v1141_v16, %v1053_v23 }
 0x23d   : > { %v1132_v20 = vsel %vm1131_vm1, %v1129_v11, %v1126_v4 }
 0x23e   : > { %v4572_v10 = vpop.eup %4571  ;;  %v5250_v43 = vadd.f32 %v1132_v20, %v1052_v63 }
 0x23f   : > { %v1153_v18 = vmul.f32 0.6931472, %v4572_v10 }
 0x240   : > { %v4351_v35 = vpack.c.bf16 %v5244_v24, %v5250_v43 }
 0x241   : > { %v1159_v25 = vsel %vm1158_vm2, %v1156_v19, %v1153_v18 }
 0x242   : > { %v5248_v26 = vadd.f32 %v1159_v25, %v1055_v2 }
 0x244   : > { %v4349_v27 = vpack.c.bf16 %v5248_v26, %v5246_v13 }
 0x246   : > { %4350 = vmatprep.subr.bf16.mxu1 %v4349_v27 }
 0x247   : > { %4352 = vmatpush1.bf16.msra.mxu1 %v4351_v35 }
 0x24a   : > { %4229 = vmatmul.mubr.msk.f32.vlgmr.msra.gmra.mrb[8].mxu1 %vm6488_vm10, %v1168_v30 }
 0x24b   : > { %1278 = vmatprep.mubr.f32.mxu1 %v4797_v0 }
 0x24e   : > { %4230 = vmatmul.mubr.msk.f32.gmra.mrb[10].mxu1 %vm6488_vm10, %v1169_v51 }
 0x24f   : > { %1284 = vmatprep.mubr.f32.mxu1 %v4797_v0 }
 0x252   : > { %4231 = vmatmul.mubr.msk.f32.gmra.mrb[12].mxu1 %vm6488_vm10, %v1170_v9 }
 0x253   : > { %1290 = vmatprep.mubr.f32.mxu1 %v4797_v0 }
 0x256   : > { %4232 = vmatmul.mubr.msk.f32.gmra.mrb[14].mxu1 %vm6488_vm10, %v1171_v28 }
 0x257   : > { %1780 = vmatprep.mubr.f32.mxu1 %v4797_v0 }
 0x31d   : > { %v1274_v29 = vpop.f32.mrb[8].mxu1 }
 0x31e   : > { %v5276_v31 = vadd.f32 %v1274_v29, %v1179_v17  ;;  %v1276_v32 = vpop.f32.mrb[9].mxu1 }
 0x31f   : > { %v5278_v34 = vadd.f32 %v1276_v32, %v1179_v17 }
 0x320   : > { %v1309_v22 = vand.u32 2147483647, %v5276_v31 }
 0x321   : > { %v1310_v37 = vand.u32 2147483647, %v5278_v34  ;;  %v1280_v38 = vpop.f32.mrb[10].mxu1 }
 0x322   : > { %v1317_v40 = vsub.f32 0.0, %v1309_v22  ;;  %v5282_v42 = vadd.f32 %v1280_v38, %v1184_v36  ;;  %v1282_v33 = vpop.f32.mrb[11].mxu1 }
 0x323   : > { %v1318_v45 = vsub.f32 0.0, %v1310_v37  ;;  %v5284_v41 = vadd.f32 %v1282_v33, %v1184_v36  ;;  %v1301_v37 = vmax.f32 %v5276_v31, 0.0 }
 0x324   : > { %v1325_v52 = vmul.f32 1.442695, %v1317_v40  ;;  %v1311_v3 = vand.u32 2147483647, %v5282_v42  ;;  %v1302_v40 = vmax.f32 %v5278_v34, 0.0 }
 0x325   : > { %v1327_v59 = vmul.f32 1.442695, %v1318_v45  ;;  %v1312_v53 = vand.u32 2147483647, %v5284_v41  ;;  %v1286_v54 = vpop.f32.mrb[12].mxu1 }
 0x326   : > { %4573 = vpow2.f32 %v1325_v52  ;;  %v1319_v56 = vsub.f32 0.0, %v1311_v3  ;;  %v5288_v57 = vadd.f32 %v1286_v54, %v1189_v14  ;;  %v1288_v58 = vpop.f32.mrb[13].mxu1  ;;  %v1303_v54 = vmax.f32 %v5282_v42, 0.0 }
 0x327   : > { %4575 = vpow2.f32 %v1327_v59  ;;  %v1320_v60 = vsub.f32 0.0, %v1312_v53  ;;  %v5290_v47 = vadd.f32 %v1288_v58, %v1189_v14 }
 0x328   : > { %v1329_v61 = vmul.f32 1.442695, %v1319_v56  ;;  %v1313_v49 = vand.u32 2147483647, %v5288_v57 }
 0x329   : > { %v1331_v6 = vmul.f32 1.442695, %v1320_v60  ;;  %v1314_v21 = vand.u32 2147483647, %v5290_v47  ;;  %v1292_v62 = vpop.f32.mrb[14].mxu1 }
 0x32a   : > { %4577 = vpow2.f32 %v1329_v61  ;;  %v1321_v1 = vsub.f32 0.0, %v1313_v49  ;;  %v5294_v55 = vadd.f32 %v1292_v62, %v1194_v39  ;;  %v1294_v4 = vpop.f32.mrb[15].mxu1  ;;  %v1304_v49 = vmax.f32 %v5284_v41, 0.0 }
 0x32b   : > { %4579 = vpow2.f32 %v1331_v6  ;;  %v1322_v5 = vsub.f32 0.0, %v1314_v21  ;;  %v5297_v12 = vadd.f32 %v1294_v4, %v1194_v39  ;;  %v1306_v21 = vmax.f32 %v5290_v47, 0.0  ;;  %v1298_v47 = vld [vmem:[%s6471_s9 + $0x8] sm:$0xff] }
 0x32c   : > { %v1333_v7 = vmul.f32 1.442695, %v1321_v1  ;;  %v1315_v8 = vand.u32 2147483647, %v5294_v55 }
 0x32d   : > { %v1335_v10 = vmul.f32 1.442695, %v1322_v5  ;;  %v1316_v23 = vand.u32 2147483647, %v5297_v12 }
 0x32e   : > { %4581 = vpow2.f32 %v1333_v7  ;;  %v1323_v11 = vsub.f32 0.0, %v1315_v8 }
 0x32f   : > { %4583 = vpow2.f32 %v1335_v10  ;;  %v1324_v35 = vsub.f32 0.0, %v1316_v23 }
 0x330   : > { %v4574_v15 = vpop.eup %4573  ;;  %v1337_v16 = vmul.f32 1.442695, %v1323_v11 }
 0x331   : > { %v4576_v18 = vpop.eup %4575  ;;  %v1341_v19 = vadd.f32 1.0, %v4574_v15  ;;  %v1344_v51 = vmul.f32 -0.5, %v4574_v15  ;;  %v1339_v29 = vmul.f32 1.442695, %v1324_v35  ;;  %v1347_v45 = vand.u32 2147483647, %v4574_v15 }
 0x332   : > { %v1350_v20 = vadd.f32 1.0, %v4576_v18  ;;  %4585 = vpow2.f32 %v1337_v16  ;;  %v1353_v9 = vmul.f32 -0.5, %v4576_v18  ;;  %v1356_v3 = vand.u32 2147483647, %v4576_v18 }
 0x333   : > { %4587 = vlog2.f32 %v1341_v19  ;;  %v1345_v38 = vadd.f32 1.0, %v1344_v51  ;;  %vm5313_vm3 = vcmp.lt.f32.partialorder %v1347_v45, 0.0004427343 }
 0x334   : > { %v4578_v2 = vpop.eup %4577  ;;  %4589 = vlog2.f32 %v1350_v20  ;;  %v1354_v52 = vadd.f32 1.0, %v1353_v9  ;;  %vm5317_vm4 = vcmp.lt.f32.partialorder %v1356_v3, 0.0004427343  ;;  %v1307_v3 = vmax.f32 %v5294_v55, 0.0 }
 0x335   : > { %v4580_v63 = vpop.eup %4579  ;;  %v1359_v25 = vadd.f32 1.0, %v4578_v2  ;;  %v1362_v17 = vmul.f32 -0.5, %v4578_v2  ;;  %v1365_v60 = vand.u32 2147483647, %v4578_v2  ;;  %v1346_v31 = vmul.f32 %v4574_v15, %v1345_v38 }
 0x336   : > { %v1368_v27 = vadd.f32 1.0, %v4580_v63  ;;  %v1371_v22 = vmul.f32 -0.5, %v4580_v63  ;;  %v1374_v34 = vand.u32 2147483647, %v4580_v63  ;;  %v1355_v62 = vmul.f32 %v4576_v18, %v1354_v52 }
 0x337   : > { %4591 = vlog2.f32 %v1359_v25  ;;  %v1363_v56 = vadd.f32 1.0, %v1362_v17  ;;  %vm1366_vm5 = vcmp.lt.f32.partialorder %v1365_v60, 0.0004427343 }
 0x338   : > { %v5300_v30 = vpop.eup %4581  ;;  %4593 = vlog2.f32 %v1368_v27  ;;  %v1372_v61 = vadd.f32 1.0, %v1371_v22  ;;  %vm1375_vm6 = vcmp.lt.f32.partialorder %v1374_v34, 0.0004427343 }
 0x339   : > { %v1377_v28 = vadd.f32 1.0, %v5300_v30  ;;  %v5303_v32 = vpop.eup %4583  ;;  %v1380_v39 = vmul.f32 -0.5, %v5300_v30  ;;  %v1364_v7 = vmul.f32 %v4578_v2, %v1363_v56  ;;  %v1383_v19 = vand.u32 2147483647, %v5300_v30 }
 0x33a   : > { %v1386_v1 = vadd.f32 1.0, %v5303_v32  ;;  %v1373_v15 = vmul.f32 %v4580_v63, %v1372_v61  ;;  %v1392_v61 = vand.u32 2147483647, %v5303_v32 }
 0x33b   : > { %4595 = vlog2.f32 %v1377_v28  ;;  %v1381_v18 = vadd.f32 1.0, %v1380_v39  ;;  %vm1384_vm7 = vcmp.lt.f32.partialorder %v1383_v19, 0.0004427343 }
 0x33c   : > { %v5305_v36 = vpop.eup %4585  ;;  %4597 = vpow2.f32 %v1339_v29  ;;  %vm1393_vm9 = vcmp.lt.f32.partialorder %v1392_v61, 0.0004427343 }
 0x33d   : > { %v4588_v33 = vpop.eup %4587  ;;  %v1395_v14 = vadd.f32 1.0, %v5305_v36  ;;  %v1398_v8 = vmul.f32 -0.5, %v5305_v36  ;;  %v1401_v17 = vand.u32 2147483647, %v5305_v36  ;;  %v1382_v63 = vmul.f32 %v5300_v30, %v1381_v18  ;;  %v1433_v18 = vpop.permute.xlu1 %1432 }
 0x33e   : > { %v4590_v59 = vpop.eup %4589  ;;  %v1343_v53 = vmul.f32 0.6931472, %v4588_v33 }
 0x33f   : > { %v1352_v58 = vmul.f32 0.6931472, %v4590_v59  ;;  %4599 = vlog2.f32 %v1395_v14  ;;  %v1399_v9 = vadd.f32 1.0, %v1398_v8  ;;  %vm1402_vm8 = vcmp.lt.f32.partialorder %v1401_v17, 0.0004427343 }
 0x340   : > { %v1349_v5 = vsel %vm5313_vm3, %v1346_v31, %v1343_v53  ;;  %4601 = vlog2.f32 %v1386_v1  ;;  %v1389_v14 = vmul.f32 -0.5, %v5303_v32 }
 0x341   : > { %v4592_v6 = vpop.eup %4591  ;;  %v1358_v10 = vsel %vm5317_vm4, %v1355_v62, %v1352_v58  ;;  %v1413_v23 = vadd.f32 %v1349_v5, %v1301_v37  ;;  %v1400_v37 = vmul.f32 %v5305_v36, %v1399_v9  ;;  %v1308_v62 = vmax.f32 %v5297_v12, 0.0  ;;  %v1299_v12 = vld [vmem:[%s6471_s9 + $0x10] sm:$0xff] }
 0x342   : > { %v4594_v4 = vpop.eup %4593  ;;  %v1361_v41 = vmul.f32 0.6931472, %v4592_v6  ;;  %v1414_v35 = vadd.f32 %v1358_v10, %v1302_v40  ;;  %v1305_v40 = vmax.f32 %v5288_v57, 0.0  ;;  %v1390_v60 = vadd.f32 1.0, %v1389_v14 }
 0x343   : > { %v1370_v11 = vmul.f32 0.6931472, %v4594_v4 }
 0x344   : > { %v1367_v16 = vsel %vm1366_vm5, %v1364_v7, %v1361_v41  ;;  %v1391_v57 = vmul.f32 %v5303_v32, %v1390_v60  ;;  %v1297_v32 = vld [vmem:[%s6471_s9] sm:$0xff]  ;;  %v1300_v41 = vld [vmem:[%s6471_s9 + $0x18] sm:$0xff]  ;;  %v1428_v7 = vpop.permute.xlu0 %1427 }
 0x345   : > { %v4596_v20 = vpop.eup %4595  ;;  %v1415_v25 = vadd.f32 %v1367_v16, %v1303_v54  ;;  %v1376_v27 = vsel %vm1375_vm6, %v1373_v15, %v1370_v11 }
 0x346   : > { %v1416_v2 = vadd.f32 %v1376_v27, %v1304_v49  ;;  %v1379_v51 = vmul.f32 0.6931472, %v4596_v20  ;;  %v4598_v29 = vpop.eup %4597 }
 0x347   : > { %v4355_v28 = vpack.c.bf16 %v1415_v25, %v1413_v23  ;;  %v1404_v33 = vadd.f32 1.0, %v4598_v29  ;;  %v1407_v54 = vmul.f32 -0.5, %v4598_v29  ;;  %v1410_v49 = vand.u32 2147483647, %v4598_v29 }
 0x348   : > { %v4353_v22 = vpack.c.bf16 %v1416_v2, %v1414_v35  ;;  %v1385_v45 = vsel %vm1384_vm7, %v1382_v63, %v1379_v51 }
 0x349   : > { %v4600_v38 = vpop.eup %4599  ;;  %4603 = vlog2.f32 %v1404_v33  ;;  %v1417_v30 = vadd.f32 %v1385_v45, %v1305_v40  ;;  %v1408_v31 = vadd.f32 1.0, %v1407_v54  ;;  %vm1411_vm11 = vcmp.lt.f32.partialorder %v1410_v49, 0.0004427343  ;;  %v1443_v40 = vpop.permute.xlu1 %1442 }
 0x34a   : > { %v1397_v52 = vmul.f32 0.6931472, %v4600_v38  ;;  %4354 = vmatprep.subr.bf16.mxu0 %v4353_v22  ;;  %v4602_v56 = vpop.eup %4601 }
 0x34b   : > { %4356 = vmatpush1.bf16.msra.mxu0 %v4355_v28  ;;  %v1388_v36 = vmul.f32 0.6931472, %v4602_v56  ;;  %v1409_v6 = vmul.f32 %v4598_v29, %v1408_v31  ;;  %v1438_v28 = vpop.permute.xlu0 %1437 }
 0x34c   : > { %v1403_v59 = vsel %vm1402_vm8, %v1400_v37, %v1397_v52 }
 0x34d   : > { %v1419_v53 = vadd.f32 %v1403_v59, %v1307_v3  ;;  %v1394_v34 = vsel %vm1393_vm9, %v1391_v57, %v1388_v36 }
 0x34e   : > { %v1418_v1 = vadd.f32 %v1394_v34, %v1306_v21 }
 0x34f   : > { %v4359_v58 = vpack.c.bf16 %v1419_v53, %v1417_v30 }
 0x353   : > { %v4604_v55 = vpop.eup %4603 }
 0x354   : > { %v1406_v39 = vmul.f32 0.6931472, %v4604_v55 }
 0x356   : > { %v1412_v42 = vsel %vm1411_vm11, %v1409_v6, %v1406_v39 }
 0x357   : > { %v1420_v4 = vadd.f32 %v1412_v42, %v1308_v62 }
 0x359   : > { %v4357_v5 = vpack.c.bf16 %v1420_v4, %v1418_v1 }
 0x35b   : > { %4358 = vmatprep.subr.bf16.mxu0 %v4357_v5 }
 0x35c   : > { %4360 = vmatpush1.bf16.msra.mxu0 %v4359_v58 }
 0x35f   : > { %4233 = vmatmul.mubr.msk.f32.vlgmr.msra.gmra.mrb[8].mxu0 %vm6488_vm10, %v1297_v32 }
 0x360   : > { %1527 = vmatprep.mubr.f32.mxu0 %v4797_v0 }
 0x363   : > { %4234 = vmatmul.mubr.msk.f32.gmra.mrb[10].mxu0 %vm6488_vm10, %v1298_v47 }
 0x364   : > { %1533 = vmatprep.mubr.f32.mxu0 %v4797_v0 }
 0x367   : > { %4235 = vmatmul.mubr.msk.f32.gmra.mrb[12].mxu0 %vm6488_vm10, %v1299_v12 }
 0x368   : > { %1539 = vmatprep.mubr.f32.mxu0 %v4797_v0 }
 0x36b   : > { %4236 = vmatmul.mubr.msk.f32.gmra.mrb[14].mxu0 %vm6488_vm10, %v1300_v41 }
 0x36c   : > { %2031 = vmatprep.mubr.f32.mxu0 %v4797_v0 }
 0x432   : > { %v1523_v8 = vpop.f32.mrb[8].mxu0 }
 0x433   : > { %v1524_v10 = vadd.f32 %v1523_v8, %v1428_v7  ;;  %v1525_v11 = vpop.f32.mrb[9].mxu0 }
 0x434   : > { %v1526_v15 = vadd.f32 %v1525_v11, %v1428_v7 }
 0x435   : > { %v5359_v16 = vadd.f32 %v1524_v10, %v5225_v50 }
 0x436   : > { %v5362_v19 = vadd.f32 %v1526_v15, %v5221_v46  ;;  %v1529_v20 = vpop.f32.mrb[10].mxu0 }
 0x437   : > { %v1562_v23 = vand.u32 2147483647, %v5359_v16  ;;  %v1530_v25 = vadd.f32 %v1529_v20, %v1433_v18  ;;  %v1531_v27 = vpop.f32.mrb[11].mxu0 }
 0x438   : > { %v1563_v35 = vand.u32 2147483647, %v5362_v19  ;;  %v1532_v2 = vadd.f32 %v1531_v27, %v1433_v18 }
 0x439   : > { %v1570_v51 = vsub.f32 0.0, %v1562_v23  ;;  %v5367_v9 = vadd.f32 %v1530_v25, %v5219_v44 }
 0x43a   : > { %v1571_v17 = vsub.f32 0.0, %v1563_v35  ;;  %v5370_v50 = vadd.f32 %v1532_v2, %v5223_v48  ;;  %v1535_v29 = vpop.f32.mrb[12].mxu0 }
 0x43b   : > { %v1578_v46 = vmul.f32 1.442695, %v1570_v51  ;;  %v1564_v63 = vand.u32 2147483647, %v5367_v9  ;;  %v1536_v22 = vadd.f32 %v1535_v29, %v1438_v28  ;;  %v1537_v38 = vpop.f32.mrb[13].mxu0  ;;  %v1556_v29 = vmax.f32 %v5367_v9, 0.0 }
 0x43c   : > { %v1580_v33 = vmul.f32 1.442695, %v1571_v17  ;;  %v1565_v45 = vand.u32 2147483647, %v5370_v50  ;;  %v1538_v52 = vadd.f32 %v1537_v38, %v1438_v28  ;;  %v1555_v17 = vmax.f32 %v5362_v19, 0.0 }
 0x43d   : > { %4605 = vpow2.f32 %v1578_v46  ;;  %v1572_v37 = vsub.f32 0.0, %v1564_v63  ;;  %v5375_v44 = vadd.f32 %v1536_v22, %v5250_v43  ;;  %v1557_v63 = vmax.f32 %v5370_v50, 0.0 }
 0x43e   : > { %4607 = vpow2.f32 %v1580_v33  ;;  %v1573_v3 = vsub.f32 0.0, %v1565_v45  ;;  %v5378_v48 = vadd.f32 %v1538_v52, %v5246_v13  ;;  %v1541_v14 = vpop.f32.mrb[14].mxu0 }
 0x43f   : > { %v1582_v59 = vmul.f32 1.442695, %v1572_v37  ;;  %v1566_v30 = vand.u32 2147483647, %v5375_v44  ;;  %v1542_v53 = vadd.f32 %v1541_v14, %v1443_v40  ;;  %v1543_v54 = vpop.f32.mrb[15].mxu0 }
 0x440   : > { %v1584_v56 = vmul.f32 1.442695, %v1573_v3  ;;  %v1567_v58 = vand.u32 2147483647, %v5378_v48  ;;  %v1544_v60 = vadd.f32 %v1543_v54, %v1443_v40  ;;  %v4239_v40 = vld [vmem:[%s6469_s7 + $0x30] sm:$0xff] }
 0x441   : > { %4609 = vpow2.f32 %v1582_v59  ;;  %v1574_v61 = vsub.f32 0.0, %v1566_v30  ;;  %v5383_v43 = vadd.f32 %v1542_v53, %v5244_v24 }
 0x442   : > { %4611 = vpow2.f32 %v1584_v56  ;;  %v1575_v36 = vsub.f32 0.0, %v1567_v58  ;;  %v5386_v13 = vadd.f32 %v1544_v60, %v5248_v26 }
 0x443   : > { %v1586_v31 = vmul.f32 1.442695, %v1574_v61  ;;  %v1568_v49 = vand.u32 2147483647, %v5383_v43 }
 0x444   : > { %v1588_v57 = vmul.f32 1.442695, %v1575_v36  ;;  %v1569_v55 = vand.u32 2147483647, %v5386_v13  ;;  %v1561_v22 = vmax.f32 %v5386_v13, 0.0  ;;  %v4238_v13 = vld [vmem:[%s6469_s7 + $0x28] sm:$0xff] }
 0x445   : > { %4613 = vpow2.f32 %v1586_v31  ;;  %v1576_v34 = vsub.f32 0.0, %v1568_v49 }
 0x446   : > { %4615 = vpow2.f32 %v1588_v57  ;;  %v1577_v39 = vsub.f32 0.0, %v1569_v55 }
 0x447   : > { %v4606_v6 = vpop.eup %4605  ;;  %v1590_v21 = vmul.f32 1.442695, %v1576_v34  ;;  %v1554_v34 = vmax.f32 %v5359_v16, 0.0 }
 0x448   : > { %v4608_v62 = vpop.eup %4607  ;;  %v1594_v24 = vadd.f32 1.0, %v4606_v6  ;;  %v1592_v42 = vmul.f32 1.442695, %v1577_v39  ;;  %v1597_v12 = vmul.f32 -0.5, %v4606_v6  ;;  %v1600_v15 = vand.u32 2147483647, %v4606_v6 }
 0x449   : > { %4617 = vpow2.f32 %v1590_v21  ;;  %v1603_v1 = vadd.f32 1.0, %v4608_v62  ;;  %v1606_v8 = vmul.f32 -0.5, %v4608_v62  ;;  %v1609_v25 = vand.u32 2147483647, %v4608_v62 }
 0x44a   : > { %4619 = vlog2.f32 %v1594_v24  ;;  %v1598_v23 = vadd.f32 1.0, %v1597_v12  ;;  %vm5404_vm12 = vcmp.lt.f32.partialorder %v1600_v15, 0.0004427343 }
 0x44b   : > { %v4610_v26 = vpop.eup %4609  ;;  %4621 = vpow2.f32 %v1592_v42  ;;  %v1607_v51 = vadd.f32 1.0, %v1606_v8  ;;  %vm5409_vm13 = vcmp.lt.f32.partialorder %v1609_v25, 0.0004427343 }
 0x44c   : > { %v4612_v4 = vpop.eup %4611  ;;  %v1612_v5 = vadd.f32 1.0, %v4610_v26  ;;  %4623 = vlog2.f32 %v1603_v1  ;;  %v1615_v10 = vmul.f32 -0.5, %v4610_v26  ;;  %v1618_v35 = vand.u32 2147483647, %v4610_v26 }
 0x44d   : > { %v1621_v32 = vadd.f32 1.0, %v4612_v4  ;;  %v1624_v18 = vmul.f32 -0.5, %v4612_v4  ;;  %v1599_v37 = vmul.f32 %v4606_v6, %v1598_v23  ;;  %v1627_v19 = vand.u32 2147483647, %v4612_v4 }
 0x44e   : > { %4625 = vlog2.f32 %v1612_v5  ;;  %v1616_v46 = vadd.f32 1.0, %v1615_v10  ;;  %vm5413_vm14 = vcmp.lt.f32.partialorder %v1618_v35, 0.0004427343  ;;  %v1608_v14 = vmul.f32 %v4608_v62, %v1607_v51 }
 0x44f   : > { %v5390_v47 = vpop.eup %4613  ;;  %4627 = vlog2.f32 %v1621_v32  ;;  %v1625_v38 = vadd.f32 1.0, %v1624_v18  ;;  %vm1628_vm15 = vcmp.lt.f32.partialorder %v1627_v19, 0.0004427343  ;;  %v1560_v23 = vmax.f32 %v5383_v43, 0.0  ;;  %v4240_v19 = vld [vmem:[%s6469_s7 + $0x38] sm:$0xff] }
 0x450   : > { %v5392_v41 = vpop.eup %4615  ;;  %v1630_v7 = vadd.f32 1.0, %v5390_v47  ;;  %v1617_v53 = vmul.f32 %v4610_v26, %v1616_v46  ;;  %v1633_v58 = vmul.f32 -0.5, %v5390_v47  ;;  %v1636_v6 = vand.u32 2147483647, %v5390_v47 }
 0x451   : > { %v1639_v11 = vadd.f32 1.0, %v5392_v41  ;;  %v1642_v56 = vmul.f32 -0.5, %v5392_v41  ;;  %v1626_v36 = vmul.f32 %v4612_v4, %v1625_v38  ;;  %v1645_v12 = vand.u32 2147483647, %v5392_v41 }
 0x452   : > { %4629 = vlog2.f32 %v1630_v7  ;;  %v1634_v5 = vadd.f32 1.0, %v1633_v58  ;;  %vm5448_vm0 = vcmp.lt.f32.partialorder %v1636_v6, 0.0004427343 }
 0x453   : > { %v5396_v20 = vpop.eup %4617  ;;  %4631 = vlog2.f32 %v1639_v11  ;;  %v1643_v26 = vadd.f32 1.0, %v1642_v56  ;;  %vm1646_vm2 = vcmp.lt.f32.partialorder %v1645_v12, 0.0004427343 }
 0x454   : > { %v4620_v27 = vpop.eup %4619  ;;  %v1648_v2 = vadd.f32 1.0, %v5396_v20  ;;  %v1651_v54 = vmul.f32 -0.5, %v5396_v20  ;;  %v1654_v32 = vand.u32 2147483647, %v5396_v20  ;;  %v1635_v51 = vmul.f32 %v5390_v47, %v1634_v5 }
 0x455   : > { %v5399_v28 = vpop.eup %4621  ;;  %v1596_v52 = vmul.f32 0.6931472, %v4620_v27  ;;  %v1644_v35 = vmul.f32 %v5392_v41, %v1643_v26  ;;  %v1559_v41 = vmax.f32 %v5378_v48, 0.0  ;;  %v1558_v47 = vmax.f32 %v5375_v44, 0.0  ;;  %v4237_v44 = vld [vmem:[%s6469_s7 + $0x20] sm:$0xff] }
 0x456   : > { %4633 = vlog2.f32 %v1648_v2  ;;  %v1657_v33 = vadd.f32 1.0, %v5399_v28  ;;  %v4624_v45 = vpop.eup %4623  ;;  %v1660_v57 = vmul.f32 -0.5, %v5399_v28  ;;  %v1652_v24 = vadd.f32 1.0, %v1651_v54 }
 0x457   : > { %v1605_v50 = vmul.f32 0.6931472, %v4624_v45  ;;  %v1602_v31 = vsel %vm5404_vm12, %v1599_v37, %v1596_v52  ;;  %v1663_v18 = vand.u32 2147483647, %v5399_v28  ;;  %vm1655_vm1 = vcmp.lt.f32.partialorder %v1654_v32, 0.0004427343 }
 0x458   : > { %v4626_v9 = vpop.eup %4625  ;;  %4635 = vlog2.f32 %v1657_v33  ;;  %v5435_v4 = vadd.f32 %v1602_v31, %v1554_v34  ;;  %v1661_v8 = vadd.f32 1.0, %v1660_v57  ;;  %v1653_v27 = vmul.f32 %v5396_v20, %v1652_v24 }
 0x459   : > { %v4628_v59 = vpop.eup %4627  ;;  %v1614_v30 = vmul.f32 0.6931472, %v4626_v9  ;;  %v1611_v60 = vsel %vm5409_vm13, %v1608_v14, %v1605_v50  ;;  %vm1664_vm3 = vcmp.lt.f32.partialorder %v1663_v18, 0.0004427343  ;;  %v1687_v9 = vpop.permute.xlu0 %1686 }
 0x45a   : > { %v1623_v61 = vmul.f32 0.6931472, %v4628_v59  ;;  %v5431_v42 = vadd.f32 %v1611_v60, %v1555_v17  ;;  %v1662_v43 = vmul.f32 %v5399_v28, %v1661_v8 }
 0x45b   : > { %v1620_v49 = vsel %vm5413_vm14, %v1617_v53, %v1614_v30  ;;  %v1692_v53 = vpop.permute.xlu1 %1691 }
 0x45c   : > { %v4630_v55 = vpop.eup %4629  ;;  %v5428_v39 = vadd.f32 %v1620_v49, %v1556_v29  ;;  %v1629_v21 = vsel %vm1628_vm15, %v1626_v36, %v1623_v61 }
 0x45d   : > { %v4632_v62 = vpop.eup %4631  ;;  %v5433_v1 = vadd.f32 %v1629_v21, %v1557_v63  ;;  %v1632_v11 = vmul.f32 0.6931472, %v4630_v55  ;;  %v1697_v55 = vpop.permute.xlu0 %1696 }
 0x45e   : > { %v1641_v7 = vmul.f32 0.6931472, %v4632_v62  ;;  %v4363_v15 = vpack.c.bf16 %v5428_v39, %v5435_v4 }
 0x45f   : > { %v4361_v16 = vpack.c.bf16 %v5433_v1, %v5431_v42  ;;  %v1638_v20 = vsel %vm5448_vm0, %v1635_v51, %v1632_v11 }
 0x460   : > { %v4634_v10 = vpop.eup %4633  ;;  %v1647_v46 = vsel %vm1646_vm2, %v1644_v35, %v1641_v7  ;;  %v5464_v37 = vadd.f32 %v1638_v20, %v1558_v47  ;;  %v1702_v7 = vpop.permute.xlu1 %1701 }
 0x461   : > { %v1650_v25 = vmul.f32 0.6931472, %v4634_v10  ;;  %4362 = vmatprep.subr.bf16.mxu1 %v4361_v16  ;;  %v5460_v45 = vadd.f32 %v1647_v46, %v1559_v41 }
 0x462   : > { %v4636_v2 = vpop.eup %4635  ;;  %4364 = vmatpush1.bf16.msra.mxu1 %v4363_v15 }
 0x463   : > { %v1656_v29 = vsel %vm1655_vm1, %v1653_v27, %v1650_v25  ;;  %v1659_v63 = vmul.f32 0.6931472, %v4636_v2 }
 0x464   : > { %v5458_v38 = vadd.f32 %v1656_v29, %v1560_v23 }
 0x465   : > { %v1665_v33 = vsel %vm1664_vm3, %v1662_v43, %v1659_v63 }
 0x466   : > { %v5462_v52 = vadd.f32 %v1665_v33, %v1561_v22  ;;  %v4367_v48 = vpack.c.bf16 %v5458_v38, %v5464_v37 }
 0x468   : > { %v4365_v28 = vpack.c.bf16 %v5462_v52, %v5460_v45 }
 0x46a   : > { %4366 = vmatprep.subr.bf16.mxu1 %v4365_v28 }
 0x46b   : > { %4368 = vmatpush1.bf16.msra.mxu1 %v4367_v48 }
 0x46e   : > { %4245 = vmatmul.mubr.msk.f32.vlgmr.msra.gmra.mrb[16].mxu1 %vm6488_vm10, %v4237_v44 }
 0x46f   : > { %1786 = vmatprep.mubr.f32.mxu1 %v4797_v0 }
 0x472   : > { %4246 = vmatmul.mubr.msk.f32.gmra.mrb[18].mxu1 %vm6488_vm10, %v4238_v13 }
 0x473   : > { %1792 = vmatprep.mubr.f32.mxu1 %v4797_v0 }
 0x476   : > { %4247 = vmatmul.mubr.msk.f32.gmra.mrb[20].mxu1 %vm6488_vm10, %v4239_v40 }
 0x477   : > { %1798 = vmatprep.mubr.f32.mxu1 %v4797_v0 }
 0x47a   : > { %4248 = vmatmul.mubr.msk.f32.gmra.mrb[22].mxu1 %vm6488_vm10, %v4240_v19 }
 0x47b   : > { %2288 = vmatprep.mubr.f32.mxu1 %v4797_v0 }
 0x541   : > { %v1782_v3 = vpop.f32.mrb[16].mxu1 }
 0x542   : > { %v5490_v50 = vadd.f32 %v1782_v3, %v1687_v9  ;;  %v1784_v14 = vpop.f32.mrb[17].mxu1 }
 0x543   : > { %v5492_v59 = vadd.f32 %v1784_v14, %v1687_v9 }
 0x544   : > { %v1818_v30 = vand.u32 2147483647, %v5490_v50 }
 0x545   : > { %v1819_v54 = vand.u32 2147483647, %v5492_v59  ;;  %v1788_v56 = vpop.f32.mrb[18].mxu1 }
 0x546   : > { %v1826_v58 = vsub.f32 0.0, %v1818_v30  ;;  %v5496_v60 = vadd.f32 %v1788_v56, %v1692_v53  ;;  %v1790_v61 = vpop.f32.mrb[19].mxu1 }
 0x547   : > { %v1827_v36 = vsub.f32 0.0, %v1819_v54  ;;  %v5498_v31 = vadd.f32 %v1790_v61, %v1692_v53  ;;  %v1810_v54 = vmax.f32 %v5490_v50, 0.0 }
 0x548   : > { %v1834_v49 = vmul.f32 1.442695, %v1826_v58  ;;  %v1820_v57 = vand.u32 2147483647, %v5496_v60  ;;  %v1811_v58 = vmax.f32 %v5492_v59, 0.0 }
 0x549   : > { %v1836_v34 = vmul.f32 1.442695, %v1827_v36  ;;  %v1821_v6 = vand.u32 2147483647, %v5498_v31  ;;  %v1794_v21 = vpop.f32.mrb[20].mxu1 }
 0x54a   : > { %4637 = vpow2.f32 %v1834_v49  ;;  %v1828_v62 = vsub.f32 0.0, %v1820_v57  ;;  %v5502_v24 = vadd.f32 %v1794_v21, %v1697_v55  ;;  %v1796_v26 = vpop.f32.mrb[21].mxu1  ;;  %v1812_v21 = vmax.f32 %v5496_v60, 0.0 }
 0x54b   : > { %4639 = vpow2.f32 %v1836_v34  ;;  %v1829_v5 = vsub.f32 0.0, %v1821_v6  ;;  %v5504_v32 = vadd.f32 %v1796_v26, %v1697_v55 }
 0x54c   : > { %v1838_v12 = vmul.f32 1.442695, %v1828_v62  ;;  %v1822_v16 = vand.u32 2147483647, %v5502_v24 }
 0x54d   : > { %v1840_v8 = vmul.f32 1.442695, %v1829_v5  ;;  %v1823_v10 = vand.u32 2147483647, %v5504_v32  ;;  %v1800_v11 = vpop.f32.mrb[22].mxu1 }
 0x54e   : > { %4641 = vpow2.f32 %v1838_v12  ;;  %v1830_v15 = vsub.f32 0.0, %v1822_v16  ;;  %v5508_v18 = vadd.f32 %v1800_v11, %v1702_v7  ;;  %v1802_v23 = vpop.f32.mrb[23].mxu1  ;;  %v1813_v16 = vmax.f32 %v5498_v31, 0.0 }
 0x54f   : > { %4643 = vpow2.f32 %v1840_v8  ;;  %v1831_v25 = vsub.f32 0.0, %v1823_v10  ;;  %v5511_v17 = vadd.f32 %v1802_v23, %v1702_v7  ;;  %v1815_v10 = vmax.f32 %v5504_v32, 0.0  ;;  %v4250_v32 = vld [vmem:[%s6471_s9 + $0x28] sm:$0xff] }
 0x550   : > { %v1842_v27 = vmul.f32 1.442695, %v1830_v15  ;;  %v1824_v35 = vand.u32 2147483647, %v5508_v18 }
 0x551   : > { %v1844_v2 = vmul.f32 1.442695, %v1831_v25  ;;  %v1825_v41 = vand.u32 2147483647, %v5511_v17 }
 0x552   : > { %4645 = vpow2.f32 %v1842_v27  ;;  %v1832_v51 = vsub.f32 0.0, %v1824_v35 }
 0x553   : > { %4647 = vpow2.f32 %v1844_v2  ;;  %v1833_v48 = vsub.f32 0.0, %v1825_v41 }
 0x554   : > { %v4638_v29 = vpop.eup %4637  ;;  %v1846_v46 = vmul.f32 1.442695, %v1832_v51 }
 0x555   : > { %v4640_v63 = vpop.eup %4639  ;;  %v1850_v43 = vadd.f32 1.0, %v4638_v29  ;;  %v1853_v13 = vmul.f32 -0.5, %v4638_v29  ;;  %v1848_v3 = vmul.f32 1.442695, %v1833_v48  ;;  %v1856_v36 = vand.u32 2147483647, %v4638_v29 }
 0x556   : > { %v1859_v20 = vadd.f32 1.0, %v4640_v63  ;;  %4649 = vpow2.f32 %v1846_v46  ;;  %v1862_v40 = vmul.f32 -0.5, %v4640_v63  ;;  %v1865_v57 = vand.u32 2147483647, %v4640_v63 }
 0x557   : > { %4651 = vlog2.f32 %v1850_v43  ;;  %v1854_v56 = vadd.f32 1.0, %v1853_v13  ;;  %vm5527_vm4 = vcmp.lt.f32.partialorder %v1856_v36, 0.0004427343 }
 0x558   : > { %v4642_v22 = vpop.eup %4641  ;;  %4653 = vlog2.f32 %v1859_v20  ;;  %v1863_v49 = vadd.f32 1.0, %v1862_v40  ;;  %vm5531_vm5 = vcmp.lt.f32.partialorder %v1865_v57, 0.0004427343  ;;  %v1816_v57 = vmax.f32 %v5508_v18, 0.0 }
 0x559   : > { %v4644_v47 = vpop.eup %4643  ;;  %v1868_v33 = vadd.f32 1.0, %v4642_v22  ;;  %v1871_v9 = vmul.f32 -0.5, %v4642_v22  ;;  %v1874_v5 = vand.u32 2147483647, %v4642_v22  ;;  %v1855_v50 = vmul.f32 %v4638_v29, %v1854_v56 }
 0x55a   : > { %v1877_v28 = vadd.f32 1.0, %v4644_v47  ;;  %v1880_v30 = vmul.f32 -0.5, %v4644_v47  ;;  %v1883_v59 = vand.u32 2147483647, %v4644_v47  ;;  %v1864_v11 = vmul.f32 %v4640_v63, %v1863_v49 }
 0x55b   : > { %4655 = vlog2.f32 %v1868_v33  ;;  %v1872_v62 = vadd.f32 1.0, %v1871_v9  ;;  %vm1875_vm6 = vcmp.lt.f32.partialorder %v1874_v5, 0.0004427343 }
 0x55c   : > { %v5514_v44 = vpop.eup %4645  ;;  %4657 = vlog2.f32 %v1877_v28  ;;  %v1881_v12 = vadd.f32 1.0, %v1880_v30  ;;  %vm1884_vm7 = vcmp.lt.f32.partialorder %v1883_v59, 0.0004427343 }
 0x55d   : > { %v1886_v19 = vadd.f32 1.0, %v5514_v44  ;;  %v5517_v14 = vpop.eup %4647  ;;  %v1889_v7 = vmul.f32 -0.5, %v5514_v44  ;;  %v1873_v27 = vmul.f32 %v4642_v22, %v1872_v62  ;;  %v1892_v43 = vand.u32 2147483647, %v5514_v44 }
 0x55e   : > { %v1895_v15 = vadd.f32 1.0, %v5517_v14  ;;  %v1882_v29 = vmul.f32 %v4644_v47, %v1881_v12  ;;  %v1901_v12 = vand.u32 2147483647, %v5517_v14 }
 0x55f   : > { %4659 = vlog2.f32 %v1886_v19  ;;  %v1890_v63 = vadd.f32 1.0, %v1889_v7  ;;  %vm1893_vm8 = vcmp.lt.f32.partialorder %v1892_v43, 0.0004427343 }
 0x560   : > { %v5519_v53 = vpop.eup %4649  ;;  %4661 = vpow2.f32 %v1848_v3  ;;  %vm1902_vm11 = vcmp.lt.f32.partialorder %v1901_v12, 0.0004427343 }
 0x561   : > { %v4652_v61 = vpop.eup %4651  ;;  %v1904_v55 = vadd.f32 1.0, %v5519_v53  ;;  %v1907_v35 = vmul.f32 -0.5, %v5519_v53  ;;  %v1910_v9 = vand.u32 2147483647, %v5519_v53  ;;  %v1891_v47 = vmul.f32 %v5514_v44, %v1890_v63  ;;  %v1943_v63 = vpop.permute.xlu1 %1942 }
 0x562   : > { %v4654_v34 = vpop.eup %4653  ;;  %v1852_v6 = vmul.f32 0.6931472, %v4652_v61 }
 0x563   : > { %v1861_v26 = vmul.f32 0.6931472, %v4654_v34  ;;  %4663 = vlog2.f32 %v1904_v55  ;;  %v1908_v40 = vadd.f32 1.0, %v1907_v35  ;;  %vm1911_vm9 = vcmp.lt.f32.partialorder %v1910_v9, 0.0004427343 }
 0x564   : > { %v1858_v25 = vsel %vm5527_vm4, %v1855_v50, %v1852_v6  ;;  %4665 = vlog2.f32 %v1895_v15  ;;  %v1898_v55 = vmul.f32 -0.5, %v5517_v14 }
 0x565   : > { %v4656_v8 = vpop.eup %4655  ;;  %v1867_v2 = vsel %vm5531_vm5, %v1864_v11, %v1861_v26  ;;  %v1922_v41 = vadd.f32 %v1858_v25, %v1810_v54  ;;  %v1909_v54 = vmul.f32 %v5519_v53, %v1908_v40  ;;  %v1817_v11 = vmax.f32 %v5511_v17, 0.0  ;;  %v4251_v17 = vld [vmem:[%s6471_s9 + $0x30] sm:$0xff] }
 0x566   : > { %v4658_v23 = vpop.eup %4657  ;;  %v1870_v31 = vmul.f32 0.6931472, %v4656_v8  ;;  %v1923_v48 = vadd.f32 %v1867_v2, %v1811_v58  ;;  %v1814_v58 = vmax.f32 %v5502_v24, 0.0  ;;  %v1899_v5 = vadd.f32 1.0, %v1898_v55 }
 0x567   : > { %v1879_v51 = vmul.f32 0.6931472, %v4658_v23 }
 0x568   : > { %v1876_v46 = vsel %vm1875_vm6, %v1873_v27, %v1870_v31  ;;  %v1900_v24 = vmul.f32 %v5517_v14, %v1899_v5  ;;  %v4249_v14 = vld [vmem:[%s6471_s9 + $0x20] sm:$0xff]  ;;  %v4252_v31 = vld [vmem:[%s6471_s9 + $0x38] sm:$0xff]  ;;  %v1938_v27 = vpop.permute.xlu0 %1937 }
 0x569   : > { %v4660_v20 = vpop.eup %4659  ;;  %v1924_v33 = vadd.f32 %v1876_v46, %v1812_v21  ;;  %v1885_v28 = vsel %vm1884_vm7, %v1882_v29, %v1879_v51 }
 0x56a   : > { %v1925_v22 = vadd.f32 %v1885_v28, %v1813_v16  ;;  %v1888_v13 = vmul.f32 0.6931472, %v4660_v20  ;;  %v4662_v3 = vpop.eup %4661 }
 0x56b   : > { %v4371_v19 = vpack.c.bf16 %v1924_v33, %v1922_v41  ;;  %v1913_v61 = vadd.f32 1.0, %v4662_v3  ;;  %v1916_v21 = vmul.f32 -0.5, %v4662_v3  ;;  %v1919_v16 = vand.u32 2147483647, %v4662_v3 }
 0x56c   : > { %v4369_v30 = vpack.c.bf16 %v1925_v22, %v1923_v48  ;;  %v1894_v36 = vsel %vm1893_vm8, %v1891_v47, %v1888_v13 }
 0x56d   : > { %v4664_v56 = vpop.eup %4663  ;;  %4667 = vlog2.f32 %v1913_v61  ;;  %v1926_v44 = vadd.f32 %v1894_v36, %v1814_v58  ;;  %v1917_v50 = vadd.f32 1.0, %v1916_v21  ;;  %vm1920_vm12 = vcmp.lt.f32.partialorder %v1919_v16, 0.0004427343  ;;  %v1953_v58 = vpop.permute.xlu1 %1952 }
 0x56e   : > { %v1906_v49 = vmul.f32 0.6931472, %v4664_v56  ;;  %4370 = vmatprep.subr.bf16.mxu0 %v4369_v30  ;;  %v4666_v62 = vpop.eup %4665 }
 0x56f   : > { %4372 = vmatpush1.bf16.msra.mxu0 %v4371_v19  ;;  %v1897_v53 = vmul.f32 0.6931472, %v4666_v62  ;;  %v1918_v8 = vmul.f32 %v4662_v3, %v1917_v50  ;;  %v1948_v19 = vpop.permute.xlu0 %1947 }
 0x570   : > { %v1912_v34 = vsel %vm1911_vm9, %v1909_v54, %v1906_v49 }
 0x571   : > { %v1928_v6 = vadd.f32 %v1912_v34, %v1816_v57  ;;  %v1903_v59 = vsel %vm1902_vm11, %v1900_v24, %v1897_v53 }
 0x572   : > { %v1927_v15 = vadd.f32 %v1903_v59, %v1815_v10 }
 0x573   : > { %v4375_v26 = vpack.c.bf16 %v1928_v6, %v1926_v44 }
 0x577   : > { %v4668_v18 = vpop.eup %4667 }
 0x578   : > { %v1915_v7 = vmul.f32 0.6931472, %v4668_v18 }
 0x57a   : > { %v1921_v60 = vsel %vm1920_vm12, %v1918_v8, %v1915_v7 }
 0x57b   : > { %v1929_v23 = vadd.f32 %v1921_v60, %v1817_v11 }
 0x57d   : > { %v4373_v25 = vpack.c.bf16 %v1929_v23, %v1927_v15 }
 0x57f   : > { %4374 = vmatprep.subr.bf16.mxu0 %v4373_v25 }
 0x580   : > { %4376 = vmatpush1.bf16.msra.mxu0 %v4375_v26 }
 0x583   : > { %4257 = vmatmul.mubr.msk.f32.vlgmr.msra.gmra.mrb[16].mxu0 %vm6488_vm10, %v4249_v14 }
 0x584   : > { %2037 = vmatprep.mubr.f32.mxu0 %v4797_v0 }
 0x587   : > { %4258 = vmatmul.mubr.msk.f32.gmra.mrb[18].mxu0 %vm6488_vm10, %v4250_v32 }
 0x588   : > { %2043 = vmatprep.mubr.f32.mxu0 %v4797_v0 }
 0x58b   : > { %4259 = vmatmul.mubr.msk.f32.gmra.mrb[20].mxu0 %vm6488_vm10, %v4251_v17 }
 0x58c   : > { %2049 = vmatprep.mubr.f32.mxu0 %v4797_v0 }
 0x58f   : > { %4260 = vmatmul.mubr.msk.f32.gmra.mrb[22].mxu0 %vm6488_vm10, %v4252_v31 }
 0x590   : > { %4112 = vmatprep.mubr.f32.mxu0 %v4797_v0 }
 0x656   : > { %v2033_v35 = vpop.f32.mrb[16].mxu0 }
 0x657   : > { %v2034_v2 = vadd.f32 %v2033_v35, %v1938_v27  ;;  %v2035_v51 = vpop.f32.mrb[17].mxu0 }
 0x658   : > { %v2036_v29 = vadd.f32 %v2035_v51, %v1938_v27 }
 0x659   : > { %v5573_v46 = vadd.f32 %v2034_v2, %v5435_v4 }
 0x65a   : > { %v5576_v43 = vadd.f32 %v2036_v29, %v5431_v42  ;;  %v2039_v20 = vpop.f32.mrb[18].mxu0 }
 0x65b   : > { %v2072_v41 = vand.u32 2147483647, %v5573_v46  ;;  %v2040_v33 = vadd.f32 %v2039_v20, %v1943_v63  ;;  %v2041_v28 = vpop.f32.mrb[19].mxu0 }
 0x65c   : > { %v2073_v48 = vand.u32 2147483647, %v5576_v43  ;;  %v2042_v22 = vadd.f32 %v2041_v28, %v1943_v63 }
 0x65d   : > { %v2080_v13 = vsub.f32 0.0, %v2072_v41  ;;  %v5581_v40 = vadd.f32 %v2040_v33, %v5428_v39  ;;  %v2064_v33 = vmax.f32 %v5573_v46, 0.0 }
 0x65e   : > { %v2081_v9 = vsub.f32 0.0, %v2073_v48  ;;  %v5584_v4 = vadd.f32 %v2042_v22, %v5433_v1  ;;  %v2045_v3 = vpop.f32.mrb[20].mxu0 }
 0x65f   : > { %v2088_v42 = vmul.f32 1.442695, %v2080_v13  ;;  %v2074_v47 = vand.u32 2147483647, %v5581_v40  ;;  %v2046_v30 = vadd.f32 %v2045_v3, %v1948_v19  ;;  %v2047_v56 = vpop.f32.mrb[21].mxu0  ;;  %v2065_v13 = vmax.f32 %v5576_v43, 0.0 }
 0x660   : > { %v2090_v61 = vmul.f32 1.442695, %v2081_v9  ;;  %v2075_v36 = vand.u32 2147483647, %v5584_v4  ;;  %v2048_v49 = vadd.f32 %v2047_v56, %v1948_v19  ;;  %v2066_v19 = vmax.f32 %v5581_v40, 0.0 }
 0x661   : > { %4669 = vpow2.f32 %v2088_v42  ;;  %v2082_v54 = vsub.f32 0.0, %v2074_v47  ;;  %v5589_v39 = vadd.f32 %v2046_v30, %v5464_v37  ;;  %v2067_v46 = vmax.f32 %v5584_v4, 0.0 }
 0x662   : > { %4671 = vpow2.f32 %v2090_v61  ;;  %v2083_v57 = vsub.f32 0.0, %v2075_v36  ;;  %v5592_v1 = vadd.f32 %v2048_v49, %v5460_v45  ;;  %v2051_v55 = vpop.f32.mrb[22].mxu0 }
 0x663   : > { %v2092_v34 = vmul.f32 1.442695, %v2082_v54  ;;  %v2076_v44 = vand.u32 2147483647, %v5589_v39  ;;  %v2052_v6 = vadd.f32 %v2051_v55, %v1953_v58  ;;  %v2053_v21 = vpop.f32.mrb[23].mxu0 }
 0x664   : > { %v2094_v62 = vmul.f32 1.442695, %v2083_v57  ;;  %v2077_v26 = vand.u32 2147483647, %v5592_v1  ;;  %v2054_v5 = vadd.f32 %v2053_v21, %v1953_v58 }
 0x665   : > { %4673 = vpow2.f32 %v2092_v34  ;;  %v2084_v12 = vsub.f32 0.0, %v2076_v44  ;;  %v5597_v37 = vadd.f32 %v2052_v6, %v5458_v38 }
 0x666   : > { %4675 = vpow2.f32 %v2094_v62  ;;  %v2085_v53 = vsub.f32 0.0, %v2077_v26  ;;  %v5600_v45 = vadd.f32 %v2054_v5, %v5462_v52 }
 0x667   : > { %v2096_v50 = vmul.f32 1.442695, %v2084_v12  ;;  %v2078_v16 = vand.u32 2147483647, %v5597_v37 }
 0x668   : > { %v2098_v24 = vmul.f32 1.442695, %v2085_v53  ;;  %v2079_v18 = vand.u32 2147483647, %v5600_v45 }
 0x669   : > { %4677 = vpow2.f32 %v2096_v50  ;;  %v2086_v59 = vsub.f32 0.0, %v2078_v16 }
 0x66a   : > { %4679 = vpow2.f32 %v2098_v24  ;;  %v2087_v7 = vsub.f32 0.0, %v2079_v18 }
 0x66b   : > { %v4670_v8 = vpop.eup %4669  ;;  %v2100_v10 = vmul.f32 1.442695, %v2086_v59 }
 0x66c   : > { %v4672_v11 = vpop.eup %4671  ;;  %v2104_v38 = vadd.f32 1.0, %v4670_v8  ;;  %v2102_v60 = vmul.f32 1.442695, %v2087_v7  ;;  %v2107_v17 = vmul.f32 -0.5, %v4670_v8  ;;  %v2110_v2 = vand.u32 2147483647, %v4670_v8 }
 0x66d   : > { %4681 = vpow2.f32 %v2100_v10  ;;  %v2113_v15 = vadd.f32 1.0, %v4672_v11  ;;  %v2116_v31 = vmul.f32 -0.5, %v4672_v11  ;;  %v2119_v63 = vand.u32 2147483647, %v4672_v11 }
 0x66e   : > { %4683 = vlog2.f32 %v2104_v38  ;;  %v2108_v28 = vadd.f32 1.0, %v2107_v17  ;;  %vm5618_vm13 = vcmp.lt.f32.partialorder %v2110_v2, 0.0004427343 }
 0x66f   : > { %v4674_v52 = vpop.eup %4673  ;;  %4685 = vpow2.f32 %v2102_v60  ;;  %v2117_v48 = vadd.f32 1.0, %v2116_v31  ;;  %vm5623_vm14 = vcmp.lt.f32.partialorder %v2119_v63, 0.0004427343 }
 0x670   : > { %v4676_v23 = vpop.eup %4675  ;;  %v2122_v25 = vadd.f32 1.0, %v4674_v52  ;;  %4687 = vlog2.f32 %v2113_v15  ;;  %v2125_v51 = vmul.f32 -0.5, %v4674_v52  ;;  %v2128_v9 = vand.u32 2147483647, %v4674_v52 }
 0x671   : > { %v2131_v14 = vadd.f32 1.0, %v4676_v23  ;;  %v2134_v20 = vmul.f32 -0.5, %v4676_v23  ;;  %v2109_v49 = vmul.f32 %v4670_v8, %v2108_v28  ;;  %v2118_v58 = vmul.f32 %v4672_v11, %v2117_v48 }
 0x672   : > { %4689 = vlog2.f32 %v2122_v25  ;;  %v2126_v56 = vadd.f32 1.0, %v2125_v51  ;;  %v2137_v57 = vand.u32 2147483647, %v4676_v23  ;;  %vm5629_vm15 = vcmp.lt.f32.partialorder %v2128_v9, 0.0004427343 }
 0x673   : > { %v5604_v32 = vpop.eup %4677  ;;  %4691 = vlog2.f32 %v2131_v14  ;;  %v2135_v43 = vadd.f32 1.0, %v2134_v20  ;;  %v2068_v20 = vmax.f32 %v5589_v39, 0.0  ;;  %v2069_v9 = vmax.f32 %v5592_v1, 0.0 }
 0x674   : > { %v5606_v27 = vpop.eup %4679  ;;  %v2140_v35 = vadd.f32 1.0, %v5604_v32  ;;  %v2143_v54 = vmul.f32 -0.5, %v5604_v32  ;;  %v2127_v26 = vmul.f32 %v4674_v52, %v2126_v56  ;;  %v2146_v12 = vand.u32 2147483647, %v5604_v32 }
 0x675   : > { %v2149_v29 = vadd.f32 1.0, %v5606_v27  ;;  %v2152_v44 = vmul.f32 -0.5, %v5606_v27  ;;  %v2136_v16 = vmul.f32 %v4676_v23, %v2135_v43  ;;  %vm2138_vm0 = vcmp.lt.f32.partialorder %v2137_v57, 0.0004427343 }
 0x676   : > { %4693 = vlog2.f32 %v2140_v35  ;;  %v2144_v18 = vadd.f32 1.0, %v2143_v54  ;;  %v2155_v31 = vand.u32 2147483647, %v5606_v27  ;;  %vm5647_vm1 = vcmp.lt.f32.partialorder %v2146_v12, 0.0004427343  ;;  %v2195_v54 = vpop.permute.xlu0 %2194 }
 0x677   : > { %v5610_v41 = vpop.eup %4681  ;;  %4695 = vlog2.f32 %v2149_v29  ;;  %v2153_v38 = vadd.f32 1.0, %v2152_v44  ;;  %v2070_v39 = vmax.f32 %v5597_v37, 0.0  ;;  %v2184_v37 = vld [vmem:[%s6473_s11] sm:$0xff] }
 0x678   : > { %v4684_v22 = vpop.eup %4683  ;;  %v2158_v3 = vadd.f32 1.0, %v5610_v41  ;;  %v2161_v5 = vmul.f32 -0.5, %v5610_v41  ;;  %v2164_v17 = vand.u32 2147483647, %v5610_v41  ;;  %v2145_v35 = vmul.f32 %v5604_v32, %v2144_v18 }
 0x679   : > { %v5616_v42 = vpop.eup %4685  ;;  %v2106_v47 = vmul.f32 0.6931472, %v4684_v22  ;;  %v2154_v32 = vmul.f32 %v5606_v27, %v2153_v38  ;;  %vm2156_vm3 = vcmp.lt.f32.partialorder %v2155_v31, 0.0004427343 }
 0x67a   : > { %4697 = vlog2.f32 %v2158_v3  ;;  %v2167_v40 = vadd.f32 1.0, %v5616_v42  ;;  %v4688_v36 = vpop.eup %4687  ;;  %v2170_v59 = vmul.f32 -0.5, %v5616_v42  ;;  %v2162_v52 = vadd.f32 1.0, %v2161_v5 }
 0x67b   : > { %v2115_v4 = vmul.f32 0.6931472, %v4688_v36  ;;  %v2112_v21 = vsel %vm5618_vm13, %v2109_v49, %v2106_v47  ;;  %v2173_v28 = vand.u32 2147483647, %v5616_v42  ;;  %vm2165_vm2 = vcmp.lt.f32.partialorder %v2164_v17, 0.0004427343 }
 0x67c   : > { %v4690_v55 = vpop.eup %4689  ;;  %4699 = vlog2.f32 %v2167_v40  ;;  %v2176_v8 = vadd.f32 %v2112_v21, %v2064_v33  ;;  %v2171_v29 = vadd.f32 1.0, %v2170_v59  ;;  %v2187_v49 = vld [vmem:[%s6473_s11 + $0x18] sm:$0xff] }
 0x67d   : > { %v4692_v6 = vpop.eup %4691  ;;  %v2124_v62 = vmul.f32 0.6931472, %v4690_v55  ;;  %v2121_v53 = vsel %vm5623_vm14, %v2118_v58, %v2115_v4  ;;  %vm2174_vm4 = vcmp.lt.f32.partialorder %v2173_v28, 0.0004427343 }
 0x67e   : > { %v2133_v50 = vmul.f32 0.6931472, %v4692_v6  ;;  %v2177_v25 = vadd.f32 %v2121_v53, %v2065_v13  ;;  %v2163_v13 = vmul.f32 %v5610_v41, %v2162_v52  ;;  %v2172_v56 = vmul.f32 %v5616_v42, %v2171_v29  ;;  %v2186_v42 = vld [vmem:[%s6473_s11 + $0x10] sm:$0xff]  ;;  %v2200_v6 = vpop.permute.xlu1 %2199 }
 0x67f   : > { %v2130_v24 = vsel %vm5629_vm15, %v2127_v26, %v2124_v62  ;;  %v2071_v41 = vmax.f32 %v5600_v45, 0.0  ;;  %v2185_v45 = vld [vmem:[%s6473_s11 + $0x8] sm:$0xff] }
 0x680   : > { %v4694_v7 = vpop.eup %4693  ;;  %v2178_v10 = vadd.f32 %v2130_v24, %v2066_v19  ;;  %v2139_v11 = vsel %vm2138_vm0, %v2136_v16, %v2133_v50 }
 0x681   : > { %v4696_v60 = vpop.eup %4695  ;;  %v2142_v15 = vmul.f32 0.6931472, %v4694_v7  ;;  %v2179_v14 = vadd.f32 %v2139_v11, %v2067_v46 }
 0x682   : > { %v4379_v23 = vpack.c.bf16 %v2178_v10, %v2176_v8  ;;  %v2151_v51 = vmul.f32 0.6931472, %v4696_v60 }
 0x683   : > { %v4377_v2 = vpack.c.bf16 %v2179_v14, %v2177_v25  ;;  %v2148_v48 = vsel %vm5647_vm1, %v2145_v35, %v2142_v15 }
 0x684   : > { %v4698_v63 = vpop.eup %4697  ;;  %v2157_v47 = vsel %vm2156_vm3, %v2154_v32, %v2151_v51  ;;  %v2180_v46 = vadd.f32 %v2148_v48, %v2068_v20 }
 0x685   : > { %v2160_v22 = vmul.f32 0.6931472, %v4698_v63  ;;  %4378 = vmatprep.subr.bf16.mxu1 %v4377_v2  ;;  %v2181_v27 = vadd.f32 %v2157_v47, %v2069_v9  ;;  %v4800_v9 = vmov 2475754826  }
 0x686   : > { %v4700_v19 = vpop.eup %4699  ;;  %4380 = vmatpush1.bf16.msra.mxu1 %v4379_v23 }
 0x687   : > { %v2166_v3 = vsel %vm2165_vm2, %v2163_v13, %v2160_v22  ;;  %v2169_v30 = vmul.f32 0.6931472, %v4700_v19  ;;  %v4799_v22 = vmov 683565275  }
 0x688   : > { %v2182_v61 = vadd.f32 %v2166_v3, %v2070_v39  ;;  %v4801_v3 = vmov 2131351028  }
 0x689   : > { %v2175_v43 = vsel %vm2174_vm4, %v2172_v56, %v2169_v30  ;;  %v4802_v30 = vmov 2102212464  }
 0x68a   : > { %v2183_v40 = vadd.f32 %v2175_v43, %v2071_v41  ;;  %v4383_v36 = vpack.c.bf16 %v2182_v61, %v2180_v46  ;;  %v4803_v46 = vmov 920167782  }
 0x68c   : > { %v4381_v1 = vpack.c.bf16 %v2183_v40, %v2181_v27 }
 0x68e   : > { %4382 = vmatprep.subr.bf16.mxu1 %v4381_v1  ;;  %v6487_v1 = vmov 1326507024  }
 0x68f   : > { %4384 = vmatpush1.bf16.msra.mxu1 %v4383_v36 }
 0x692   : > { %4261 = vmatmul.mubr.msk.f32.vlgmr.msra.gmra.mrb[24].mxu1 %vm6488_vm10, %v2184_v37 }
 0x693   : > { %2294 = vmatprep.mubr.f32.mxu1 %v4797_v0 }
 0x696   : > { %4262 = vmatmul.mubr.msk.f32.gmra.mrb[26].mxu1 %vm6488_vm10, %v2185_v45 }
 0x697   : > { %2300 = vmatprep.mubr.f32.mxu1 %v4797_v0 }
 0x69a   : > { %4263 = vmatmul.mubr.msk.f32.gmra.mrb[28].mxu1 %vm6488_vm10, %v2186_v42 }
 0x69b   : > { %2306 = vmatprep.mubr.f32.mxu1 %v4797_v0 }
 0x69e   : > { %4264 = vmatmul.mubr.msk.f32.gmra.mrb[30].mxu1 %vm6488_vm10, %v2187_v49 }
 0x69f   : > { %4038 = vmatprep.mubr.f32.mxu1 %v4797_v0 }
 0x765   : > { %v2290_v58 = vpop.f32.mrb[24].mxu1 }
 0x766   : > { %v5680_v57 = vadd.f32 %v2290_v58, %v2195_v54  ;;  %v2292_v55 = vpop.f32.mrb[25].mxu1 }
 0x767   : > { %v5682_v34 = vadd.f32 %v2292_v55, %v2195_v54 }
 0x768   : > { %v2314_v4 = vand.u32 2147483647, %v5680_v57  ;;  %v2317_v44 = vand.u32 2139095040, %v5680_v57 }
 0x769   : > { %v2418_v21 = vand.u32 2147483647, %v5682_v34  ;;  %v2421_v62 = vand.u32 2139095040, %v5682_v34  ;;  %v2296_v26 = vpop.f32.mrb[26].mxu1 }
 0x76a   : > { %v2318_v5 = vshrl.u32 %v2317_v44, 23  ;;  %v2321_v0 = vand.u32 8388607, %v2314_v4  ;;  %v5690_v12 = vadd.f32 %v2296_v26, %v2200_v6  ;;  %v2298_v53 = vpop.f32.mrb[27].mxu1 }
 0x76b   : > { %v2422_v50 = vshrl.u32 %v2421_v62, 23  ;;  %v2425_v16 = vand.u32 8388607, %v2418_v21  ;;  %v5706_v51 = vadd.f32 %v2298_v53, %v2200_v6 }
 0x76c   : > { %v4265_v24 = vadd.s32 4294967169, %v2318_v5  ;;  %v2522_v18 = vand.u32 2147483647, %v5690_v12  ;;  %v2525_v7 = vand.u32 2139095040, %v5690_v12  ;;  %v2322_v10 = vor.u32 8388608, %v2321_v0 }
 0x76d   : > { %v4269_v59 = vadd.s32 4294967169, %v2422_v50  ;;  %v5696_v8 = vpop.f32.mrb[28].mxu1  ;;  %v2426_v38 = vor.u32 8388608, %v2425_v16 }
 0x76e   : > { %v2324_v11 = vadd.s32 1, %v4265_v24  ;;  %v2526_v15 = vshrl.u32 %v2525_v7, 23  ;;  %v5700_v52 = vand.u32 8388607, %v2522_v18  ;;  %v5702_v25 = vpop.f32.mrb[29].mxu1  ;;  %v5710_v63 = vshll.u32 %v2322_v10, 8 }
 0x76f   : > { %v2428_v60 = vadd.s32 1, %v4269_v59  ;;  %v5714_v33 = vshll.u32 %v2426_v38, 8 }
 0x770   : > { %vm2325_vm5 = vcmp.gt.s32.totalorder %v2324_v11, 0  ;;  %v4273_v17 = vadd.s32 4294967169, %v2526_v15  ;;  %v2530_v28 = vor.u32 8388608, %v5700_v52 }
 0x771   : > { %v2326_v14 = vsel %vm2325_vm5, %v2324_v11, 0  ;;  %vm2429_vm6 = vcmp.gt.s32.totalorder %v2428_v60, 0  ;;  %v5704_v23 = vpop.f32.mrb[30].mxu1 }
 0x772   : > { %v2327_v31 = vshrl.u32 %v2326_v14, 5  ;;  %v2328_v35 = vand.u32 31, %v2326_v14  ;;  %v2430_v2 = vsel %vm2429_vm6, %v2428_v60, 0  ;;  %v5708_v29 = vpop.f32.mrb[31].mxu1  ;;  %v5718_v19 = vadd.s32 1, %v4273_v17 }
 0x773   : > { %v5712_v20 = vshrl.u32 %v2430_v2, 5  ;;  %v2432_v32 = vand.u32 31, %v2430_v2 }
 0x774   : > { %v2329_v48 = vsub.s32 32, %v2328_v35  ;;  %v2331_v13 = vshll.u32 %v4799_v22, %v2328_v35  ;;  %v2334_v39 = vshll.u32 %v4800_v9, %v2328_v35  ;;  %v2337_v47 = vshll.u32 %v4801_v3, %v2328_v35 }
 0x775   : > { %v2340_v56 = vshll.u32 %v4802_v30, %v2328_v35  ;;  %v2343_v61 = vshll.u32 %v4803_v46, %v2328_v35  ;;  %vm2346_vm7 = vcmp.lt.s32.totalorder %v2327_v31, 1  ;;  %vm2347_vm8 = vcmp.lt.s32.totalorder %v2327_v31, 2 }
 0x776   : > { %v2332_v41 = vshrl.u32 %v4800_v9, %v2329_v48  ;;  %v2335_v43 = vshrl.u32 %v4801_v3, %v2329_v48  ;;  %v2338_v27 = vshrl.u32 %v4802_v30, %v2329_v48  ;;  %v2330_v40 = vshrl.u32 %v4799_v22, %v2329_v48 }
 0x777   : > { %v2341_v36 = vshrl.u32 %v4803_v46, %v2329_v48  ;;  %v2344_v37 = vshrl.u32 %v6487_v1, %v2329_v48  ;;  %v2433_v54 = vsub.s32 32, %v2432_v32  ;;  %vm2348_vm9 = vcmp.lt.s32.totalorder %v2327_v31, 3 }
 0x778   : > { %v2333_v45 = vor.u32 %v2332_v41, %v2331_v13  ;;  %v2336_v42 = vor.u32 %v2335_v43, %v2334_v39  ;;  %v2339_v49 = vor.u32 %v2338_v27, %v2337_v47  ;;  %vm2349_vm11 = vcmp.lt.s32.totalorder %v2327_v31, 4 }
 0x779   : > { %v2342_v58 = vor.u32 %v2341_v36, %v2340_v56  ;;  %v2345_v55 = vor.u32 %v2344_v37, %v2343_v61  ;;  %v2435_v50 = vshll.u32 %v4799_v22, %v2432_v32  ;;  %v2436_v59 = vshrl.u32 %v4800_v9, %v2433_v54 }
 0x77a   : > { %v2350_v44 = vsel %vm2346_vm7, %v2330_v40, %v2333_v45  ;;  %v2351_v6 = vsel %vm2349_vm11, %v2339_v49, 2102212464  ;;  %v2354_v62 = vsel %vm2346_vm7, %v2333_v45, %v2336_v42  ;;  %v2358_v26 = vsel %vm2346_vm7, %v2336_v42, %v2339_v49 }
 0x77b   : > { %v2352_v5 = vsel %vm2348_vm9, %v2336_v42, %v2351_v6  ;;  %v2355_v0 = vsel %vm2349_vm11, %v2342_v58, 920167782  ;;  %v2359_v53 = vsel %vm2349_vm11, %v2345_v55, 1326507024  ;;  %v2438_v7 = vshll.u32 %v4800_v9, %v2432_v32 }
 0x77c   : > { %v2356_v16 = vsel %vm2348_vm9, %v2339_v49, %v2355_v0  ;;  %v2360_v24 = vsel %vm2348_vm9, %v2342_v58, %v2359_v53  ;;  %v2353_v10 = vsel %vm2347_vm8, %v2350_v44, %v2352_v5  ;;  %v2439_v60 = vshrl.u32 %v4801_v3, %v2433_v54 }
 0x77d   : > { %v2357_v11 = vsel %vm2347_vm8, %v2354_v62, %v2356_v16  ;;  %v2361_v38 = vsel %vm2347_vm8, %v2358_v26, %v2360_v24  ;;  %v2437_v2 = vor.u32 %v2436_v59, %v2435_v50  ;;  %v2441_v13 = vshll.u32 %v4801_v3, %v2432_v32 }
 0x77e   : > { %v5741_v15 = vmul.u32.u64.low %v5710_v63, %v2361_v38  ;;  %v5742_v14 = vmul.u32.u64.high %v5710_v63, %v2361_v38, %v5741_v15  ;;  %v5745_v17 = vmul.u32.u64.low %v5710_v63, %v2357_v11  ;;  %v5746_v35 = vmul.u32.u64.high %v5710_v63, %v2357_v11, %v5745_v17 }
 0x77f   : > { %v2440_v48 = vor.u32 %v2439_v60, %v2438_v7  ;;  %v2442_v39 = vshrl.u32 %v4802_v30, %v2433_v54  ;;  %v2434_v31 = vshrl.u32 %v4799_v22, %v2433_v54  ;;  %v2444_v47 = vshll.u32 %v4802_v30, %v2432_v32 }
 0x780   : > { %v2445_v56 = vshrl.u32 %v4803_v46, %v2433_v54  ;;  %v2448_v61 = vshrl.u32 %v6487_v1, %v2433_v54  ;;  %v2369_v41 = vmul.u32 %v5710_v63, %v2353_v10  ;;  %v2447_v27 = vshll.u32 %v4803_v46, %v2432_v32 }
 0x781   : > { %v2443_v43 = vor.u32 %v2442_v39, %v2441_v13  ;;  %vm2450_vm12 = vcmp.lt.s32.totalorder %v5712_v20, 1  ;;  %vm2371_vm13 = vc.u32 %v5742_v14, %v5745_v17  ;;  %v2372_v40 = vadd.s32 1, %v5746_v35 }
 0x782   : > { %v2446_v36 = vor.u32 %v2445_v56, %v2444_v47  ;;  %vm2451_vm14 = vcmp.lt.s32.totalorder %v5712_v20, 2  ;;  %v2449_v37 = vor.u32 %v2448_v61, %v2447_v27  ;;  %vm2452_vm15 = vcmp.lt.s32.totalorder %v5712_v20, 3 }
 0x783   : > { %vm2453_vm0 = vcmp.lt.s32.totalorder %v5712_v20, 4  ;;  %v2458_v45 = vsel %vm2450_vm12, %v2437_v2, %v2440_v48  ;;  %v2373_v63 = vsel %vm2371_vm13, %v2372_v40, %v5746_v35  ;;  %v2462_v49 = vsel %vm2450_vm12, %v2440_v48, %v2443_v43 }
 0x784   : > { %v2455_v42 = vsel %vm2453_vm0, %v2443_v43, 2102212464  ;;  %v2459_v32 = vsel %vm2453_vm0, %v2446_v36, 920167782  ;;  %v2374_v54 = vadd.s32 %v2373_v63, %v2369_v41  ;;  %v2454_v58 = vsel %vm2450_vm12, %v2434_v31, %v2437_v2 }
 0x785   : > { %v2460_v55 = vsel %vm2452_vm15, %v2443_v43, %v2459_v32  ;;  %v2463_v44 = vsel %vm2453_vm0, %v2449_v37, 1326507024  ;;  %v2456_v6 = vsel %vm2452_vm15, %v2440_v48, %v2455_v42  ;;  %vm2533_vm1 = vcmp.gt.s32.totalorder %v5718_v19, 0 }
 0x786   : > { %v2461_v62 = vsel %vm2451_vm14, %v2458_v45, %v2460_v55  ;;  %v2464_v26 = vsel %vm2452_vm15, %v2446_v36, %v2463_v44  ;;  %v2375_v5 = vadd.s32 536870912, %v2374_v54  ;;  %v2534_v59 = vsel %vm2533_vm1, %v5718_v19, 0 }
 0x787   : > { %v2465_v0 = vsel %vm2451_vm14, %v2462_v49, %v2464_v26  ;;  %v5771_v53 = vmul.u32.u64.low %v5714_v33, %v2461_v62  ;;  %v5772_v50 = vmul.u32.u64.high %v5714_v33, %v2461_v62, %v5771_v53  ;;  %v2629_v7 = vand.u32 2139095040, %v5706_v51 }
 0x788   : > { %v5776_v16 = vmul.u32.u64.low %v5714_v33, %v2465_v0  ;;  %v5777_v24 = vmul.u32.u64.high %v5714_v33, %v2465_v0, %v5776_v16  ;;  %v5781_v10 = vshrl.u32 %v2375_v5, 30  ;;  %v2457_v11 = vsel %vm2451_vm14, %v2454_v58, %v2456_v6 }
 0x789   : > { %v2536_v38 = vand.u32 31, %v2534_v59  ;;  %v2476_v15 = vadd.s32 1, %v5772_v50  ;;  %v2626_v2 = vand.u32 2147483647, %v5706_v51  ;;  %v2473_v48 = vmul.u32 %v5714_v33, %v2457_v11 }
 0x78a   : > { %v2377_v60 = vshll.u32 %v5781_v10, 30  ;;  %vm2475_vm2 = vc.u32 %v5777_v24, %v5771_v53  ;;  %v5793_v19 = vshll.u32 %v2530_v28, 8  ;;  %v2630_v13 = vshrl.u32 %v2629_v7, 23 }
 0x78b   : > { %v2537_v35 = vsub.s32 32, %v2536_v38  ;;  %v2477_v39 = vsel %vm2475_vm2, %v2476_v15, %v5772_v50  ;;  %v5798_v31 = vshrl.u32 %v2534_v59, 5  ;;  %v2539_v47 = vshll.u32 %v4799_v22, %v2536_v38 }
 0x78c   : > { %v5795_v20 = vsub.s32 %v2374_v54, %v2377_v60  ;;  %v2478_v56 = vadd.s32 %v2477_v39, %v2473_v48  ;;  %v2542_v33 = vshll.u32 %v4800_v9, %v2536_v38  ;;  %v2545_v28 = vshll.u32 %v4801_v3, %v2536_v38 }
 0x78d   : > { %v2540_v61 = vshrl.u32 %v4800_v9, %v2537_v35  ;;  %v2543_v41 = vshrl.u32 %v4801_v3, %v2537_v35  ;;  %v2546_v43 = vshrl.u32 %v4802_v30, %v2537_v35  ;;  %v2548_v27 = vshll.u32 %v4802_v30, %v2536_v38 }
 0x78e   : > { %v2380_v52 = vsub.s32 0, %v5795_v20  ;;  %v2479_v40 = vadd.s32 536870912, %v2478_v56  ;;  %v2549_v45 = vshrl.u32 %v4803_v46, %v2537_v35  ;;  %v2551_v32 = vshll.u32 %v4803_v46, %v2536_v38 }
 0x78f   : > { %v2541_v36 = vor.u32 %v2540_v61, %v2539_v47  ;;  %v2544_v37 = vor.u32 %v2543_v41, %v2542_v33  ;;  %v2547_v42 = vor.u32 %v2546_v43, %v2545_v28  ;;  %v2552_v49 = vshrl.u32 %v6487_v1, %v2537_v35 }
 0x790   : > { %v4266_v63 = vmin.u32 %v2380_v52, %v5795_v20  ;;  %v2370_v54 = vadd.s32 %v5745_v17, %v5742_v14  ;;  %v5814_v58 = vshrl.u32 %v2479_v40, 30  ;;  %v2550_v55 = vor.u32 %v2549_v45, %v2548_v27 }
 0x791   : > { %v4277_v44 = vadd.s32 4294967169, %v2630_v13  ;;  %v2538_v62 = vshrl.u32 %v4799_v22, %v2537_v35  ;;  %v2553_v26 = vor.u32 %v2552_v49, %v2551_v32  ;;  %vm2554_vm3 = vcmp.lt.s32.totalorder %v5798_v31, 1 }
 0x792   : > { %v2382_v6 = vclz %v4266_v63  ;;  %v2481_v5 = vshll.u32 %v5814_v58, 30  ;;  %vm2555_vm4 = vcmp.lt.s32.totalorder %v5798_v31, 2  ;;  %vm2557_vm5 = vcmp.lt.s32.totalorder %v5798_v31, 4 }
 0x793   : > { %v2562_v0 = vsel %vm2554_vm3, %v2541_v36, %v2544_v37  ;;  %vm2556_vm6 = vcmp.lt.s32.totalorder %v5798_v31, 3  ;;  %v2563_v14 = vsel %vm2557_vm5, %v2550_v55, 920167782  ;;  %v2566_v17 = vsel %vm2554_vm3, %v2544_v37, %v2547_v42  ;;  %v2205_v31 = vpop.permute.xlu0 %2204 }
 0x794   : > { %v4267_v50 = vadd.s32 4294967294, %v2382_v6  ;;  %v2482_v16 = vsub.s32 %v2478_v56, %v2481_v5  ;;  %v2559_v59 = vsel %vm2557_vm5, %v2547_v42, 2102212464  ;;  %v2564_v7 = vsel %vm2556_vm6, %v2547_v42, %v2563_v14 }
 0x795   : > { %v2567_v11 = vsel %vm2557_vm5, %v2553_v26, 1326507024  ;;  %v2558_v38 = vsel %vm2554_vm3, %v2538_v62, %v2541_v36  ;;  %v2565_v60 = vsel %vm2555_vm4, %v2562_v0, %v2564_v7  ;;  %v2636_v39 = vadd.s32 1, %v4277_v44 }
 0x796   : > { %vm4268_vm7 = vcmp.lt.s32.totalorder %v4267_v50, 0  ;;  %v2568_v15 = vsel %vm2556_vm6, %v2550_v55, %v2567_v11  ;;  %v2484_v48 = vsub.s32 0, %v2482_v16  ;;  %v2560_v33 = vsel %vm2556_vm6, %v2544_v37, %v2559_v59 }
 0x797   : > { %v2385_v35 = vsel %vm4268_vm7, 0, %v4267_v50  ;;  %v2569_v13 = vsel %vm2555_vm4, %v2566_v17, %v2568_v15  ;;  %vm2637_vm8 = vcmp.gt.s32.totalorder %v2636_v39, 0  ;;  %v2561_v32 = vsel %vm2555_vm4, %v2558_v38, %v2560_v33 }
 0x798   : > { %v2386_v47 = vsub.s32 32, %v2385_v35  ;;  %v2387_v56 = vshll.u32 %v5795_v20, %v2385_v35  ;;  %v2390_v61 = vsub.s32 4294967266, %v2385_v35  ;;  %v4270_v41 = vmin.u32 %v2484_v48, %v2482_v16 }
 0x799   : > { %v5834_v52 = vmul.u32.u64.low %v5793_v19, %v2569_v13  ;;  %v5835_v28 = vmul.u32.u64.high %v5793_v19, %v2569_v13, %v5834_v52  ;;  %v5838_v40 = vmul.u32.u64.low %v5793_v19, %v2565_v60  ;;  %v5839_v36 = vmul.u32.u64.high %v5793_v19, %v2565_v60, %v5838_v40 }
 0x79a   : > { %v2388_v43 = vshrl.u32 %v2370_v54, %v2386_v47  ;;  %v2391_v27 = vadd.s32 127, %v2390_v61  ;;  %v2486_v45 = vclz %v4270_v41  ;;  %v2633_v20 = vand.u32 8388607, %v2626_v2 }
 0x79b   : > { %v2638_v63 = vsel %vm2637_vm8, %v2636_v39, 0  ;;  %vm2579_vm9 = vc.u32 %v5835_v28, %v5838_v40  ;;  %v2580_v44 = vadd.s32 1, %v5839_v36  ;;  %v2577_v6 = vmul.u32 %v5793_v19, %v2561_v32 }
 0x79c   : > { %v2389_v42 = vor.u32 %v2388_v43, %v2387_v56  ;;  %v2392_v37 = vshll.u32 %v2391_v27, 23  ;;  %v2640_v49 = vand.u32 31, %v2638_v63  ;;  %v4271_v55 = vadd.s32 4294967294, %v2486_v45 }
 0x79d   : > { %v2634_v62 = vor.u32 8388608, %v2633_v20  ;;  %v2581_v14 = vsel %vm2579_vm9, %v2580_v44, %v5839_v36  ;;  %vm2316_vm12 = vcmp.lt.s32.totalorder %v5680_v57, 0  ;;  %v2474_v17 = vadd.s32 %v5771_v53, %v5777_v24 }
 0x79e   : > { %v2393_v54 = vor.u32 4788187, %v2392_v37  ;;  %vm4272_vm11 = vcmp.lt.s32.totalorder %v4271_v55, 0  ;;  %v2641_v26 = vsub.s32 32, %v2640_v49  ;;  %v2396_v0 = vcvt.s32.f32 %v2389_v42 }
 0x79f   : > { %v2489_v50 = vsel %vm4272_vm11, 0, %v4271_v55  ;;  %v2582_v11 = vadd.s32 %v2581_v14, %v2577_v6  ;;  %v5855_v19 = vadd.f32 %v5696_v8, %v2205_v31  ;;  %v5858_v15 = vadd.f32 %v5702_v25, %v2205_v31 }
 0x7a0   : > { %v2394_v5 = vand.u32 2147483647, %v2393_v54  ;;  %v2490_v59 = vsub.s32 32, %v2489_v50  ;;  %v2494_v7 = vsub.s32 4294967266, %v2489_v50  ;;  %v2491_v60 = vshll.u32 %v2482_v16, %v2489_v50 }
 0x7a1   : > { %v2583_v13 = vadd.s32 536870912, %v2582_v11  ;;  %v2644_v39 = vshrl.u32 %v4800_v9, %v2641_v26  ;;  %v2643_v47 = vshll.u32 %v4799_v22, %v2640_v49  ;;  %v2646_v53 = vshll.u32 %v4800_v9, %v2640_v49 }
 0x7a2   : > { %v2397_v38 = vmul.f32 %v2396_v0, %v2394_v5  ;;  %v2492_v35 = vshrl.u32 %v2474_v17, %v2490_v59  ;;  %v2495_v48 = vadd.s32 127, %v2494_v7  ;;  %v2647_v24 = vshrl.u32 %v4801_v3, %v2641_v26 }
 0x7a3   : > { %v2650_v56 = vshrl.u32 %v4802_v30, %v2641_v26  ;;  %v5865_v8 = vshrl.u32 %v2583_v13, 30  ;;  %v2653_v25 = vshrl.u32 %v4803_v46, %v2641_v26  ;;  %v2649_v41 = vshll.u32 %v4801_v3, %v2640_v49 }
 0x7a4   : > { %v2493_v16 = vor.u32 %v2492_v35, %v2491_v60  ;;  %v2496_v61 = vshll.u32 %v2495_v48, 23  ;;  %v2398_v33 = vxor.u32 2147483648, %v2397_v38  ;;  %v2652_v52 = vshll.u32 %v4802_v30, %v2640_v49 }
 0x7a5   : > { %v2656_v43 = vshrl.u32 %v6487_v1, %v2641_v26  ;;  %v2585_v36 = vshll.u32 %v5865_v8, 30  ;;  %v2639_v45 = vshrl.u32 %v2638_v63, 5  ;;  %v2645_v20 = vor.u32 %v2644_v39, %v2643_v47 }
 0x7a6   : > { %v2497_v27 = vor.u32 4788187, %v2496_v61  ;;  %vm5874_vm13 = vcmp.le.f32.partialorder %v2314_v4, 0.7853982  ;;  %v2648_v37 = vor.u32 %v2647_v24, %v2646_v53  ;;  %v2651_v32 = vor.u32 %v2650_v56, %v2649_v41 }
 0x7a7   : > { %v2654_v55 = vor.u32 %v2653_v25, %v2652_v52  ;;  %v2655_v54 = vshll.u32 %v4803_v46, %v2640_v49  ;;  %v2400_v44 = vsub.s32 4, %v5781_v10  ;;  %v2500_v5 = vcvt.s32.f32 %v2493_v16  ;;  %v5905_v25 = vpop.permute.xlu1 %2209 }
 0x7a8   : > { %v2498_v6 = vand.u32 2147483647, %v2497_v27  ;;  %v5880_v0 = vsub.s32 %v2582_v11, %v2585_v36  ;;  %v2399_v63 = vsel %vm2316_vm12, %v2398_v33, %v2397_v38  ;;  %vm2420_vm14 = vcmp.lt.s32.totalorder %v5682_v34, 0 }
 0x7a9   : > { %v2642_v4 = vshrl.u32 %v4799_v22, %v2641_v26  ;;  %v2657_v50 = vor.u32 %v2656_v43, %v2655_v54  ;;  %v2674_v14 = vshll.u32 %v2634_v62, 8  ;;  %vm2658_vm15 = vcmp.lt.s32.totalorder %v2639_v45, 1 }
 0x7aa   : > { %v2501_v31 = vmul.f32 %v2500_v5, %v2498_v6  ;;  %v2588_v17 = vsub.s32 0, %v5880_v0  ;;  %vm2661_vm0 = vcmp.lt.s32.totalorder %v2639_v45, 4  ;;  %vm2660_vm1 = vcmp.lt.s32.totalorder %v2639_v45, 3 }
 0x7ab   : > { %v2663_v49 = vsel %vm2661_vm0, %v2651_v32, 2102212464  ;;  %v2666_v59 = vsel %vm2658_vm15, %v2645_v20, %v2648_v37  ;;  %v2667_v7 = vsel %vm2661_vm0, %v2654_v55, 920167782  ;;  %vm5889_vm2 = vcmp.le.f32.partialorder %v2418_v21, 0.7853982 }
 0x7ac   : > { %v4274_v38 = vmin.u32 %v2588_v17, %v5880_v0  ;;  %vm2659_vm3 = vcmp.lt.s32.totalorder %v2639_v45, 2  ;;  %v2668_v62 = vsel %vm2660_vm1, %v2651_v32, %v2667_v7  ;;  %v2670_v26 = vsel %vm2658_vm15, %v2648_v37, %v2651_v32 }
 0x7ad   : > { %v2662_v60 = vsel %vm2658_vm15, %v2642_v4, %v2645_v20  ;;  %v2669_v35 = vsel %vm2659_vm3, %v2666_v59, %v2668_v62  ;;  %v2671_v48 = vsel %vm2661_vm0, %v2657_v50, 1326507024  ;;  %v2733_v13 = vand.u32 2139095040, %v5855_v19 }
 0x7ae   : > { %v2502_v39 = vxor.u32 2147483648, %v2501_v31  ;;  %v2590_v47 = vclz %v4274_v38  ;;  %v2664_v53 = vsel %vm2660_vm1, %v2648_v37, %v2663_v49  ;;  %v2672_v21 = vsel %vm2660_vm1, %v2654_v55, %v2671_v48 }
 0x7af   : > { %v2673_v24 = vsel %vm2659_vm3, %v2670_v26, %v2672_v21  ;;  %v5900_v56 = vmul.u32.u64.low %v2674_v14, %v2669_v35  ;;  %v5901_v16 = vmul.u32.u64.high %v2674_v14, %v2669_v35, %v5900_v56  ;;  %v2730_v61 = vand.u32 2147483647, %v5855_v19 }
 0x7b0   : > { %v2402_v33 = vsel %vm5874_vm13, %v5680_v57, %v2399_v63  ;;  %v4275_v41 = vadd.s32 4294967294, %v2590_v47  ;;  %v5910_v52 = vmul.u32.u64.low %v2674_v14, %v2673_v24  ;;  %v5911_v43 = vmul.u32.u64.high %v2674_v14, %v2673_v24, %v5910_v52 }
 0x7b1   : > { %v2401_v27 = vsel %vm2316_vm12, %v2400_v44, %v5781_v10  ;;  %v2665_v36 = vsel %vm2659_vm3, %v2662_v60, %v2664_v53  ;;  %v2734_v20 = vshrl.u32 %v2733_v13, 23  ;;  %v5919_v37 = vadd.f32 %v5704_v23, %v5905_v25 }
 0x7b2   : > { %v2503_v32 = vsel %vm2420_vm14, %v2502_v39, %v2501_v31  ;;  %v2578_v55 = vadd.s32 %v5838_v40, %v5835_v28  ;;  %vm4276_vm4 = vcmp.lt.s32.totalorder %v4275_v41, 0  ;;  %v2837_v54 = vand.u32 2139095040, %v5858_v15 }
 0x7b3   : > { %4701 = vcosq.f32 %v2402_v33  ;;  %v2593_v6 = vsel %vm4276_vm4, 0, %v4275_v41  ;;  %v2684_v10 = vadd.s32 1, %v5901_v16  ;;  %v4281_v45 = vadd.s32 4294967169, %v2734_v20 }
 0x7b4   : > { %v2594_v44 = vsub.s32 32, %v2593_v6  ;;  %v2598_v5 = vsub.s32 4294967266, %v2593_v6  ;;  %v2681_v63 = vmul.u32 %v2674_v14, %v2665_v36  ;;  %v2737_v23 = vand.u32 8388607, %v2730_v61 }
 0x7b5   : > { %v2506_v4 = vsel %vm5889_vm2, %v5682_v34, %v2503_v32  ;;  %v2595_v28 = vshll.u32 %v5880_v0, %v2593_v6  ;;  %vm2683_vm5 = vc.u32 %v5911_v43, %v5900_v56  ;;  %v2740_v40 = vadd.s32 1, %v4281_v45 }
 0x7b6   : > { %v2596_v50 = vshrl.u32 %v2578_v55, %v2594_v44  ;;  %v2599_v31 = vadd.s32 127, %v2598_v5  ;;  %v2685_v17 = vsel %vm2683_vm5, %v2684_v10, %v5901_v16  ;;  %v2838_v49 = vshrl.u32 %v2837_v54, 23 }
 0x7b7   : > { %v5938_v14 = vsel %vm5874_vm13, 0, %v2401_v27  ;;  %4703 = vsinq.f32 %v2402_v33  ;;  %v2686_v59 = vadd.s32 %v2685_v17, %v2681_v63  ;;  %vm2741_vm6 = vcmp.gt.s32.totalorder %v2740_v40, 0 }
 0x7b8   : > { %4705 = vcosq.f32 %v2506_v4  ;;  %v2597_v7 = vor.u32 %v2596_v50, %v2595_v28  ;;  %v2600_v38 = vshll.u32 %v2599_v31, 23  ;;  %v2742_v0 = vsel %vm2741_vm6, %v2740_v40, 0 }
 0x7b9   : > { %4707 = vsinq.f32 %v2506_v4  ;;  %v2608_v62 = vsub.s32 4, %v5865_v8  ;;  %v2687_v26 = vadd.s32 536870912, %v2686_v59  ;;  %v2744_v60 = vand.u32 31, %v2742_v0 }
 0x7ba   : > { %v2601_v35 = vor.u32 4788187, %v2600_v38  ;;  %v2738_v48 = vor.u32 8388608, %v2737_v23  ;;  %v2834_v13 = vand.u32 2147483647, %v5858_v15  ;;  %v4285_v39 = vadd.s32 4294967169, %v2838_v49 }
 0x7bb   : > { %v2604_v42 = vcvt.s32.f32 %v2597_v7  ;;  %v5942_v47 = vshrl.u32 %v2687_v26, 30  ;;  %v2743_v53 = vshrl.u32 %v2742_v0, 5  ;;  %v2745_v21 = vsub.s32 32, %v2744_v60 }
 0x7bc   : > { %v2602_v24 = vand.u32 2147483647, %v2601_v35  ;;  %v2747_v16 = vshll.u32 %v4799_v22, %v2744_v60  ;;  %v2750_v33 = vshll.u32 %v4800_v9, %v2744_v60  ;;  %v2753_v41 = vshll.u32 %v4801_v3, %v2744_v60 }
 0x7bd   : > { %v5947_v52 = vpop.eup %4701  ;;  %v2689_v27 = vshll.u32 %v5942_v47, 30  ;;  %v2748_v36 = vshrl.u32 %v4800_v9, %v2745_v21  ;;  %v2751_v20 = vshrl.u32 %v4801_v3, %v2745_v21  ;;  %v2756_v32 = vshll.u32 %v4802_v30, %v2744_v60 }
 0x7be   : > { %vm2524_vm7 = vcmp.lt.s32.totalorder %v5690_v12, 0  ;;  %v2754_v55 = vshrl.u32 %v4802_v30, %v2745_v21  ;;  %v2757_v54 = vshrl.u32 %v4803_v46, %v2745_v21  ;;  %v2759_v6 = vshll.u32 %v4803_v46, %v2744_v60 }
 0x7bf   : > { %v2760_v10 = vshrl.u32 %v6487_v1, %v2745_v21  ;;  %v2605_v45 = vmul.f32 %v2604_v42, %v2602_v24  ;;  %v5958_v44 = vsub.s32 %v2686_v59, %v2689_v27  ;;  %v2749_v5 = vor.u32 %v2748_v36, %v2747_v16 }
 0x7c0   : > { %v2752_v63 = vor.u32 %v2751_v20, %v2750_v33  ;;  %v2755_v23 = vor.u32 %v2754_v55, %v2753_v41  ;;  %v2758_v4 = vor.u32 %v2757_v54, %v2756_v32  ;;  %v2778_v28 = vshll.u32 %v2738_v48, 8 }
 0x7c1   : > { %v2841_v40 = vand.u32 8388607, %v2834_v13  ;;  %v5962_v50 = vpop.eup %4703  ;;  %vm5966_vm8 = vcmp.le.f32.partialorder %v2522_v18, 0.7853982  ;;  %v2692_v17 = vsub.s32 0, %v5958_v44  ;;  %v2761_v49 = vor.u32 %v2760_v10, %v2759_v6 }
 0x7c2   : > { %vm2762_vm9 = vcmp.lt.s32.totalorder %v2743_v53, 1  ;;  %vm2765_vm11 = vcmp.lt.s32.totalorder %v2743_v53, 4  ;;  %v5971_v59 = vpop.eup %4705  ;;  %v2746_v7 = vshrl.u32 %v4799_v22, %v2745_v21  ;;  %v2844_v26 = vadd.s32 1, %v4285_v39 }
 0x7c3   : > { %v2767_v38 = vsel %vm2765_vm11, %v2755_v23, 2102212464  ;;  %v2770_v0 = vsel %vm2762_vm9, %v2749_v5, %v2752_v63  ;;  %v5975_v60 = vpop.eup %4707  ;;  %v2606_v35 = vxor.u32 2147483648, %v2605_v45  ;;  %v4278_v18 = vmin.u32 %v2692_v17, %v5958_v44 }
 0x7c4   : > { %vm2764_vm12 = vcmp.lt.s32.totalorder %v2743_v53, 3  ;;  %v2771_v48 = vsel %vm2765_vm11, %v2758_v4, 920167782  ;;  %vm2763_vm13 = vcmp.lt.s32.totalorder %v2743_v53, 2  ;;  %v2766_v42 = vsel %vm2762_vm9, %v2746_v7, %v2749_v5 }
 0x7c5   : > { %v2772_v24 = vsel %vm2764_vm12, %v2755_v23, %v2771_v48  ;;  %v2774_v16 = vsel %vm2762_vm9, %v2752_v63, %v2755_v23  ;;  %v2694_v33 = vclz %v4278_v18  ;;  %v2768_v41 = vsel %vm2764_vm12, %v2752_v63, %v2767_v38 }
 0x7c6   : > { %v2773_v27 = vsel %vm2763_vm13, %v2770_v0, %v2772_v24  ;;  %v2775_v21 = vsel %vm2765_vm11, %v2761_v49, 1326507024  ;;  %v2842_v32 = vor.u32 8388608, %v2841_v40  ;;  %v2607_v55 = vsel %vm2524_vm7, %v2606_v35, %v2605_v45 }
 0x7c7   : > { %v2776_v36 = vsel %vm2764_vm12, %v2758_v4, %v2775_v21  ;;  %v5980_v20 = vmul.u32.u64.low %v2778_v28, %v2773_v27  ;;  %v5981_v39 = vmul.u32.u64.high %v2778_v28, %v2773_v27, %v5980_v20  ;;  %v4279_v54 = vadd.s32 4294967294, %v2694_v33 }
 0x7c8   : > { %v2777_v6 = vsel %vm2763_vm13, %v2774_v16, %v2776_v36  ;;  %vm2845_vm15 = vcmp.gt.s32.totalorder %v2844_v26, 0  ;;  %v2769_v10 = vsel %vm2763_vm13, %v2766_v42, %v2768_v41  ;;  %v2682_v53 = vadd.s32 %v5900_v56, %v5911_v43 }
 0x7c9   : > { %v5986_v5 = vmul.u32.u64.low %v2778_v28, %v2777_v6  ;;  %v5987_v23 = vmul.u32.u64.high %v2778_v28, %v2777_v6, %v5986_v5  ;;  %v2846_v63 = vsel %vm2845_vm15, %v2844_v26, 0  ;;  %vm4280_vm0 = vcmp.lt.s32.totalorder %v4279_v54, 0 }
 0x7ca   : > { %v2848_v4 = vand.u32 31, %v2846_v63  ;;  %v6486_v17 = vand.u32 2147483647, %v5919_v37  ;;  %v5995_v40 = vsel %vm5966_vm8, %v5690_v12, %v2607_v55  ;;  %v2697_v45 = vsel %vm4280_vm0, 0, %v4279_v54 }
 0x7cb   : > { %v2788_v49 = vadd.s32 1, %v5981_v39  ;;  %v5998_v7 = vshll.u32 %v2842_v32, 8  ;;  %v2698_v38 = vsub.s32 32, %v2697_v45  ;;  %v2702_v0 = vsub.s32 4294967266, %v2697_v45 }
 0x7cc   : > { %v2785_v26 = vmul.u32 %v2778_v28, %v2769_v10  ;;  %v2849_v35 = vsub.s32 32, %v2848_v4  ;;  %v2699_v56 = vshll.u32 %v5958_v44, %v2697_v45  ;;  %vm2787_vm1 = vc.u32 %v5987_v23, %v5980_v20 }
 0x7cd   : > { %v2847_v43 = vshrl.u32 %v2846_v63, 5  ;;  %v2941_v18 = vand.u32 2139095040, %v5919_v37  ;;  %v2700_v48 = vshrl.u32 %v2682_v53, %v2698_v38  ;;  %v2703_v42 = vadd.s32 127, %v2702_v0 }
 0x7ce   : > { %v2789_v24 = vsel %vm2787_vm1, %v2788_v49, %v5981_v39  ;;  %v2851_v16 = vshll.u32 %v4799_v22, %v2848_v4  ;;  %v2852_v41 = vshrl.u32 %v4800_v9, %v2849_v35  ;;  %v2854_v28 = vshll.u32 %v4800_v9, %v2848_v4 }
 0x7cf   : > { %v2790_v33 = vadd.s32 %v2789_v24, %v2785_v26  ;;  %v2855_v27 = vshrl.u32 %v4801_v3, %v2849_v35  ;;  %v2701_v44 = vor.u32 %v2700_v48, %v2699_v56  ;;  %v2704_v21 = vshll.u32 %v2703_v42, 23 }
 0x7d0   : > { %v2857_v36 = vshll.u32 %v4801_v3, %v2848_v4  ;;  %v2858_v32 = vshrl.u32 %v4802_v30, %v2849_v35  ;;  %v2860_v54 = vshll.u32 %v4802_v30, %v2848_v4  ;;  %v2861_v39 = vshrl.u32 %v4803_v46, %v2849_v35 }
 0x7d1   : > { %v2791_v55 = vadd.s32 536870912, %v2790_v33  ;;  %v2945_v6 = vand.u32 8388607, %v6486_v17  ;;  %v2705_v10 = vor.u32 4788187, %v2704_v21  ;;  %v2853_v5 = vor.u32 %v2852_v41, %v2851_v16 }
 0x7d2   : > { %v2856_v63 = vor.u32 %v2855_v27, %v2854_v28  ;;  %v2859_v53 = vor.u32 %v2858_v32, %v2857_v36  ;;  %vm2628_vm3 = vcmp.lt.s32.totalorder %v5706_v51, 0  ;;  %v2862_v49 = vor.u32 %v2861_v39, %v2860_v54 }
 0x7d3   : > { %v6016_v45 = vshrl.u32 %v2791_v55, 30  ;;  %v2863_v38 = vshll.u32 %v4803_v46, %v2848_v4  ;;  %v2864_v0 = vshrl.u32 %v6487_v1, %v2849_v35  ;;  %v2706_v26 = vand.u32 2147483647, %v2705_v10 }
 0x7d4   : > { %v2708_v56 = vcvt.s32.f32 %v2701_v44  ;;  %v2850_v48 = vshrl.u32 %v4799_v22, %v2849_v35  ;;  %vm2866_vm4 = vcmp.lt.s32.totalorder %v2847_v43, 1  ;;  %vm2868_vm5 = vcmp.lt.s32.totalorder %v2847_v43, 3 }
 0x7d5   : > { %v2793_v42 = vshll.u32 %v6016_v45, 30  ;;  %v2865_v24 = vor.u32 %v2864_v0, %v2863_v38  ;;  %vm2869_vm6 = vcmp.lt.s32.totalorder %v2847_v43, 4  ;;  %vm6024_vm9 = vcmp.le.f32.partialorder %v2626_v2, 0.7853982 }
 0x7d6   : > { %v2709_v41 = vmul.f32 %v2708_v56, %v2706_v26  ;;  %v2871_v4 = vsel %vm2869_vm6, %v2859_v53, 2102212464  ;;  %v2874_v28 = vsel %vm2866_vm4, %v2853_v5, %v2856_v63  ;;  %v2875_v27 = vsel %vm2869_vm6, %v2862_v49, 920167782 }
 0x7d7   : > { %v6031_v35 = vsub.s32 %v2790_v33, %v2793_v42  ;;  %vm2867_vm11 = vcmp.lt.s32.totalorder %v2847_v43, 2  ;;  %v2876_v44 = vsel %vm2868_vm5, %v2859_v53, %v2875_v27  ;;  %v2942_v21 = vshrl.u32 %v2941_v18, 23 }
 0x7d8   : > { %4709 = vcosq.f32 %v5995_v40  ;;  %v2710_v36 = vxor.u32 2147483648, %v2709_v41  ;;  %v2870_v2 = vsel %vm2866_vm4, %v2850_v48, %v2853_v5  ;;  %v2877_v32 = vsel %vm2867_vm11, %v2874_v28, %v2876_v44 }
 0x7d9   : > { %v2796_v55 = vsub.s32 0, %v6031_v35  ;;  %v2872_v54 = vsel %vm2868_vm5, %v2856_v63, %v2871_v4  ;;  %v2878_v39 = vsel %vm2866_vm4, %v2856_v63, %v2859_v53  ;;  %v2879_v33 = vsel %vm2869_vm6, %v2865_v24, 1326507024 }
 0x7da   : > { %v2880_v10 = vsel %vm2868_vm5, %v2862_v49, %v2879_v33  ;;  %v6043_v38 = vmul.u32.u64.low %v5998_v7, %v2877_v32  ;;  %v6044_v18 = vmul.u32.u64.high %v5998_v7, %v2877_v32, %v6043_v38  ;;  %v6049_v5 = vadd.f32 %v5708_v29, %v5905_v25 }
 0x7db   : > { %v4282_v0 = vmin.u32 %v2796_v55, %v6031_v35  ;;  %v2881_v26 = vsel %vm2867_vm11, %v2878_v39, %v2880_v10  ;;  %v4289_v56 = vadd.s32 4294967169, %v2942_v21  ;;  %v2946_v48 = vor.u32 8388608, %v2945_v6 }
 0x7dc   : > { %v2711_v63 = vsel %vm2628_vm3, %v2710_v36, %v2709_v41  ;;  %v2873_v53 = vsel %vm2867_vm11, %v2870_v2, %v2872_v54  ;;  %v6057_v49 = vmul.u32.u64.low %v5998_v7, %v2881_v26  ;;  %v6058_v42 = vmul.u32.u64.high %v5998_v7, %v2881_v26, %v6057_v49 }
 0x7dd   : > { %v6065_v29 = vsel %vm2524_vm7, %v2608_v62, %v5865_v8  ;;  %4711 = vsinq.f32 %v5995_v40  ;;  %v2798_v25 = vclz %v4282_v0  ;;  %v2948_v6 = vadd.s32 1, %v4289_v56 }
 0x7de   : > { %v2786_v24 = vadd.s32 %v5980_v20, %v5987_v23  ;;  %v2892_v43 = vadd.s32 1, %v6044_v18  ;;  %v6485_v41 = vand.u32 2147483647, %v6049_v5  ;;  %v3045_v4 = vand.u32 2139095040, %v6049_v5 }
 0x7df   : > { %v6076_v28 = vsel %vm6024_vm9, %v5706_v51, %v2711_v63  ;;  %v4283_v8 = vadd.s32 4294967294, %v2798_v25  ;;  %v2889_v62 = vmul.u32 %v5998_v7, %v2873_v53  ;;  %vm2949_vm7 = vcmp.gt.s32.totalorder %v2948_v6, 0 }
 0x7e0   : > { %vm2891_vm12 = vc.u32 %v6058_v42, %v6043_v38  ;;  %v2950_v40 = vsel %vm2949_vm7, %v2948_v6, 0  ;;  %v6081_v20 = vshll.u32 %v2946_v48, 8  ;;  %v3046_v23 = vshrl.u32 %v3045_v4, 23 }
 0x7e1   : > { %vm4284_vm13 = vcmp.lt.s32.totalorder %v4283_v8, 0  ;;  %v2893_v27 = vsel %vm2891_vm12, %v2892_v43, %v6044_v18  ;;  %v2952_v44 = vand.u32 31, %v2950_v40  ;;  %v2504_v21 = vsub.s32 4, %v5814_v58 }
 0x7e2   : > { %v6085_v36 = vpop.eup %4709  ;;  %v2801_v2 = vsel %vm4284_vm13, 0, %v4283_v8  ;;  %v2894_v32 = vadd.s32 %v2893_v27, %v2889_v62  ;;  %v6087_v55 = vshrl.u32 %v2950_v40, 5  ;;  %v6091_v7 = vand.u32 8388607, %v6485_v41 }
 0x7e3   : > { %v2802_v54 = vsub.s32 32, %v2801_v2  ;;  %v2806_v39 = vsub.s32 4294967266, %v2801_v2  ;;  %v2953_v33 = vsub.s32 32, %v2952_v44  ;;  %v4293_v10 = vadd.s32 4294967169, %v3046_v23 }
 0x7e4   : > { %v2803_v0 = vshll.u32 %v6031_v35, %v2801_v2  ;;  %v2895_v18 = vadd.s32 536870912, %v2894_v32  ;;  %v2955_v26 = vshll.u32 %v4799_v22, %v2952_v44  ;;  %v2958_v56 = vshll.u32 %v4800_v9, %v2952_v44 }
 0x7e5   : > { %v2804_v48 = vshrl.u32 %v2786_v24, %v2802_v54  ;;  %v2807_v63 = vadd.s32 127, %v2806_v39  ;;  %v2956_v53 = vshrl.u32 %v4800_v9, %v2953_v33  ;;  %v2961_v49 = vshll.u32 %v4801_v3, %v2952_v44 }
 0x7e6   : > { %v6098_v25 = vshrl.u32 %v2895_v18, 30  ;;  %v2954_v6 = vshrl.u32 %v4799_v22, %v2953_v33  ;;  %v2959_v43 = vshrl.u32 %v4801_v3, %v2953_v33  ;;  %v2962_v4 = vshrl.u32 %v4802_v30, %v2953_v33 }
 0x7e7   : > { %v6103_v35 = vpop.eup %4711  ;;  %v2805_v8 = vor.u32 %v2804_v48, %v2803_v0  ;;  %v2808_v62 = vshll.u32 %v2807_v63, 23  ;;  %v2964_v40 = vshll.u32 %v4802_v30, %v2952_v44  ;;  %v2965_v24 = vshrl.u32 %v4803_v46, %v2953_v33 }
 0x7e8   : > { %vm2732_vm15 = vcmp.lt.s32.totalorder %v5855_v19, 0  ;;  %v2897_v23 = vshll.u32 %v6098_v25, 30  ;;  %v2957_v27 = vor.u32 %v2956_v53, %v2955_v26  ;;  %v2960_v2 = vor.u32 %v2959_v43, %v2958_v56 }
 0x7e9   : > { %v2963_v54 = vor.u32 %v2962_v4, %v2961_v49  ;;  %v2809_v39 = vor.u32 4788187, %v2808_v62  ;;  %v2966_v18 = vor.u32 %v2965_v24, %v2964_v40  ;;  %v2967_v41 = vshll.u32 %v4803_v46, %v2952_v44 }
 0x7ea   : > { %v2968_v17 = vshrl.u32 %v6487_v1, %v2953_v33  ;;  %vm6113_vm0 = vcmp.le.f32.partialorder %v2730_v61, 0.7853982  ;;  %v2812_v48 = vcvt.s32.f32 %v2805_v8  ;;  %v6117_v63 = vsub.s32 %v2894_v32, %v2897_v23 }
 0x7eb   : > { %vm2970_vm1 = vcmp.lt.s32.totalorder %v6087_v55, 1  ;;  %vm2971_vm4 = vcmp.lt.s32.totalorder %v6087_v55, 2  ;;  %v2810_v26 = vand.u32 2147483647, %v2809_v39  ;;  %vm2972_vm5 = vcmp.lt.s32.totalorder %v6087_v55, 3 }
 0x7ec   : > { %v2969_v56 = vor.u32 %v2968_v17, %v2967_v41  ;;  %vm2973_vm6 = vcmp.lt.s32.totalorder %v6087_v55, 4  ;;  %v2900_v44 = vsub.s32 0, %v6117_v63  ;;  %v2978_v61 = vsel %vm2970_vm1, %v2957_v27, %v2960_v2 }
 0x7ed   : > { %v2975_v33 = vsel %vm2973_vm6, %v2963_v54, 2102212464  ;;  %v2979_v53 = vsel %vm2973_vm6, %v2966_v18, 920167782  ;;  %v2813_v49 = vmul.f32 %v2812_v48, %v2810_v26  ;;  %v2974_v43 = vsel %vm2970_vm1, %v2954_v6, %v2957_v27 }
 0x7ee   : > { %v2980_v4 = vsel %vm2972_vm5, %v2963_v54, %v2979_v53  ;;  %v2982_v32 = vsel %vm2970_vm1, %v2960_v2, %v2963_v54  ;;  %v4286_v8 = vmin.u32 %v2900_v44, %v6117_v63  ;;  %v2976_v62 = vsel %vm2972_vm5, %v2960_v2, %v2975_v33 }
 0x7ef   : > { %v2981_v40 = vsel %vm2971_vm4, %v2978_v61, %v2980_v4  ;;  %v2983_v17 = vsel %vm2973_vm6, %v2969_v56, 1326507024  ;;  %v2814_v41 = vxor.u32 2147483648, %v2813_v49  ;;  %v3050_v27 = vor.u32 8388608, %v6091_v7 }
 0x7f0   : > { %v2984_v24 = vsel %vm2972_vm5, %v2966_v18, %v2983_v17  ;;  %v6128_v23 = vmul.u32.u64.low %v6081_v20, %v2981_v40  ;;  %v6129_v39 = vmul.u32.u64.high %v6081_v20, %v2981_v40, %v6128_v23  ;;  %v2902_v1 = vclz %v4286_v8 }
 0x7f1   : > { %v2985_v6 = vsel %vm2971_vm4, %v2982_v32, %v2984_v24  ;;  %v3052_v54 = vadd.s32 1, %v4293_v10  ;;  %v2815_v2 = vsel %vm2732_vm15, %v2814_v41, %v2813_v49  ;;  %v2977_v48 = vsel %vm2971_vm4, %v2974_v43, %v2976_v62 }
 0x7f2   : > { %v6140_v18 = vmul.u32.u64.low %v6081_v20, %v2985_v6  ;;  %v6141_v26 = vmul.u32.u64.high %v6081_v20, %v2985_v6, %v6140_v18  ;;  %v6146_v56 = vsel %vm5966_vm8, 0, %v6065_v29  ;;  %4713 = vcosq.f32 %v6076_v28 }
 0x7f3   : > { %v4287_v44 = vadd.s32 4294967294, %v2902_v1  ;;  %vm3053_vm11 = vcmp.gt.s32.totalorder %v3052_v54, 0  ;;  %4715 = vsinq.f32 %v6076_v28  ;;  %v2818_v55 = vsel %vm6113_vm0, %v5855_v19, %v2815_v2 }
 0x7f4   : > { %v2996_v7 = vadd.s32 1, %v6129_v39  ;;  %v3054_v10 = vsel %vm3053_vm11, %v3052_v54, 0  ;;  %v2890_v33 = vadd.s32 %v6043_v38, %v6058_v42  ;;  %v2993_v31 = vmul.u32 %v6081_v20, %v2977_v48 }
 0x7f5   : > { %vm4288_vm7 = vcmp.lt.s32.totalorder %v4287_v44, 0  ;;  %v3056_v29 = vand.u32 31, %v3054_v10  ;;  %vm2995_vm8 = vc.u32 %v6141_v26, %v6128_v23  ;;  %v6159_v1 = vshll.u32 %v3050_v27, 8 }
 0x7f6   : > { %v2905_v61 = vsel %vm4288_vm7, 0, %v4287_v44  ;;  %v2505_v28 = vsel %vm2420_vm14, %v2504_v21, %v5814_v58  ;;  %4717 = vcosq.f32 %v2818_v55  ;;  %v2997_v38 = vsel %vm2995_vm8, %v2996_v7, %v6129_v39 }
 0x7f7   : > { %v2906_v53 = vsub.s32 32, %v2905_v61  ;;  %v2910_v49 = vsub.s32 4294967266, %v2905_v61  ;;  %v2907_v42 = vshll.u32 %v6117_v63, %v2905_v61  ;;  %v2998_v20 = vadd.s32 %v2997_v38, %v2993_v31 }
 0x7f8   : > { %v3055_v43 = vshrl.u32 %v3054_v10, 5  ;;  %v3057_v4 = vsub.s32 32, %v3056_v29  ;;  %v3059_v62 = vshll.u32 %v4799_v22, %v3056_v29  ;;  %v3062_v40 = vshll.u32 %v4800_v9, %v3056_v29 }
 0x7f9   : > { %v2908_v32 = vshrl.u32 %v2890_v33, %v2906_v53  ;;  %v2911_v8 = vadd.s32 127, %v2910_v49  ;;  %v2999_v17 = vadd.s32 536870912, %v2998_v20  ;;  %v3065_v21 = vshll.u32 %v4801_v3, %v3056_v29 }
 0x7fa   : > { %v3060_v41 = vshrl.u32 %v4800_v9, %v3057_v4  ;;  %v3063_v58 = vshrl.u32 %v4801_v3, %v3057_v4  ;;  %v3066_v63 = vshrl.u32 %v4802_v30, %v3057_v4  ;;  %v3069_v6 = vshrl.u32 %v4803_v46, %v3057_v4 }
 0x7fb   : > { %v2909_v24 = vor.u32 %v2908_v32, %v2907_v42  ;;  %v2912_v39 = vshll.u32 %v2911_v8, 23  ;;  %4719 = vsinq.f32 %v2818_v55  ;;  %vm2836_vm14 = vcmp.lt.s32.totalorder %v5858_v15, 0 }
 0x7fc   : > { %v6176_v27 = vshrl.u32 %v2999_v17, 30  ;;  %v3068_v54 = vshll.u32 %v4802_v30, %v3056_v29  ;;  %v2507_v9 = vsel %vm5889_vm2, 0, %v2505_v28  ;;  %v6181_v2 = vpop.eup %4713  ;;  %vm6185_vm12 = vcmp.le.f32.partialorder %v2834_v13, 0.7853982 }
 0x7fd   : > { %v2913_v48 = vor.u32 4788187, %v2912_v39  ;;  %v3061_v18 = vor.u32 %v3060_v41, %v3059_v62  ;;  %v3064_v44 = vor.u32 %v3063_v58, %v3062_v40  ;;  %v3067_v55 = vor.u32 %v3066_v63, %v3065_v21  ;;  %v6189_v7 = vpop.eup %4715 }
 0x7fe   : > { %v3001_v10 = vshll.u32 %v6176_v27, 30  ;;  %v3070_v30 = vor.u32 %v3069_v6, %v3068_v54  ;;  %v3071_v11 = vshll.u32 %v4803_v46, %v3056_v29  ;;  %v6543_v33 = vmov 1326507024  }
 0x7ff   : > { %v3072_v31 = vshrl.u32 %v6543_v33, %v3057_v4  ;;  %v2914_v61 = vand.u32 2147483647, %v2913_v48  ;;  %v2916_v28 = vcvt.s32.f32 %v2909_v24  ;;  %v3058_v13 = vshrl.u32 %v4799_v22, %v3057_v4 }
 0x800   : > { %vm3074_vm2 = vcmp.lt.s32.totalorder %v3055_v43, 1  ;;  %v6195_v53 = vsub.s32 %v2998_v20, %v3001_v10  ;;  %vm3076_vm13 = vcmp.lt.s32.totalorder %v3055_v43, 3  ;;  %vm3077_vm1 = vcmp.lt.s32.totalorder %v3055_v43, 4  ;;  %v6197_v38 = vpop.eup %4717 }
 0x801   : > { %v3073_v49 = vor.u32 %v3072_v31, %v3071_v11  ;;  %v2917_v42 = vmul.f32 %v2916_v28, %v2914_v61  ;;  %v3078_v32 = vsel %vm3074_vm2, %v3058_v13, %v3061_v18  ;;  %v3079_v8 = vsel %vm3077_vm1, %v3067_v55, 2102212464 }
 0x802   : > { %v3082_v62 = vsel %vm3074_vm2, %v3061_v18, %v3064_v44  ;;  %v3004_v46 = vsub.s32 0, %v6195_v53  ;;  %v3080_v29 = vsel %vm3076_vm13, %v3064_v44, %v3079_v8  ;;  %v3083_v40 = vsel %vm3077_vm1, %v3070_v30, 920167782 }
 0x803   : > { %v3086_v17 = vsel %vm3074_vm2, %v3064_v44, %v3067_v55  ;;  %v2918_v41 = vxor.u32 2147483648, %v2917_v42  ;;  %vm3075_vm4 = vcmp.lt.s32.totalorder %v3055_v43, 2  ;;  %v3084_v22 = vsel %vm3076_vm13, %v3067_v55, %v3083_v40 }
 0x804   : > { %v3087_v20 = vsel %vm3077_vm1, %v3073_v49, 1326507024  ;;  %v4290_v4 = vmin.u32 %v3004_v46, %v6195_v53  ;;  %v3081_v58 = vsel %vm3075_vm4, %v3078_v32, %v3080_v29  ;;  %v3085_v21 = vsel %vm3075_vm4, %v3082_v62, %v3084_v22 }
 0x805   : > { %v3088_v24 = vsel %vm3076_vm13, %v3070_v30, %v3087_v20  ;;  %v2919_v39 = vsel %vm2836_vm14, %v2918_v41, %v2917_v42  ;;  %v6207_v6 = vmul.u32.u64.low %v6159_v1, %v3085_v21  ;;  %v6208_v54 = vmul.u32.u64.high %v6159_v1, %v3085_v21, %v6207_v6  ;;  %v6211_v48 = vpop.eup %4719 }
 0x806   : > { %v3089_v63 = vsel %vm3075_vm4, %v3086_v17, %v3088_v24  ;;  %v6216_v18 = vsel %vm6185_vm12, %v5858_v15, %v2919_v39  ;;  %v3006_v44 = vclz %v4290_v4  ;;  %v2994_v10 = vadd.s32 %v6128_v23, %v6141_v26 }
 0x807   : > { %v6219_v43 = vmul.u32.u64.low %v6159_v1, %v3089_v63  ;;  %v6220_v55 = vmul.u32.u64.high %v6159_v1, %v3089_v63, %v6219_v43  ;;  %v3097_v30 = vmul.u32 %v6159_v1, %v3081_v58  ;;  %vm2510_vm5 = vweird.f32 %v5682_v34 }
 0x808   : > { %v2515_v11 = vxor.u32 2147483648, %v5975_v60  ;;  %v2712_v33 = vsub.s32 4, %v5942_v47  ;;  %4721 = vcosq.f32 %v6216_v18  ;;  %v4291_v31 = vadd.s32 4294967294, %v3006_v44 }
 0x809   : > { %v2518_v61 = vxor.u32 2147483648, %v5971_v59  ;;  %v2723_v28 = vxor.u32 2147483648, %v6189_v7  ;;  %v3100_v13 = vadd.s32 1, %v6208_v54  ;;  %v3343_v26 = vand.u32 3, %v2507_v9 }
 0x80a   : > { %v2713_v23 = vsel %vm2628_vm3, %v2712_v33, %v5942_v47  ;;  %v2511_v1 = vadd.s32 3, %v2507_v9  ;;  %vm4292_vm6 = vcmp.lt.s32.totalorder %v4291_v31, 0  ;;  %vm3099_vm11 = vc.u32 %v6220_v55, %v6207_v6 }
 0x80b   : > { %v2715_v49 = vsel %vm6024_vm9, 0, %v2713_v23  ;;  %vm2718_vm7 = vweird.f32 %v5706_v51  ;;  %v2726_v42 = vxor.u32 2147483648, %v6181_v2  ;;  %v3009_v32 = vsel %vm4292_vm6, 0, %v4291_v31 }
 0x80c   : > { %v3101_v8 = vsel %vm3099_vm11, %v3100_v13, %v6208_v54  ;;  %vm3344_vm8 = vcmp.lt.s32.totalorder %v3343_v26, 2  ;;  %vm3345_vm2 = vcmp.eq.s32.totalorder %v3343_v26, 0  ;;  %v3010_v62 = vsub.s32 32, %v3009_v32 }
 0x80d   : > { %v3011_v47 = vshll.u32 %v6195_v53, %v3009_v32  ;;  %v3014_v9 = vsub.s32 4294967266, %v3009_v32  ;;  %v3102_v46 = vadd.s32 %v3101_v8, %v3097_v30  ;;  %v3347_v29 = vsel %vm3345_vm2, %v5971_v59, %v2515_v11 }
 0x80e   : > { %vm3348_vm3 = vcmp.eq.s32.totalorder %v3343_v26, 2  ;;  %v3549_v40 = vand.u32 3, %v2715_v49  ;;  %v2512_v16 = vand.u32 3, %v2511_v1  ;;  %v3012_v17 = vshrl.u32 %v2994_v10, %v3010_v62 }
 0x80f   : > { %v3015_v41 = vadd.s32 127, %v3014_v9  ;;  %v3103_v22 = vadd.s32 536870912, %v3102_v46  ;;  %v3350_v20 = vsel %vm3348_vm3, %v2518_v61, %v5975_v60  ;;  %vm2940_vm4 = vcmp.lt.s32.totalorder %v5919_v37, 0 }
 0x810   : > { %v3351_v4 = vsel %vm3344_vm8, %v3347_v29, %v3350_v20  ;;  %vm3550_vm9 = vcmp.lt.s32.totalorder %v3549_v40, 2  ;;  %vm3551_vm13 = vcmp.eq.s32.totalorder %v3549_v40, 0  ;;  %vm3554_vm1 = vcmp.eq.s32.totalorder %v3549_v40, 2 }
 0x811   : > { %v3013_v58 = vor.u32 %v3012_v17, %v3011_v47  ;;  %v3016_v21 = vshll.u32 %v3015_v41, 23  ;;  %v6245_v24 = vshrl.u32 %v3103_v22, 30  ;;  %v3352_v53 = vsel %vm2510_vm5, nan, %v3351_v4 }
 0x812   : > { %v3553_v39 = vsel %vm3551_vm13, %v6181_v2, %v2723_v28  ;;  %v3556_v63 = vsel %vm3554_vm1, %v2726_v42, %v6189_v7  ;;  %vm2513_vm6 = vcmp.lt.s32.totalorder %v2512_v16, 2  ;;  %vm2514_vm11 = vcmp.eq.s32.totalorder %v2512_v16, 0  ;;  %v6254_v54 = vpop.eup %4721 }
 0x813   : > { %v3017_v44 = vor.u32 4788187, %v3016_v21  ;;  %v3020_v43 = vcvt.s32.f32 %v3013_v58  ;;  %v3105_v10 = vshll.u32 %v6245_v24, 30  ;;  %v3557_v30 = vsel %vm3550_vm9, %v3553_v39, %v3556_v63 }
 0x814   : > { %v3558_v33 = vsel %vm2718_vm7, nan, %v3557_v30  ;;  %v2516_v31 = vsel %vm2514_vm11, %v5971_v59, %v2515_v11  ;;  %vm2517_vm8 = vcmp.eq.s32.totalorder %v2512_v16, 2  ;;  %v2719_v13 = vadd.s32 3, %v2715_v49 }
 0x815   : > { %v6544_v23 = vand.u32 2147483647, %v5919_v37  ;;  %v3018_v1 = vand.u32 2147483647, %v3017_v44  ;;  %v6267_v32 = vsub.s32 %v3102_v46, %v3105_v10  ;;  %v4385_v8 = vpack.c.bf16 %v3558_v33, %v3352_v53 }
 0x816   : > { %v2519_v62 = vsel %vm2517_vm8, %v2518_v61, %v5975_v60  ;;  %v2816_v47 = vsub.s32 4, %v6016_v45  ;;  %4723 = vsinq.f32 %v6216_v18  ;;  %v2720_v11 = vand.u32 3, %v2719_v13 }
 0x817   : > { %vm6263_vm2 = vcmp.le.f32.partialorder %v6544_v23, 0.7853982  ;;  %v2520_v59 = vsel %vm2513_vm6, %v2516_v31, %v2519_v62  ;;  %v3021_v49 = vmul.f32 %v3020_v43, %v3018_v1  ;;  %v3098_v9 = vadd.s32 %v6207_v6, %v6220_v55  ;;  %4386 = vmatprep.subr.bf16.mxu1 %v4385_v8 }
 0x818   : > { %v3108_v29 = vsub.s32 0, %v6267_v32  ;;  %v2411_v46 = vxor.u32 2147483648, %v5962_v50  ;;  %v2521_v40 = vsel %vm2510_vm5, nan, %v2520_v59  ;;  %vm2721_vm3 = vcmp.lt.s32.totalorder %v2720_v11, 2 }
 0x819   : > { %vm2722_vm9 = vcmp.eq.s32.totalorder %v2720_v11, 0  ;;  %vm2725_vm13 = vcmp.eq.s32.totalorder %v2720_v11, 2  ;;  %v3022_v60 = vxor.u32 2147483648, %v3021_v49  ;;  %v2414_v16 = vxor.u32 2147483648, %v5947_v52 }
 0x81a   : > { %v4294_v18 = vmin.u32 %v3108_v29, %v6267_v32  ;;  %v2724_v61 = vsel %vm2722_vm9, %v6181_v2, %v2723_v28  ;;  %v2727_v6 = vsel %vm2725_vm13, %v2726_v42, %v6189_v7  ;;  %v2619_v17 = vxor.u32 2147483648, %v6103_v35 }
 0x81b   : > { %v2728_v55 = vsel %vm2721_vm3, %v2724_v61, %v2727_v6  ;;  %v3240_v34 = vand.u32 3, %v5938_v14  ;;  %v3023_v41 = vsel %vm2940_vm4, %v3022_v60, %v3021_v49  ;;  %v3446_v4 = vand.u32 3, %v6146_v56 }
 0x81c   : > { %v3110_v22 = vclz %v4294_v18  ;;  %v2729_v20 = vsel %vm2718_vm7, nan, %v2728_v55  ;;  %vm2406_vm5 = vweird.f32 %v5680_v57  ;;  %v2622_v2 = vxor.u32 2147483648, %v6085_v36 }
 0x81d   : > { %v4393_v58 = vpack.c.bf16 %v2729_v20, %v2521_v40  ;;  %vm3242_vm1 = vcmp.eq.s32.totalorder %v3240_v34, 0  ;;  %vm2614_vm6 = vweird.f32 %v5690_v12  ;;  %vm3245_vm11 = vcmp.eq.s32.totalorder %v3240_v34, 2 }
 0x81e   : > { %v4295_v7 = vadd.s32 4294967294, %v3110_v22  ;;  %v3244_v28 = vsel %vm3242_vm1, %v5947_v52, %v2411_v46  ;;  %v3026_v42 = vsel %vm6263_vm2, %v5919_v37, %v3023_v41  ;;  %vm3241_vm7 = vcmp.lt.s32.totalorder %v3240_v34, 2 }
 0x81f   : > { %4394 = vmatprep.subr.bf16.mxu0 %v4393_v58  ;;  %v3247_v51 = vsel %vm3245_vm11, %v2414_v16, %v5962_v50  ;;  %vm3448_vm8 = vcmp.eq.s32.totalorder %v3446_v4, 0  ;;  %vm3451_vm9 = vcmp.eq.s32.totalorder %v3446_v4, 2  ;;  %vm3447_vm13 = vcmp.lt.s32.totalorder %v3446_v4, 2 }
 0x820   : > { %vm4296_vm3 = vcmp.lt.s32.totalorder %v4295_v7, 0  ;;  %v3248_v21 = vsel %vm3241_vm7, %v3244_v28, %v3247_v51  ;;  %v3450_v53 = vsel %vm3448_vm8, %v6085_v36, %v2619_v17  ;;  %v6301_v39 = vpop.eup %4723  ;;  %v3453_v44 = vsel %vm3451_vm9, %v2622_v2, %v6103_v35 }
 0x821   : > { %v3113_v63 = vsel %vm4296_vm3, 0, %v4295_v7  ;;  %v2407_v43 = vadd.s32 3, %v5938_v14  ;;  %4725 = vcosq.f32 %v3026_v42  ;;  %v3454_v33 = vsel %vm3447_vm13, %v3450_v53, %v3453_v44 }
 0x822   : > { %v3114_v10 = vsub.s32 32, %v3113_v63  ;;  %v3118_v30 = vsub.s32 4294967266, %v3113_v63  ;;  %v3249_v31 = vsel %vm2406_vm5, nan, %v3248_v21  ;;  %v3455_v13 = vsel %vm2614_vm6, nan, %v3454_v33 }
 0x823   : > { %v2408_v23 = vand.u32 3, %v2407_v43  ;;  %v2615_v1 = vadd.s32 3, %v6146_v56  ;;  %v3115_v8 = vshll.u32 %v6267_v32, %v3113_v63  ;;  %v4387_v11 = vpack.c.bf16 %v3455_v13, %v3249_v31 }
 0x824   : > { %v3116_v62 = vshrl.u32 %v3098_v9, %v3114_v10  ;;  %v3119_v59 = vadd.s32 127, %v3118_v30  ;;  %v2920_v49 = vsub.s32 4, %v6098_v25  ;;  %4727 = vsinq.f32 %v3026_v42 }
 0x825   : > { %vm2410_vm1 = vcmp.eq.s32.totalorder %v2408_v23, 0  ;;  %vm2413_vm11 = vcmp.eq.s32.totalorder %v2408_v23, 2  ;;  %v2616_v14 = vand.u32 3, %v2615_v1  ;;  %4388 = vmatpush1.bf16.msra.mxu1 %v4387_v11  ;;  %vm3044_vm7 = vcmp.lt.s32.totalorder %v6049_v5, 0 }
 0x826   : > { %v3117_v29 = vor.u32 %v3116_v62, %v3115_v8  ;;  %v3120_v40 = vshll.u32 %v3119_v59, 23  ;;  %v2412_v60 = vsel %vm2410_vm1, %v5947_v52, %v2411_v46  ;;  %v2415_v18 = vsel %vm2413_vm11, %v2414_v16, %v5962_v50 }
 0x827   : > { %vm2409_vm8 = vcmp.lt.s32.totalorder %v2408_v23, 2  ;;  %vm2618_vm3 = vcmp.eq.s32.totalorder %v2616_v14, 0  ;;  %vm2621_vm9 = vcmp.eq.s32.totalorder %v2616_v14, 2  ;;  %vm2617_vm13 = vcmp.lt.s32.totalorder %v2616_v14, 2 }
 0x828   : > { %v3121_v56 = vor.u32 4788187, %v3120_v40  ;;  %v2416_v32 = vsel %vm2409_vm8, %v2412_v60, %v2415_v18  ;;  %v2620_v9 = vsel %vm2618_vm3, %v6085_v36, %v2619_v17  ;;  %v3124_v61 = vcvt.s32.f32 %v3117_v29 }
 0x829   : > { %v2623_v6 = vsel %vm2621_vm9, %v2622_v2, %v6103_v35  ;;  %v2921_v52 = vsel %vm2836_vm14, %v2920_v49, %v6098_v25  ;;  %v3128_v16 = vsub.s32 4, %v6245_v24  ;;  %v3024_v34 = vsub.s32 4, %v6176_v27 }
 0x82a   : > { %v3122_v46 = vand.u32 2147483647, %v3121_v56  ;;  %v2624_v50 = vsel %vm2617_vm13, %v2620_v9, %v2623_v6  ;;  %v2923_v55 = vsel %vm6185_vm12, 0, %v2921_v52  ;;  %v2417_v36 = vsel %vm2406_vm5, nan, %v2416_v32 }
 0x82b   : > { %v2625_v17 = vsel %vm2614_vm6, nan, %v2624_v50  ;;  %v3755_v35 = vand.u32 3, %v2923_v55  ;;  %v6328_v41 = vpop.eup %4725  ;;  %v3129_v3 = vsel %vm3044_vm7, %v3128_v16, %v6245_v24  ;;  %v2927_v20 = vadd.s32 3, %v2923_v55 }
 0x82c   : > { %v3125_v22 = vmul.f32 %v3124_v61, %v3122_v46  ;;  %v4395_v25 = vpack.c.bf16 %v2625_v17, %v2417_v36  ;;  %v6547_v4 = vand.u32 2147483647, %v6049_v5  ;;  %v2931_v58 = vxor.u32 2147483648, %v6301_v39 }
 0x82d   : > { %v2934_v57 = vxor.u32 2147483648, %v6254_v54  ;;  %v2817_v7 = vsel %vm2732_vm15, %v2816_v47, %v6016_v45  ;;  %v3025_v24 = vsel %vm2940_vm4, %v3024_v34, %v6176_v27  ;;  %vm3757_vm12 = vcmp.eq.s32.totalorder %v3755_v35, 0 }
 0x82e   : > { %vm3043_vm14 = vcmp.le.f32.partialorder %v6547_v4, 0.7853982  ;;  %v3126_v2 = vxor.u32 2147483648, %v3125_v22  ;;  %4396 = vmatpush1.bf16.msra.mxu0 %v4395_v25  ;;  %vm3760_vm5 = vcmp.eq.s32.totalorder %v3755_v35, 2  ;;  %v2928_v42 = vand.u32 3, %v2927_v20  ;;  %v6347_v51 = vpop.eup %4727 }
 0x82f   : > { %v3131_v12 = vsel %vm3043_vm14, 0, %v3129_v3  ;;  %v3759_v53 = vsel %vm3757_vm12, %v6254_v54, %v2931_v58  ;;  %v3762_v63 = vsel %vm3760_vm5, %v2934_v57, %v6301_v39  ;;  %v2819_v45 = vsel %vm6113_vm0, 0, %v2817_v7 }
 0x830   : > { %v3127_v28 = vsel %vm3044_vm7, %v3126_v2, %v3125_v22  ;;  %v3135_v44 = vadd.s32 3, %v3131_v12  ;;  %v6354_v27 = vand.u32 3, %v3131_v12  ;;  %v3027_v47 = vsel %vm6263_vm2, 0, %v3025_v24 }
 0x831   : > { %v3130_v21 = vsel %vm3043_vm14, %v6049_v5, %v3127_v28  ;;  %vm3756_vm15 = vcmp.lt.s32.totalorder %v3755_v35, 2  ;;  %vm2930_vm4 = vcmp.eq.s32.totalorder %v2928_v42, 0  ;;  %vm2933_vm6 = vcmp.eq.s32.totalorder %v2928_v42, 2 }
 0x832   : > { %4729 = vcosq.f32 %v3130_v21  ;;  %v6358_v43 = vsel %vm3756_vm15, %v3759_v53, %v3762_v63  ;;  %v2827_v10 = vxor.u32 2147483648, %v6211_v48  ;;  %v3136_v30 = vand.u32 3, %v3135_v44 }
 0x833   : > { %4731 = vsinq.f32 %v3130_v21  ;;  %v2830_v33 = vxor.u32 2147483648, %v6197_v38  ;;  %v3035_v0 = vxor.u32 2147483648, %v6347_v51  ;;  %v3652_v31 = vand.u32 3, %v2819_v45 }
 0x834   : > { %vm3966_vm0 = vcmp.eq.s32.totalorder %v6354_v27, 2  ;;  %v3038_v13 = vxor.u32 2147483648, %v6328_v41  ;;  %v3858_v26 = vand.u32 3, %v3027_v47  ;;  %v2823_v23 = vadd.s32 3, %v2819_v45 }
 0x835   : > { %v3031_v1 = vadd.s32 3, %v3027_v47  ;;  %vm3963_vm2 = vcmp.eq.s32.totalorder %v6354_v27, 0  ;;  %vm2929_vm1 = vcmp.lt.s32.totalorder %v2928_v42, 2  ;;  %v2932_v8 = vsel %vm2930_vm4, %v6254_v54, %v2931_v58 }
 0x836   : > { %v2935_v62 = vsel %vm2933_vm6, %v2934_v57, %v6301_v39  ;;  %vm3654_vm11 = vcmp.eq.s32.totalorder %v3652_v31, 0  ;;  %vm3962_vm7 = vcmp.lt.s32.totalorder %v6354_v27, 2  ;;  %vm3030_vm8 = vweird.f32 %v5919_v37 }
 0x837   : > { %v3656_v59 = vsel %vm3654_vm11, %v6197_v38, %v2827_v10  ;;  %vm3657_vm3 = vcmp.eq.s32.totalorder %v3652_v31, 2  ;;  %vm3860_vm9 = vcmp.eq.s32.totalorder %v3858_v26, 0  ;;  %vm2926_vm13 = vweird.f32 %v5858_v15  ;;  %v3146_v15 = vld [vmem:[%s6476_s14] sm:$0x7] }
 0x838   : > { %v3659_v11 = vsel %vm3657_vm3, %v2830_v33, %v6211_v48  ;;  %v3862_v14 = vsel %vm3860_vm9, %v6328_v41, %v3035_v0  ;;  %vm3863_vm12 = vcmp.eq.s32.totalorder %v3858_v26, 2  ;;  %v2824_v54 = vand.u32 3, %v2823_v23 }
 0x839   : > { %v2936_v39 = vsel %vm2929_vm1, %v2932_v8, %v2935_v62  ;;  %vm3137_vm5 = vcmp.lt.s32.totalorder %v3136_v30, 2  ;;  %vm2822_vm15 = vweird.f32 %v5855_v19  ;;  %v3865_v49 = vsel %vm3863_vm12, %v3038_v13, %v6347_v51 }
 0x83a   : > { %v3032_v29 = vand.u32 3, %v3031_v1  ;;  %vm3138_vm4 = vcmp.eq.s32.totalorder %v3136_v30, 0  ;;  %vm3141_vm6 = vcmp.eq.s32.totalorder %v3136_v30, 2  ;;  %vm3653_vm11 = vcmp.lt.s32.totalorder %v3652_v31, 2 }
 0x83b   : > { %vm3859_vm10 = vcmp.lt.s32.totalorder %v3858_v26, 2  ;;  %v3660_v60 = vsel %vm3653_vm11, %v3656_v59, %v3659_v11  ;;  %vm2826_vm14 = vcmp.eq.s32.totalorder %v2824_v54, 0  ;;  %vm2829_vm3 = vcmp.eq.s32.totalorder %v2824_v54, 2 }
 0x83c   : > { %v4730_v40 = vpop.eup %4729  ;;  %v3866_v18 = vsel %vm3859_vm10, %v3862_v14, %v3865_v49  ;;  %v2828_v9 = vsel %vm2826_vm14, %v6197_v38, %v2827_v10  ;;  %v2831_v61 = vsel %vm2829_vm3, %v2830_v33, %v6211_v48  ;;  %vm3034_vm1 = vcmp.eq.s32.totalorder %v3032_v29, 0 }
 0x83d   : > { %v4732_v56 = vpop.eup %4731  ;;  %v3142_v32 = vxor.u32 2147483648, %v4730_v40  ;;  %vm2825_vm9 = vcmp.lt.s32.totalorder %v2824_v54, 2  ;;  %v3036_v52 = vsel %vm3034_vm1, %v6328_v41, %v3035_v0  ;;  %vm3037_vm12 = vcmp.eq.s32.totalorder %v3032_v29, 2 }
 0x83e   : > { %v3139_v6 = vxor.u32 2147483648, %v4732_v56  ;;  %vm3033_vm10 = vcmp.lt.s32.totalorder %v3032_v29, 2  ;;  %v3039_v55 = vsel %vm3037_vm12, %v3038_v13, %v6347_v51  ;;  %v2832_v48 = vsel %vm2825_vm9, %v2828_v9, %v2831_v61  ;;  %v4123_v51 = vpop.permute.xlu0 %4122 }
 0x83f   : > { %v3968_v46 = vsel %vm3966_vm0, %v3142_v32, %v4732_v56  ;;  %v3143_v50 = vsel %vm3141_vm6, %v3142_v32, %v4732_v56  ;;  %v3040_v34 = vsel %vm3033_vm10, %v3036_v52, %v3039_v55  ;;  %v3867_v35 = vsel %vm3030_vm8, nan, %v3866_v18 }
 0x840   : > { %v3965_v16 = vsel %vm3963_vm2, %v4730_v40, %v3139_v6  ;;  %v3140_v38 = vsel %vm3138_vm4, %v4730_v40, %v3139_v6  ;;  %v3041_v41 = vsel %vm3030_vm8, nan, %v3040_v34  ;;  %v3764_v22 = vsel %vm2926_vm13, nan, %v6358_v43 }
 0x841   : > { %v3969_v36 = vsel %vm3962_vm7, %v3965_v16, %v3968_v46  ;;  %v3144_v17 = vsel %vm3137_vm5, %v3140_v38, %v3143_v50  ;;  %vm6548_vm0 = vweird.f32 %v6049_v5  ;;  %v2937_v3 = vsel %vm2926_vm13, nan, %v2936_v39  ;;  %v2313_v5 = vld [vmem:[%s6475_s13] sm:$0x7] }
 0x842   : > { %v3970_v25 = vsel %vm6548_vm0, nan, %v3969_v36  ;;  %vm6549_vm2 = vmmov %vm6548_vm0  ;;  %v3661_v37 = vsel %vm2822_vm15, nan, %v3660_v60  ;;  %v2833_v57 = vsel %vm2822_vm15, nan, %v2832_v48  ;;  %vm6550_vm7 = vcmask 261120  }
 0x843   : > { %v3145_v20 = vsel %vm6549_vm2, nan, %v3144_v17  ;;  %v4389_v4 = vpack.c.bf16 %v3970_v25, %v3764_v22  ;;  %v4391_v2 = vpack.c.bf16 %v3867_v35, %v3661_v37  ;;  %v4399_v12 = vpack.c.bf16 %v3041_v41, %v2833_v57  ;;  %vm6551_vm8 = vmmov %vm6550_vm7 }
 0x844   : > { %v4397_v58 = vpack.c.bf16 %v3145_v20, %v2937_v3 }
 0x845   : > { %4390 = vmatprep.subr.bf16.mxu1 %v4389_v4 }
 0x846   : > { %4398 = vmatprep.subr.bf16.mxu0 %v4397_v58  ;;  %4392 = vmatpush1.bf16.msra.mxu1 %v4391_v2 }
 0x847   : > { %4400 = vmatpush1.bf16.msra.mxu0 %v4399_v12 }
 0x849   : > { %4329 = vmatmul.mubr.msk.f32.vlgmr.msra.gmra.mrb[32].mxu1 %vm6550_vm7, %v3146_v15 }
 0x84a   : > { %4330 = vmatmul.mubr.msk.f32.vlgmr.msra.gmra.mrb[24].mxu0 %vm6551_vm8, %v2313_v5 }
 0x91c   : > { %v4040_v19 = vpop.f32.mrb[32].mxu1 }
 0x91d   : > { %v4114_v7 = vpop.f32.mrb[24].mxu0  ;;  %v4042_v28 = vpop.f32.mrb[33].mxu1 }
 0x91e   : > { %v4115_v24 = vadd.f32 %v4114_v7, %v4040_v19  ;;  %v4116_v42 = vpop.f32.mrb[25].mxu0 }
 0x91f   : > { %v4117_v21 = vadd.f32 %v4116_v42, %v4042_v28 }
 0x920   : > { %v4125_v53 = vadd.f32 %v4123_v51, %v4115_v24 }
 0x921   : > { %v4126_v63 = vadd.f32 %v4123_v51, %v4117_v21 }
 0x923   : > { %v4129_v44 = vcombine.low %v4125_v53, %v4126_v63 }
 0x925   : > { %4131 = vst [vmem:[%s515_s18] sm:$0x77] %v4129_v44 }
 0x926   : > { %4746 = shalt.err (!%p4743_p3)
}
 0x927   : > { %s4747_s21 = scalar_lea.hbm %s6420_s28, 128  ;;  %s4751_s18 = scalar_lea.hbm %s6478_s16, 256 }
 0x928   : > { %p4748_p4 = scmp.ne.s32.totalorder %s6420_s28, %s4747_s21  ;;  %p4752_p9 = scmp.lt.u32.totalorder %s6420_s28, %s6478_s16 }
 0x929   : > { %p4753_p10 = scmp.lt.u32.totalorder %s4751_s18, %s4747_s21  ;;  %p4755_p12 = scmp.lt.u32.totalorder %s4747_s21, %s6420_s28 }
 0x92a   : > { %p4749_p7 = pnand %p4748_p4, %p4929_p5 }
 0x92b   : > { %p4754_p11 = por %p4753_p10, %p4752_p9 }
 0x92c   : > { %p4750_p8 = pneg %p4749_p7 }
 0x92d   : > { %p4756_p13 = por %p4755_p12, %p4754_p11 }
 0x92f   : > { %p4757_p0 = pnand %p4756_p13, %p4750_p8 }
 0x931   : > { %4760 = shalt.err (!%p4757_p0)
}
 0x932   : > { %4459 = dma.vmem_to_hbm [thread:$0]  (%p4929_p5), %s6422_s19, 128, %s6420_s28, %s4133_s30  }
 0x933 PF: > { %s6552_s29 = sld [smem:[#allocation7_spill]]  ;;  %s6553_s25 = sld [smem:[#allocation5_spill]] }
 0x939   : > { %p4465_p1 = scmp.ge.s32.totalorder %s6552_s29, 2  ;;  %s4159_s27 = sand.u32 1, %s6553_s25  }
 0x93a   : > { %s4160_s24 = scalar_lea.sflag [#allocation3], %s4159_s27 }
 0x93b   : > { %p4462_p2 = pnand %p4465_p1, %p4933_p6 }
 0x93d   : > { %4778 = dma.done.wait (!%p4462_p2), %s4160_s24, 128  }
 0x93e   : > { %4780 = vsyncadd (!%p4462_p2), %s4160_s24, 4294967168  ;;  %s6555_s24 = sld [smem:[#allocation8_spill]]  ;;  %s6556_s17 = sld [smem:[#allocation6_spill]] }
 0x93f   : > { %s6557_s23 = sld [smem:[#allocation9_spill]]  ;;  %s6558_s21 = smov %s4787_s22 }
 0x944   : > { %p26_p3 = scmp.ge.s32.totalorder %s6555_s24, 4   ;;  %s6559_s22 = smov %s6556_s17 }
 0x946   :  { %28 = sbr.rel (!%p26_p3) target bundleno = 5 (0x5), region = 123 }
 0x94d   :  { %4165 = vsyncpa [#allocation3], 1 }
 0x94e   :  { %4167 = vsyncpa [#allocation3 + $0x1], 1 }

</bundles_post_ra>
